<compile_context>
chip_gen: v6e
topology: v6e:2x2x1
jax: 0.10.0
libtpu: 0.0.40
codegen_flags: <defaults>
</compile_context>

<pallas_src>
import jax
import jax.numpy as jnp
from jax.experimental import pallas as pl
from jax.experimental.pallas import tpu as pltpu

VOCAB = 21
EMB = 24          # embedding_size == LSTM input_size
HID = 64          # LSTM hidden_size
SEQ = 18          # linear2 maps 18 -> 128, so the sequence length must be 18


def cnn_lstm_kernel(emb_ref,                       # (L*B, E) time-major f32
                    wih_f_ref, whh_f_ref, b_f_ref,  # (E,4H) (H,4H) (1,4H)  gate order [i,f,o,g]
                    wih_b_ref, whh_b_ref, b_b_ref,
                    w1f_ref, w1b_ref, b1_ref,       # (1,H) (1,H) (1,1)
                    w2_ref, b2_ref,                 # (L,128) (1,128)
                    w3_ref, b3_ref,                 # (128,1) (1,1)
                    out_ref,                        # (B, 1)
                    xf_scr, xb_scr,                 # (L*B, 4H) hoisted input projections
                    y1f_scr, y1b_scr):              # (B, L) per-direction linear1 partials
    H = whh_f_ref.shape[0]
    B, L = y1f_scr.shape

    # --- hoisted input projections (one big GEMM per direction, bias folded) ---
    emb = emb_ref[...]                                               # (L*B, E)
    xf_scr[...] = (jnp.dot(emb, wih_f_ref[...],
                           preferred_element_type=jnp.float32) + b_f_ref[...])
    xb_scr[...] = (jnp.dot(emb, wih_b_ref[...],
                           preferred_element_type=jnp.float32) + b_b_ref[...])

    whh_f = whh_f_ref[...]                                           # (H, 4H)
    whh_b = whh_b_ref[...]
    w1f = w1f_ref[...]                                               # (1, H)
    w1b = w1b_ref[...]

    def cell(x_gates, h, c, whh):
        # gate order [i, f, o, g]: one contiguous sigmoid slice + one tanh slice
        gates = x_gates + jnp.dot(h, whh, preferred_element_type=jnp.float32)
        sig = jax.nn.sigmoid(gates[:, :3 * H])                       # i | f | o
        gg = jnp.tanh(gates[:, 3 * H:])                              # g
        c_new = sig[:, H:2 * H] * c + sig[:, :H] * gg
        h_new = sig[:, 2 * H:3 * H] * jnp.tanh(c_new)
        return h_new, c_new

    zeros = jnp.zeros((B, H), jnp.float32)
    h_f, c_f = zeros, zeros
    h_b, c_b = zeros, zeros

    # interleaved fwd/bwd recurrence; linear1 fused per step
    for t in range(L):                      # L static -> unrolled
        tb = L - 1 - t
        xg_f = xf_scr[t * B:(t + 1) * B, :]                          # (B, 4H)
        xg_b = xb_scr[tb * B:(tb + 1) * B, :]
        h_f, c_f = cell(xg_f, h_f, c_f, whh_f)
        h_b, c_b = cell(xg_b, h_b, c_b, whh_b)
        # fused linear1 contribution (VPU mul + cross-lane reduce, no N=1 matmul)
        y1f_scr[:, t:t + 1] = jnp.sum(h_f * w1f, axis=-1, keepdims=True)
        y1b_scr[:, tb:tb + 1] = jnp.sum(h_b * w1b, axis=-1, keepdims=True)

    # linear1 bias + tanh, then squeeze(2) is implicit: y1 is already (B, L)
    y1 = jnp.tanh(y1f_scr[...] + y1b_scr[...] + b1_ref[...])         # (B, 18)

    # linear2(18 -> 128) + tanh
    y2 = jnp.tanh(jnp.dot(y1, w2_ref[...],
                          preferred_element_type=jnp.float32) + b2_ref[...])
    # linear3(128 -> 1) + tanh
    y3 = jnp.tanh(jnp.dot(y2, w3_ref[...],
                          preferred_element_type=jnp.float32) + b3_ref[...])
    out_ref[...] = y3


def init_params(key):
    ks = jax.random.split(key, 15)

    def u(k, shape, fan_in):
        bound = 1.0 / float(fan_in) ** 0.5
        return jax.random.uniform(k, shape, jnp.float32, -bound, bound)

    H = HID
    emb = jax.random.normal(ks[0], (VOCAB, EMB), jnp.float32)
    emb = emb.at[0].set(0.0)                 # padding_idx=0 row is zeros

    p = dict(
        embedding=emb,
        # bidirectional LSTM, layer 0; PyTorch gate order i,f,g,o; transposed
        wih_f_T=u(ks[1], (EMB, 4 * H), H),
        whh_f_T=u(ks[2], (H, 4 * H), H),
        b_f=(u(ks[3], (4 * H,), H) + u(ks[4], (4 * H,), H))[None, :],   # b_ih + b_hh
        wih_b_T=u(ks[5], (EMB, 4 * H), H),
        whh_b_T=u(ks[6], (H, 4 * H), H),
        b_b=(u(ks[7], (4 * H,), H) + u(ks[8], (4 * H,), H))[None, :],
        # linear1: 2H -> 1
        w1_T=u(ks[9], (2 * H, 1), 2 * H),
        b1=u(ks[10], (1, 1), 2 * H),
        # linear2: 18 -> 128
        w2_T=u(ks[11], (SEQ, 128), SEQ),
        b2=u(ks[12], (1, 128), SEQ),
        # linear3: 128 -> 1
        w3_T=u(ks[13], (128, 1), 128),
        b3=u(ks[14], (1, 1), 128),
    )
    return p


def _reorder_gates(w):
    """Permute 4H gate columns from PyTorch [i,f,g,o] to kernel [i,f,o,g]."""
    H = HID
    return jnp.concatenate(
        [w[..., :2 * H], w[..., 3 * H:4 * H], w[..., 2 * H:3 * H]], axis=-1)


def cnn_lstm_forward(x_tokens, p):
    B, L = x_tokens.shape
    B_pad = max(8, ((B + 7) // 8) * 8)       # fill f32 sublanes / MXU rows

    # embedding gather (data-dependent) in plain JAX, time-major & batch-padded
    x_p = jnp.pad(x_tokens, ((0, B_pad - B), (0, 0)))       # pad with token 0
    emb_tm = jnp.take(p["embedding"], x_p.T, axis=0)         # (L, B_pad, E)
    emb_tm = emb_tm.reshape(L * B_pad, EMB)

    # gate-column permutation i,f,g,o -> i,f,o,g (consistent with kernel slices)
    wih_f = _reorder_gates(p["wih_f_T"])
    whh_f = _reorder_gates(p["whh_f_T"])
    b_f = _reorder_gates(p["b_f"])
    wih_b = _reorder_gates(p["wih_b_T"])
    whh_b = _reorder_gates(p["whh_b_T"])
    b_b = _reorder_gates(p["b_b"])

    # split linear1 weight into fwd/bwd halves as row vectors for fused dot
    w1f = p["w1_T"][:HID, 0][None, :]        # (1, H)
    w1b = p["w1_T"][HID:, 0][None, :]        # (1, H)

    args = (emb_tm, wih_f, whh_f, b_f, wih_b, whh_b, b_b,
            w1f, w1b, p["b1"], p["w2_T"], p["b2"], p["w3_T"], p["b3"])

    vmem = lambda: pl.BlockSpec(memory_space=pltpu.MemorySpace.VMEM)
    out = pl.pallas_call(
        cnn_lstm_kernel,
        out_shape=jax.ShapeDtypeStruct((B_pad, 1), jnp.float32),
        in_specs=[vmem() for _ in args],
        out_specs=vmem(),
        scratch_shapes=[
            pltpu.VMEM((L * B_pad, 4 * HID), jnp.float32),   # xf_scr
            pltpu.VMEM((L * B_pad, 4 * HID), jnp.float32),   # xb_scr
            pltpu.VMEM((B_pad, L), jnp.float32),             # y1f_scr
            pltpu.VMEM((B_pad, L), jnp.float32),             # y1b_scr
        ],
    )(*args)
    return out[:B, 0]                         # final .squeeze(1) -> (B,)


def reference_forward(x_tokens, p):
    """Pure-JAX reference replicating the PyTorch forward (original gate order)."""
    emb = jnp.take(p["embedding"], x_tokens, axis=0)
    B, L, E = emb.shape
    H = HID

    def run_dir(wih, whh, b, reverse):
        def cell(carry, x_t):
            h, c = carry
            g = x_t @ wih + h @ whh + b[0]
            i = jax.nn.sigmoid(g[:, :H])
            f = jax.nn.sigmoid(g[:, H:2 * H])
            gg = jnp.tanh(g[:, 2 * H:3 * H])
            o = jax.nn.sigmoid(g[:, 3 * H:])
            c = f * c + i * gg
            h = o * jnp.tanh(c)
            return (h, c), h
        xs = jnp.swapaxes(emb, 0, 1)          # (L, B, E)
        if reverse:
            xs = xs[::-1]
        (_, _), hs = jax.lax.scan(cell, (jnp.zeros((B, H)), jnp.zeros((B, H))), xs)
        if reverse:
            hs = hs[::-1]
        return jnp.swapaxes(hs, 0, 1)         # (B, L, H)

    out = jnp.concatenate(
        [run_dir(p["wih_f_T"], p["whh_f_T"], p["b_f"], False),
         run_dir(p["wih_b_T"], p["whh_b_T"], p["b_b"], True)], axis=-1)
    y1 = jnp.tanh(out @ p["w1_T"] + p["b1"][0])[..., 0]        # (B, L)
    y2 = jnp.tanh(y1 @ p["w2_T"] + p["b2"][0])                 # (B, 128)
    y3 = jnp.tanh(y2 @ p["w3_T"] + p["b3"][0])                 # (B, 1)
    return y3[:, 0]


if __name__ == "__main__":
    key = jax.random.PRNGKey(0)
    pkey, xkey = jax.random.split(key)
    params = init_params(pkey)

    B = 2
    x = jax.random.randint(xkey, (B, SEQ), 0, VOCAB, dtype=jnp.int32)  # (2, 18) tokens

    y = cnn_lstm_forward(x, params)
    y = jax.block_until_ready(y)

    y_ref = jax.block_until_ready(reference_forward(x, params))
    assert y.shape == (B,), y.shape
    assert jnp.allclose(y, y_ref, rtol=1e-2, atol=1e-2), (y, y_ref)
    print("KERNEL_OK")
</pallas_src>

<mosaic_0001>
module attributes {stable_mosaic.version = 11 : i64} {
  func.func @cnn_lstm_kernel(%arg0: memref<144x24xf32, #tpu.memory_space<vmem>>, %arg1: memref<24x256xf32, #tpu.memory_space<vmem>>, %arg2: memref<64x256xf32, #tpu.memory_space<vmem>>, %arg3: memref<1x256xf32, #tpu.memory_space<vmem>>, %arg4: memref<24x256xf32, #tpu.memory_space<vmem>>, %arg5: memref<64x256xf32, #tpu.memory_space<vmem>>, %arg6: memref<1x256xf32, #tpu.memory_space<vmem>>, %arg7: memref<1x64xf32, #tpu.memory_space<vmem>>, %arg8: memref<1x64xf32, #tpu.memory_space<vmem>>, %arg9: memref<1x1xf32, #tpu.memory_space<vmem>>, %arg10: memref<18x128xf32, #tpu.memory_space<vmem>>, %arg11: memref<1x128xf32, #tpu.memory_space<vmem>>, %arg12: memref<128x1xf32, #tpu.memory_space<vmem>>, %arg13: memref<1x1xf32, #tpu.memory_space<vmem>>, %arg14: memref<8x1xf32, #tpu.memory_space<vmem>>, %arg15: memref<144x256xf32, #tpu.memory_space<vmem>>, %arg16: memref<144x256xf32, #tpu.memory_space<vmem>>, %arg17: memref<8x18xf32, #tpu.memory_space<vmem>>, %arg18: memref<8x18xf32, #tpu.memory_space<vmem>>) attributes {dimension_semantics = [], scalar_prefetch = 0 : i64, scratch_operands = 4 : i64, tpu.core_type = #tpu.core_type<tc>} {
    %c0 = arith.constant 0 : index
    %c0_0 = arith.constant 0 : index
    %0 = vector.load %arg0[%c0, %c0_0] : memref<144x24xf32, #tpu.memory_space<vmem>>, vector<144x24xf32>
    %c0_1 = arith.constant 0 : index
    %c0_2 = arith.constant 0 : index
    %1 = vector.load %arg1[%c0_1, %c0_2] : memref<24x256xf32, #tpu.memory_space<vmem>>, vector<24x256xf32>
    %cst = arith.constant dense<0.000000e+00> : vector<144x256xf32>
    %2 = tpu.matmul %0, %1, %cst {dimension_numbers = #tpu.dot_dimension_numbers<[1], [0], [0], [1], [0, 0, 1, 1], [], []>} : vector<144x24xf32>, vector<24x256xf32>, vector<144x256xf32> -> vector<144x256xf32>
    %c0_3 = arith.constant 0 : index
    %c0_4 = arith.constant 0 : index
    %3 = vector.load %arg3[%c0_3, %c0_4] : memref<1x256xf32, #tpu.memory_space<vmem>>, vector<1x256xf32>
    %4 = vector.broadcast %3 : vector<1x256xf32> to vector<144x256xf32>
    %5 = arith.addf %2, %4 : vector<144x256xf32>
    %c0_5 = arith.constant 0 : index
    %c0_6 = arith.constant 0 : index
    %6 = vector.load %arg15[%c0_5, %c0_6] : memref<144x256xf32, #tpu.memory_space<vmem>>, vector<144x256xf32>
    tpu.vector_store %arg15[%c0_5, %c0_6], %5 {strides = array<i32>} : memref<144x256xf32, #tpu.memory_space<vmem>>, vector<144x256xf32>,
    %c0_7 = arith.constant 0 : index
    %c0_8 = arith.constant 0 : index
    %7 = vector.load %arg4[%c0_7, %c0_8] : memref<24x256xf32, #tpu.memory_space<vmem>>, vector<24x256xf32>
    %cst_9 = arith.constant dense<0.000000e+00> : vector<144x256xf32>
    %8 = tpu.matmul %0, %7, %cst_9 {dimension_numbers = #tpu.dot_dimension_numbers<[1], [0], [0], [1], [0, 0, 1, 1], [], []>} : vector<144x24xf32>, vector<24x256xf32>, vector<144x256xf32> -> vector<144x256xf32>
    %c0_10 = arith.constant 0 : index
    %c0_11 = arith.constant 0 : index
    %9 = vector.load %arg6[%c0_10, %c0_11] : memref<1x256xf32, #tpu.memory_space<vmem>>, vector<1x256xf32>
    %10 = vector.broadcast %9 : vector<1x256xf32> to vector<144x256xf32>
    %11 = arith.addf %8, %10 : vector<144x256xf32>
    %c0_12 = arith.constant 0 : index
    %c0_13 = arith.constant 0 : index
    %12 = vector.load %arg16[%c0_12, %c0_13] : memref<144x256xf32, #tpu.memory_space<vmem>>, vector<144x256xf32>
    tpu.vector_store %arg16[%c0_12, %c0_13], %11 {strides = array<i32>} : memref<144x256xf32, #tpu.memory_space<vmem>>, vector<144x256xf32>,
    %c0_14 = arith.constant 0 : index
    %c0_15 = arith.constant 0 : index
    %13 = vector.load %arg2[%c0_14, %c0_15] : memref<64x256xf32, #tpu.memory_space<vmem>>, vector<64x256xf32>
    %c0_16 = arith.constant 0 : index
    %c0_17 = arith.constant 0 : index
    %14 = vector.load %arg5[%c0_16, %c0_17] : memref<64x256xf32, #tpu.memory_space<vmem>>, vector<64x256xf32>
    %c0_18 = arith.constant 0 : index
    %c0_19 = arith.constant 0 : index
    %15 = vector.load %arg7[%c0_18, %c0_19] : memref<1x64xf32, #tpu.memory_space<vmem>>, vector<1x64xf32>
    %c0_20 = arith.constant 0 : index
    %c0_21 = arith.constant 0 : index
    %16 = vector.load %arg8[%c0_20, %c0_21] : memref<1x64xf32, #tpu.memory_space<vmem>>, vector<1x64xf32>
    %cst_22 = arith.constant 0.000000e+00 : f32
    %17 = vector.broadcast %cst_22 : f32 to vector<8x64xf32>
    %c0_23 = arith.constant 0 : index
    %c0_24 = arith.constant 0 : index
    %18 = vector.load %arg15[%c0_23, %c0_24] : memref<144x256xf32, #tpu.memory_space<vmem>>, vector<8x256xf32>
    %c136 = arith.constant 136 : index
    %c0_25 = arith.constant 0 : index
    %19 = vector.load %arg16[%c136, %c0_25] : memref<144x256xf32, #tpu.memory_space<vmem>>, vector<8x256xf32>
    %cst_26 = arith.constant dense<0.000000e+00> : vector<8x256xf32>
    %20 = tpu.matmul %17, %13, %cst_26 {dimension_numbers = #tpu.dot_dimension_numbers<[1], [0], [0], [1], [0, 0, 1, 1], [], []>} : vector<8x64xf32>, vector<64x256xf32>, vector<8x256xf32> -> vector<8x256xf32>
    %21 = arith.addf %18, %20 : vector<8x256xf32>
    %22 = vector.extract_strided_slice %21 {offsets = [0, 0], sizes = [8, 192], strides = [1, 1]} : vector<8x256xf32> to vector<8x192xf32>
    %23 = arith.negf %22 : vector<8x192xf32>
    %24 = math.exp %23 : vector<8x192xf32>
    %cst_27 = arith.constant 1.000000e+00 : f32
    %25 = vector.broadcast %cst_27 : f32 to vector<8x192xf32>
    %26 = arith.addf %25, %24 : vector<8x192xf32>
    %27 = arith.divf %25, %26 : vector<8x192xf32>
    %28 = vector.extract_strided_slice %21 {offsets = [0, 192], sizes = [8, 64], strides = [1, 1]} : vector<8x256xf32> to vector<8x64xf32>
    %29 = math.tanh %28 : vector<8x64xf32>
    %30 = vector.extract_strided_slice %27 {offsets = [0, 64], sizes = [8, 64], strides = [1, 1]} : vector<8x192xf32> to vector<8x64xf32>
    %31 = arith.mulf %30, %17 : vector<8x64xf32>
    %32 = vector.extract_strided_slice %27 {offsets = [0, 0], sizes = [8, 64], strides = [1, 1]} : vector<8x192xf32> to vector<8x64xf32>
    %33 = arith.mulf %32, %29 : vector<8x64xf32>
    %34 = arith.addf %31, %33 : vector<8x64xf32>
    %35 = vector.extract_strided_slice %27 {offsets = [0, 128], sizes = [8, 64], strides = [1, 1]} : vector<8x192xf32> to vector<8x64xf32>
    %36 = math.tanh %34 : vector<8x64xf32>
    %37 = arith.mulf %35, %36 : vector<8x64xf32>
    %cst_28 = arith.constant dense<0.000000e+00> : vector<8x256xf32>
    %38 = tpu.matmul %17, %14, %cst_28 {dimension_numbers = #tpu.dot_dimension_numbers<[1], [0], [0], [1], [0, 0, 1, 1], [], []>} : vector<8x64xf32>, vector<64x256xf32>, vector<8x256xf32> -> vector<8x256xf32>
    %39 = arith.addf %19, %38 : vector<8x256xf32>
    %40 = vector.extract_strided_slice %39 {offsets = [0, 0], sizes = [8, 192], strides = [1, 1]} : vector<8x256xf32> to vector<8x192xf32>
    %41 = arith.negf %40 : vector<8x192xf32>
    %42 = math.exp %41 : vector<8x192xf32>
    %cst_29 = arith.constant 1.000000e+00 : f32
    %43 = vector.broadcast %cst_29 : f32 to vector<8x192xf32>
    %44 = arith.addf %43, %42 : vector<8x192xf32>
    %45 = arith.divf %43, %44 : vector<8x192xf32>
    %46 = vector.extract_strided_slice %39 {offsets = [0, 192], sizes = [8, 64], strides = [1, 1]} : vector<8x256xf32> to vector<8x64xf32>
    %47 = math.tanh %46 : vector<8x64xf32>
    %48 = vector.extract_strided_slice %45 {offsets = [0, 64], sizes = [8, 64], strides = [1, 1]} : vector<8x192xf32> to vector<8x64xf32>
    %49 = arith.mulf %48, %17 : vector<8x64xf32>
    %50 = vector.extract_strided_slice %45 {offsets = [0, 0], sizes = [8, 64], strides = [1, 1]} : vector<8x192xf32> to vector<8x64xf32>
    %51 = arith.mulf %50, %47 : vector<8x64xf32>
    %52 = arith.addf %49, %51 : vector<8x64xf32>
    %53 = vector.extract_strided_slice %45 {offsets = [0, 128], sizes = [8, 64], strides = [1, 1]} : vector<8x192xf32> to vector<8x64xf32>
    %54 = math.tanh %52 : vector<8x64xf32>
    %55 = arith.mulf %53, %54 : vector<8x64xf32>
    %56 = vector.broadcast %15 : vector<1x64xf32> to vector<8x64xf32>
    %57 = arith.mulf %37, %56 : vector<8x64xf32>
    %cst_30 = arith.constant dense<0.000000e+00> : vector<8xf32>
    %58 = vector.multi_reduction <add>, %57, %cst_30 [1] : vector<8x64xf32> to vector<8xf32>
    %59 = vector.shape_cast %58 : vector<8xf32> to vector<8x1xf32>
    %c0_31 = arith.constant 0 : index
    %c0_32 = arith.constant 0 : index
    %60 = vector.load %arg17[%c0_31, %c0_32] : memref<8x18xf32, #tpu.memory_space<vmem>>, vector<8x1xf32>
    tpu.vector_store %arg17[%c0_31, %c0_32], %59 {strides = array<i32>} : memref<8x18xf32, #tpu.memory_space<vmem>>, vector<8x1xf32>,
    %61 = vector.broadcast %16 : vector<1x64xf32> to vector<8x64xf32>
    %62 = arith.mulf %55, %61 : vector<8x64xf32>
    %cst_33 = arith.constant dense<0.000000e+00> : vector<8xf32>
    %63 = vector.multi_reduction <add>, %62, %cst_33 [1] : vector<8x64xf32> to vector<8xf32>
    %64 = vector.shape_cast %63 : vector<8xf32> to vector<8x1xf32>
    %c0_34 = arith.constant 0 : index
    %c17 = arith.constant 17 : index
    %65 = vector.load %arg18[%c0_34, %c17] : memref<8x18xf32, #tpu.memory_space<vmem>>, vector<8x1xf32>
    tpu.vector_store %arg18[%c0_34, %c17], %64 {strides = array<i32>} : memref<8x18xf32, #tpu.memory_space<vmem>>, vector<8x1xf32>,
    %c8 = arith.constant 8 : index
    %c0_35 = arith.constant 0 : index
    %66 = vector.load %arg15[%c8, %c0_35] : memref<144x256xf32, #tpu.memory_space<vmem>>, vector<8x256xf32>
    %c128 = arith.constant 128 : index
    %c0_36 = arith.constant 0 : index
    %67 = vector.load %arg16[%c128, %c0_36] : memref<144x256xf32, #tpu.memory_space<vmem>>, vector<8x256xf32>
    %cst_37 = arith.constant dense<0.000000e+00> : vector<8x256xf32>
    %68 = tpu.matmul %37, %13, %cst_37 {dimension_numbers = #tpu.dot_dimension_numbers<[1], [0], [0], [1], [0, 0, 1, 1], [], []>} : vector<8x64xf32>, vector<64x256xf32>, vector<8x256xf32> -> vector<8x256xf32>
    %69 = arith.addf %66, %68 : vector<8x256xf32>
    %70 = vector.extract_strided_slice %69 {offsets = [0, 0], sizes = [8, 192], strides = [1, 1]} : vector<8x256xf32> to vector<8x192xf32>
    %71 = arith.negf %70 : vector<8x192xf32>
    %72 = math.exp %71 : vector<8x192xf32>
    %cst_38 = arith.constant 1.000000e+00 : f32
    %73 = vector.broadcast %cst_38 : f32 to vector<8x192xf32>
    %74 = arith.addf %73, %72 : vector<8x192xf32>
    %75 = arith.divf %73, %74 : vector<8x192xf32>
    %76 = vector.extract_strided_slice %69 {offsets = [0, 192], sizes = [8, 64], strides = [1, 1]} : vector<8x256xf32> to vector<8x64xf32>
    %77 = math.tanh %76 : vector<8x64xf32>
    %78 = vector.extract_strided_slice %75 {offsets = [0, 64], sizes = [8, 64], strides = [1, 1]} : vector<8x192xf32> to vector<8x64xf32>
    %79 = arith.mulf %78, %34 : vector<8x64xf32>
    %80 = vector.extract_strided_slice %75 {offsets = [0, 0], sizes = [8, 64], strides = [1, 1]} : vector<8x192xf32> to vector<8x64xf32>
    %81 = arith.mulf %80, %77 : vector<8x64xf32>
    %82 = arith.addf %79, %81 : vector<8x64xf32>
    %83 = vector.extract_strided_slice %75 {offsets = [0, 128], sizes = [8, 64], strides = [1, 1]} : vector<8x192xf32> to vector<8x64xf32>
    %84 = math.tanh %82 : vector<8x64xf32>
    %85 = arith.mulf %83, %84 : vector<8x64xf32>
    %cst_39 = arith.constant dense<0.000000e+00> : vector<8x256xf32>
    %86 = tpu.matmul %55, %14, %cst_39 {dimension_numbers = #tpu.dot_dimension_numbers<[1], [0], [0], [1], [0, 0, 1, 1], [], []>} : vector<8x64xf32>, vector<64x256xf32>, vector<8x256xf32> -> vector<8x256xf32>
    %87 = arith.addf %67, %86 : vector<8x256xf32>
    %88 = vector.extract_strided_slice %87 {offsets = [0, 0], sizes = [8, 192], strides = [1, 1]} : vector<8x256xf32> to vector<8x192xf32>
    %89 = arith.negf %88 : vector<8x192xf32>
    %90 = math.exp %89 : vector<8x192xf32>
    %cst_40 = arith.constant 1.000000e+00 : f32
    %91 = vector.broadcast %cst_40 : f32 to vector<8x192xf32>
    %92 = arith.addf %91, %90 : vector<8x192xf32>
    %93 = arith.divf %91, %92 : vector<8x192xf32>
    %94 = vector.extract_strided_slice %87 {offsets = [0, 192], sizes = [8, 64], strides = [1, 1]} : vector<8x256xf32> to vector<8x64xf32>
    %95 = math.tanh %94 : vector<8x64xf32>
    %96 = vector.extract_strided_slice %93 {offsets = [0, 64], sizes = [8, 64], strides = [1, 1]} : vector<8x192xf32> to vector<8x64xf32>
    %97 = arith.mulf %96, %52 : vector<8x64xf32>
    %98 = vector.extract_strided_slice %93 {offsets = [0, 0], sizes = [8, 64], strides = [1, 1]} : vector<8x192xf32> to vector<8x64xf32>
    %99 = arith.mulf %98, %95 : vector<8x64xf32>
    %100 = arith.addf %97, %99 : vector<8x64xf32>
    %101 = vector.extract_strided_slice %93 {offsets = [0, 128], sizes = [8, 64], strides = [1, 1]} : vector<8x192xf32> to vector<8x64xf32>
    %102 = math.tanh %100 : vector<8x64xf32>
    %103 = arith.mulf %101, %102 : vector<8x64xf32>
    %104 = vector.broadcast %15 : vector<1x64xf32> to vector<8x64xf32>
    %105 = arith.mulf %85, %104 : vector<8x64xf32>
    %cst_41 = arith.constant dense<0.000000e+00> : vector<8xf32>
    %106 = vector.multi_reduction <add>, %105, %cst_41 [1] : vector<8x64xf32> to vector<8xf32>
    %107 = vector.shape_cast %106 : vector<8xf32> to vector<8x1xf32>
    %c0_42 = arith.constant 0 : index
    %c1 = arith.constant 1 : index
    %108 = vector.load %arg17[%c0_42, %c1] : memref<8x18xf32, #tpu.memory_space<vmem>>, vector<8x1xf32>
    tpu.vector_store %arg17[%c0_42, %c1], %107 {strides = array<i32>} : memref<8x18xf32, #tpu.memory_space<vmem>>, vector<8x1xf32>,
    %109 = vector.broadcast %16 : vector<1x64xf32> to vector<8x64xf32>
    %110 = arith.mulf %103, %109 : vector<8x64xf32>
    %cst_43 = arith.constant dense<0.000000e+00> : vector<8xf32>
    %111 = vector.multi_reduction <add>, %110, %cst_43 [1] : vector<8x64xf32> to vector<8xf32>
    %112 = vector.shape_cast %111 : vector<8xf32> to vector<8x1xf32>
    %c0_44 = arith.constant 0 : index
    %c16 = arith.constant 16 : index
    %113 = vector.load %arg18[%c0_44, %c16] : memref<8x18xf32, #tpu.memory_space<vmem>>, vector<8x1xf32>
    tpu.vector_store %arg18[%c0_44, %c16], %112 {strides = array<i32>} : memref<8x18xf32, #tpu.memory_space<vmem>>, vector<8x1xf32>,
    %c16_45 = arith.constant 16 : index
    %c0_46 = arith.constant 0 : index
    %114 = vector.load %arg15[%c16_45, %c0_46] : memref<144x256xf32, #tpu.memory_space<vmem>>, vector<8x256xf32>
    %c120 = arith.constant 120 : index
    %c0_47 = arith.constant 0 : index
    %115 = vector.load %arg16[%c120, %c0_47] : memref<144x256xf32, #tpu.memory_space<vmem>>, vector<8x256xf32>
    %cst_48 = arith.constant dense<0.000000e+00> : vector<8x256xf32>
    %116 = tpu.matmul %85, %13, %cst_48 {dimension_numbers = #tpu.dot_dimension_numbers<[1], [0], [0], [1], [0, 0, 1, 1], [], []>} : vector<8x64xf32>, vector<64x256xf32>, vector<8x256xf32> -> vector<8x256xf32>
    %117 = arith.addf %114, %116 : vector<8x256xf32>
    %118 = vector.extract_strided_slice %117 {offsets = [0, 0], sizes = [8, 192], strides = [1, 1]} : vector<8x256xf32> to vector<8x192xf32>
    %119 = arith.negf %118 : vector<8x192xf32>
    %120 = math.exp %119 : vector<8x192xf32>
    %cst_49 = arith.constant 1.000000e+00 : f32
    %121 = vector.broadcast %cst_49 : f32 to vector<8x192xf32>
    %122 = arith.addf %121, %120 : vector<8x192xf32>
    %123 = arith.divf %121, %122 : vector<8x192xf32>
    %124 = vector.extract_strided_slice %117 {offsets = [0, 192], sizes = [8, 64], strides = [1, 1]} : vector<8x256xf32> to vector<8x64xf32>
    %125 = math.tanh %124 : vector<8x64xf32>
    %126 = vector.extract_strided_slice %123 {offsets = [0, 64], sizes = [8, 64], strides = [1, 1]} : vector<8x192xf32> to vector<8x64xf32>
    %127 = arith.mulf %126, %82 : vector<8x64xf32>
    %128 = vector.extract_strided_slice %123 {offsets = [0, 0], sizes = [8, 64], strides = [1, 1]} : vector<8x192xf32> to vector<8x64xf32>
    %129 = arith.mulf %128, %125 : vector<8x64xf32>
    %130 = arith.addf %127, %129 : vector<8x64xf32>
    %131 = vector.extract_strided_slice %123 {offsets = [0, 128], sizes = [8, 64], strides = [1, 1]} : vector<8x192xf32> to vector<8x64xf32>
    %132 = math.tanh %130 : vector<8x64xf32>
    %133 = arith.mulf %131, %132 : vector<8x64xf32>
    %cst_50 = arith.constant dense<0.000000e+00> : vector<8x256xf32>
    %134 = tpu.matmul %103, %14, %cst_50 {dimension_numbers = #tpu.dot_dimension_numbers<[1], [0], [0], [1], [0, 0, 1, 1], [], []>} : vector<8x64xf32>, vector<64x256xf32>, vector<8x256xf32> -> vector<8x256xf32>
    %135 = arith.addf %115, %134 : vector<8x256xf32>
    %136 = vector.extract_strided_slice %135 {offsets = [0, 0], sizes = [8, 192], strides = [1, 1]} : vector<8x256xf32> to vector<8x192xf32>
    %137 = arith.negf %136 : vector<8x192xf32>
    %138 = math.exp %137 : vector<8x192xf32>
    %cst_51 = arith.constant 1.000000e+00 : f32
    %139 = vector.broadcast %cst_51 : f32 to vector<8x192xf32>
    %140 = arith.addf %139, %138 : vector<8x192xf32>
    %141 = arith.divf %139, %140 : vector<8x192xf32>
    %142 = vector.extract_strided_slice %135 {offsets = [0, 192], sizes = [8, 64], strides = [1, 1]} : vector<8x256xf32> to vector<8x64xf32>
    %143 = math.tanh %142 : vector<8x64xf32>
    %144 = vector.extract_strided_slice %141 {offsets = [0, 64], sizes = [8, 64], strides = [1, 1]} : vector<8x192xf32> to vector<8x64xf32>
    %145 = arith.mulf %144, %100 : vector<8x64xf32>
    %146 = vector.extract_strided_slice %141 {offsets = [0, 0], sizes = [8, 64], strides = [1, 1]} : vector<8x192xf32> to vector<8x64xf32>
    %147 = arith.mulf %146, %143 : vector<8x64xf32>
    %148 = arith.addf %145, %147 : vector<8x64xf32>
    %149 = vector.extract_strided_slice %141 {offsets = [0, 128], sizes = [8, 64], strides = [1, 1]} : vector<8x192xf32> to vector<8x64xf32>
    %150 = math.tanh %148 : vector<8x64xf32>
    %151 = arith.mulf %149, %150 : vector<8x64xf32>
    %152 = vector.broadcast %15 : vector<1x64xf32> to vector<8x64xf32>
    %153 = arith.mulf %133, %152 : vector<8x64xf32>
    %cst_52 = arith.constant dense<0.000000e+00> : vector<8xf32>
    %154 = vector.multi_reduction <add>, %153, %cst_52 [1] : vector<8x64xf32> to vector<8xf32>
    %155 = vector.shape_cast %154 : vector<8xf32> to vector<8x1xf32>
    %c0_53 = arith.constant 0 : index
    %c2 = arith.constant 2 : index
    %156 = vector.load %arg17[%c0_53, %c2] : memref<8x18xf32, #tpu.memory_space<vmem>>, vector<8x1xf32>
    tpu.vector_store %arg17[%c0_53, %c2], %155 {strides = array<i32>} : memref<8x18xf32, #tpu.memory_space<vmem>>, vector<8x1xf32>,
    %157 = vector.broadcast %16 : vector<1x64xf32> to vector<8x64xf32>
    %158 = arith.mulf %151, %157 : vector<8x64xf32>
    %cst_54 = arith.constant dense<0.000000e+00> : vector<8xf32>
    %159 = vector.multi_reduction <add>, %158, %cst_54 [1] : vector<8x64xf32> to vector<8xf32>
    %160 = vector.shape_cast %159 : vector<8xf32> to vector<8x1xf32>
    %c0_55 = arith.constant 0 : index
    %c15 = arith.constant 15 : index
    %161 = vector.load %arg18[%c0_55, %c15] : memref<8x18xf32, #tpu.memory_space<vmem>>, vector<8x1xf32>
    tpu.vector_store %arg18[%c0_55, %c15], %160 {strides = array<i32>} : memref<8x18xf32, #tpu.memory_space<vmem>>, vector<8x1xf32>,
    %c24 = arith.constant 24 : index
    %c0_56 = arith.constant 0 : index
    %162 = vector.load %arg15[%c24, %c0_56] : memref<144x256xf32, #tpu.memory_space<vmem>>, vector<8x256xf32>
    %c112 = arith.constant 112 : index
    %c0_57 = arith.constant 0 : index
    %163 = vector.load %arg16[%c112, %c0_57] : memref<144x256xf32, #tpu.memory_space<vmem>>, vector<8x256xf32>
    %cst_58 = arith.constant dense<0.000000e+00> : vector<8x256xf32>
    %164 = tpu.matmul %133, %13, %cst_58 {dimension_numbers = #tpu.dot_dimension_numbers<[1], [0], [0], [1], [0, 0, 1, 1], [], []>} : vector<8x64xf32>, vector<64x256xf32>, vector<8x256xf32> -> vector<8x256xf32>
    %165 = arith.addf %162, %164 : vector<8x256xf32>
    %166 = vector.extract_strided_slice %165 {offsets = [0, 0], sizes = [8, 192], strides = [1, 1]} : vector<8x256xf32> to vector<8x192xf32>
    %167 = arith.negf %166 : vector<8x192xf32>
    %168 = math.exp %167 : vector<8x192xf32>
    %cst_59 = arith.constant 1.000000e+00 : f32
    %169 = vector.broadcast %cst_59 : f32 to vector<8x192xf32>
    %170 = arith.addf %169, %168 : vector<8x192xf32>
    %171 = arith.divf %169, %170 : vector<8x192xf32>
    %172 = vector.extract_strided_slice %165 {offsets = [0, 192], sizes = [8, 64], strides = [1, 1]} : vector<8x256xf32> to vector<8x64xf32>
    %173 = math.tanh %172 : vector<8x64xf32>
    %174 = vector.extract_strided_slice %171 {offsets = [0, 64], sizes = [8, 64], strides = [1, 1]} : vector<8x192xf32> to vector<8x64xf32>
    %175 = arith.mulf %174, %130 : vector<8x64xf32>
    %176 = vector.extract_strided_slice %171 {offsets = [0, 0], sizes = [8, 64], strides = [1, 1]} : vector<8x192xf32> to vector<8x64xf32>
    %177 = arith.mulf %176, %173 : vector<8x64xf32>
    %178 = arith.addf %175, %177 : vector<8x64xf32>
    %179 = vector.extract_strided_slice %171 {offsets = [0, 128], sizes = [8, 64], strides = [1, 1]} : vector<8x192xf32> to vector<8x64xf32>
    %180 = math.tanh %178 : vector<8x64xf32>
    %181 = arith.mulf %179, %180 : vector<8x64xf32>
    %cst_60 = arith.constant dense<0.000000e+00> : vector<8x256xf32>
    %182 = tpu.matmul %151, %14, %cst_60 {dimension_numbers = #tpu.dot_dimension_numbers<[1], [0], [0], [1], [0, 0, 1, 1], [], []>} : vector<8x64xf32>, vector<64x256xf32>, vector<8x256xf32> -> vector<8x256xf32>
    %183 = arith.addf %163, %182 : vector<8x256xf32>
    %184 = vector.extract_strided_slice %183 {offsets = [0, 0], sizes = [8, 192], strides = [1, 1]} : vector<8x256xf32> to vector<8x192xf32>
    %185 = arith.negf %184 : vector<8x192xf32>
    %186 = math.exp %185 : vector<8x192xf32>
    %cst_61 = arith.constant 1.000000e+00 : f32
    %187 = vector.broadcast %cst_61 : f32 to vector<8x192xf32>
    %188 = arith.addf %187, %186 : vector<8x192xf32>
    %189 = arith.divf %187, %188 : vector<8x192xf32>
    %190 = vector.extract_strided_slice %183 {offsets = [0, 192], sizes = [8, 64], strides = [1, 1]} : vector<8x256xf32> to vector<8x64xf32>
    %191 = math.tanh %190 : vector<8x64xf32>
    %192 = vector.extract_strided_slice %189 {offsets = [0, 64], sizes = [8, 64], strides = [1, 1]} : vector<8x192xf32> to vector<8x64xf32>
    %193 = arith.mulf %192, %148 : vector<8x64xf32>
    %194 = vector.extract_strided_slice %189 {offsets = [0, 0], sizes = [8, 64], strides = [1, 1]} : vector<8x192xf32> to vector<8x64xf32>
    %195 = arith.mulf %194, %191 : vector<8x64xf32>
    %196 = arith.addf %193, %195 : vector<8x64xf32>
    %197 = vector.extract_strided_slice %189 {offsets = [0, 128], sizes = [8, 64], strides = [1, 1]} : vector<8x192xf32> to vector<8x64xf32>
    %198 = math.tanh %196 : vector<8x64xf32>
    %199 = arith.mulf %197, %198 : vector<8x64xf32>
    %200 = vector.broadcast %15 : vector<1x64xf32> to vector<8x64xf32>
    %201 = arith.mulf %181, %200 : vector<8x64xf32>
    %cst_62 = arith.constant dense<0.000000e+00> : vector<8xf32>
    %202 = vector.multi_reduction <add>, %201, %cst_62 [1] : vector<8x64xf32> to vector<8xf32>
    %203 = vector.shape_cast %202 : vector<8xf32> to vector<8x1xf32>
    %c0_63 = arith.constant 0 : index
    %c3 = arith.constant 3 : index
    %204 = vector.load %arg17[%c0_63, %c3] : memref<8x18xf32, #tpu.memory_space<vmem>>, vector<8x1xf32>
    tpu.vector_store %arg17[%c0_63, %c3], %203 {strides = array<i32>} : memref<8x18xf32, #tpu.memory_space<vmem>>, vector<8x1xf32>,
    %205 = vector.broadcast %16 : vector<1x64xf32> to vector<8x64xf32>
    %206 = arith.mulf %199, %205 : vector<8x64xf32>
    %cst_64 = arith.constant dense<0.000000e+00> : vector<8xf32>
    %207 = vector.multi_reduction <add>, %206, %cst_64 [1] : vector<8x64xf32> to vector<8xf32>
    %208 = vector.shape_cast %207 : vector<8xf32> to vector<8x1xf32>
    %c0_65 = arith.constant 0 : index
    %c14 = arith.constant 14 : index
    %209 = vector.load %arg18[%c0_65, %c14] : memref<8x18xf32, #tpu.memory_space<vmem>>, vector<8x1xf32>
    tpu.vector_store %arg18[%c0_65, %c14], %208 {strides = array<i32>} : memref<8x18xf32, #tpu.memory_space<vmem>>, vector<8x1xf32>,
    %c32 = arith.constant 32 : index
    %c0_66 = arith.constant 0 : index
    %210 = vector.load %arg15[%c32, %c0_66] : memref<144x256xf32, #tpu.memory_space<vmem>>, vector<8x256xf32>
    %c104 = arith.constant 104 : index
    %c0_67 = arith.constant 0 : index
    %211 = vector.load %arg16[%c104, %c0_67] : memref<144x256xf32, #tpu.memory_space<vmem>>, vector<8x256xf32>
    %cst_68 = arith.constant dense<0.000000e+00> : vector<8x256xf32>
    %212 = tpu.matmul %181, %13, %cst_68 {dimension_numbers = #tpu.dot_dimension_numbers<[1], [0], [0], [1], [0, 0, 1, 1], [], []>} : vector<8x64xf32>, vector<64x256xf32>, vector<8x256xf32> -> vector<8x256xf32>
    %213 = arith.addf %210, %212 : vector<8x256xf32>
    %214 = vector.extract_strided_slice %213 {offsets = [0, 0], sizes = [8, 192], strides = [1, 1]} : vector<8x256xf32> to vector<8x192xf32>
    %215 = arith.negf %214 : vector<8x192xf32>
    %216 = math.exp %215 : vector<8x192xf32>
    %cst_69 = arith.constant 1.000000e+00 : f32
    %217 = vector.broadcast %cst_69 : f32 to vector<8x192xf32>
    %218 = arith.addf %217, %216 : vector<8x192xf32>
    %219 = arith.divf %217, %218 : vector<8x192xf32>
    %220 = vector.extract_strided_slice %213 {offsets = [0, 192], sizes = [8, 64], strides = [1, 1]} : vector<8x256xf32> to vector<8x64xf32>
    %221 = math.tanh %220 : vector<8x64xf32>
    %222 = vector.extract_strided_slice %219 {offsets = [0, 64], sizes = [8, 64], strides = [1, 1]} : vector<8x192xf32> to vector<8x64xf32>
    %223 = arith.mulf %222, %178 : vector<8x64xf32>
    %224 = vector.extract_strided_slice %219 {offsets = [0, 0], sizes = [8, 64], strides = [1, 1]} : vector<8x192xf32> to vector<8x64xf32>
    %225 = arith.mulf %224, %221 : vector<8x64xf32>
    %226 = arith.addf %223, %225 : vector<8x64xf32>
    %227 = vector.extract_strided_slice %219 {offsets = [0, 128], sizes = [8, 64], strides = [1, 1]} : vector<8x192xf32> to vector<8x64xf32>
    %228 = math.tanh %226 : vector<8x64xf32>
    %229 = arith.mulf %227, %228 : vector<8x64xf32>
    %cst_70 = arith.constant dense<0.000000e+00> : vector<8x256xf32>
    %230 = tpu.matmul %199, %14, %cst_70 {dimension_numbers = #tpu.dot_dimension_numbers<[1], [0], [0], [1], [0, 0, 1, 1], [], []>} : vector<8x64xf32>, vector<64x256xf32>, vector<8x256xf32> -> vector<8x256xf32>
    %231 = arith.addf %211, %230 : vector<8x256xf32>
    %232 = vector.extract_strided_slice %231 {offsets = [0, 0], sizes = [8, 192], strides = [1, 1]} : vector<8x256xf32> to vector<8x192xf32>
    %233 = arith.negf %232 : vector<8x192xf32>
    %234 = math.exp %233 : vector<8x192xf32>
    %cst_71 = arith.constant 1.000000e+00 : f32
    %235 = vector.broadcast %cst_71 : f32 to vector<8x192xf32>
    %236 = arith.addf %235, %234 : vector<8x192xf32>
    %237 = arith.divf %235, %236 : vector<8x192xf32>
    %238 = vector.extract_strided_slice %231 {offsets = [0, 192], sizes = [8, 64], strides = [1, 1]} : vector<8x256xf32> to vector<8x64xf32>
    %239 = math.tanh %238 : vector<8x64xf32>
    %240 = vector.extract_strided_slice %237 {offsets = [0, 64], sizes = [8, 64], strides = [1, 1]} : vector<8x192xf32> to vector<8x64xf32>
    %241 = arith.mulf %240, %196 : vector<8x64xf32>
    %242 = vector.extract_strided_slice %237 {offsets = [0, 0], sizes = [8, 64], strides = [1, 1]} : vector<8x192xf32> to vector<8x64xf32>
    %243 = arith.mulf %242, %239 : vector<8x64xf32>
    %244 = arith.addf %241, %243 : vector<8x64xf32>
    %245 = vector.extract_strided_slice %237 {offsets = [0, 128], sizes = [8, 64], strides = [1, 1]} : vector<8x192xf32> to vector<8x64xf32>
    %246 = math.tanh %244 : vector<8x64xf32>
    %247 = arith.mulf %245, %246 : vector<8x64xf32>
    %248 = vector.broadcast %15 : vector<1x64xf32> to vector<8x64xf32>
    %249 = arith.mulf %229, %248 : vector<8x64xf32>
    %cst_72 = arith.constant dense<0.000000e+00> : vector<8xf32>
    %250 = vector.multi_reduction <add>, %249, %cst_72 [1] : vector<8x64xf32> to vector<8xf32>
    %251 = vector.shape_cast %250 : vector<8xf32> to vector<8x1xf32>
    %c0_73 = arith.constant 0 : index
    %c4 = arith.constant 4 : index
    %252 = vector.load %arg17[%c0_73, %c4] : memref<8x18xf32, #tpu.memory_space<vmem>>, vector<8x1xf32>
    tpu.vector_store %arg17[%c0_73, %c4], %251 {strides = array<i32>} : memref<8x18xf32, #tpu.memory_space<vmem>>, vector<8x1xf32>,
    %253 = vector.broadcast %16 : vector<1x64xf32> to vector<8x64xf32>
    %254 = arith.mulf %247, %253 : vector<8x64xf32>
    %cst_74 = arith.constant dense<0.000000e+00> : vector<8xf32>
    %255 = vector.multi_reduction <add>, %254, %cst_74 [1] : vector<8x64xf32> to vector<8xf32>
    %256 = vector.shape_cast %255 : vector<8xf32> to vector<8x1xf32>
    %c0_75 = arith.constant 0 : index
    %c13 = arith.constant 13 : index
    %257 = vector.load %arg18[%c0_75, %c13] : memref<8x18xf32, #tpu.memory_space<vmem>>, vector<8x1xf32>
    tpu.vector_store %arg18[%c0_75, %c13], %256 {strides = array<i32>} : memref<8x18xf32, #tpu.memory_space<vmem>>, vector<8x1xf32>,
    %c40 = arith.constant 40 : index
    %c0_76 = arith.constant 0 : index
    %258 = vector.load %arg15[%c40, %c0_76] : memref<144x256xf32, #tpu.memory_space<vmem>>, vector<8x256xf32>
    %c96 = arith.constant 96 : index
    %c0_77 = arith.constant 0 : index
    %259 = vector.load %arg16[%c96, %c0_77] : memref<144x256xf32, #tpu.memory_space<vmem>>, vector<8x256xf32>
    %cst_78 = arith.constant dense<0.000000e+00> : vector<8x256xf32>
    %260 = tpu.matmul %229, %13, %cst_78 {dimension_numbers = #tpu.dot_dimension_numbers<[1], [0], [0], [1], [0, 0, 1, 1], [], []>} : vector<8x64xf32>, vector<64x256xf32>, vector<8x256xf32> -> vector<8x256xf32>
    %261 = arith.addf %258, %260 : vector<8x256xf32>
    %262 = vector.extract_strided_slice %261 {offsets = [0, 0], sizes = [8, 192], strides = [1, 1]} : vector<8x256xf32> to vector<8x192xf32>
    %263 = arith.negf %262 : vector<8x192xf32>
    %264 = math.exp %263 : vector<8x192xf32>
    %cst_79 = arith.constant 1.000000e+00 : f32
    %265 = vector.broadcast %cst_79 : f32 to vector<8x192xf32>
    %266 = arith.addf %265, %264 : vector<8x192xf32>
    %267 = arith.divf %265, %266 : vector<8x192xf32>
    %268 = vector.extract_strided_slice %261 {offsets = [0, 192], sizes = [8, 64], strides = [1, 1]} : vector<8x256xf32> to vector<8x64xf32>
    %269 = math.tanh %268 : vector<8x64xf32>
    %270 = vector.extract_strided_slice %267 {offsets = [0, 64], sizes = [8, 64], strides = [1, 1]} : vector<8x192xf32> to vector<8x64xf32>
    %271 = arith.mulf %270, %226 : vector<8x64xf32>
    %272 = vector.extract_strided_slice %267 {offsets = [0, 0], sizes = [8, 64], strides = [1, 1]} : vector<8x192xf32> to vector<8x64xf32>
    %273 = arith.mulf %272, %269 : vector<8x64xf32>
    %274 = arith.addf %271, %273 : vector<8x64xf32>
    %275 = vector.extract_strided_slice %267 {offsets = [0, 128], sizes = [8, 64], strides = [1, 1]} : vector<8x192xf32> to vector<8x64xf32>
    %276 = math.tanh %274 : vector<8x64xf32>
    %277 = arith.mulf %275, %276 : vector<8x64xf32>
    %cst_80 = arith.constant dense<0.000000e+00> : vector<8x256xf32>
    %278 = tpu.matmul %247, %14, %cst_80 {dimension_numbers = #tpu.dot_dimension_numbers<[1], [0], [0], [1], [0, 0, 1, 1], [], []>} : vector<8x64xf32>, vector<64x256xf32>, vector<8x256xf32> -> vector<8x256xf32>
    %279 = arith.addf %259, %278 : vector<8x256xf32>
    %280 = vector.extract_strided_slice %279 {offsets = [0, 0], sizes = [8, 192], strides = [1, 1]} : vector<8x256xf32> to vector<8x192xf32>
    %281 = arith.negf %280 : vector<8x192xf32>
    %282 = math.exp %281 : vector<8x192xf32>
    %cst_81 = arith.constant 1.000000e+00 : f32
    %283 = vector.broadcast %cst_81 : f32 to vector<8x192xf32>
    %284 = arith.addf %283, %282 : vector<8x192xf32>
    %285 = arith.divf %283, %284 : vector<8x192xf32>
    %286 = vector.extract_strided_slice %279 {offsets = [0, 192], sizes = [8, 64], strides = [1, 1]} : vector<8x256xf32> to vector<8x64xf32>
    %287 = math.tanh %286 : vector<8x64xf32>
    %288 = vector.extract_strided_slice %285 {offsets = [0, 64], sizes = [8, 64], strides = [1, 1]} : vector<8x192xf32> to vector<8x64xf32>
    %289 = arith.mulf %288, %244 : vector<8x64xf32>
    %290 = vector.extract_strided_slice %285 {offsets = [0, 0], sizes = [8, 64], strides = [1, 1]} : vector<8x192xf32> to vector<8x64xf32>
    %291 = arith.mulf %290, %287 : vector<8x64xf32>
    %292 = arith.addf %289, %291 : vector<8x64xf32>
    %293 = vector.extract_strided_slice %285 {offsets = [0, 128], sizes = [8, 64], strides = [1, 1]} : vector<8x192xf32> to vector<8x64xf32>
    %294 = math.tanh %292 : vector<8x64xf32>
    %295 = arith.mulf %293, %294 : vector<8x64xf32>
    %296 = vector.broadcast %15 : vector<1x64xf32> to vector<8x64xf32>
    %297 = arith.mulf %277, %296 : vector<8x64xf32>
    %cst_82 = arith.constant dense<0.000000e+00> : vector<8xf32>
    %298 = vector.multi_reduction <add>, %297, %cst_82 [1] : vector<8x64xf32> to vector<8xf32>
    %299 = vector.shape_cast %298 : vector<8xf32> to vector<8x1xf32>
    %c0_83 = arith.constant 0 : index
    %c5 = arith.constant 5 : index
    %300 = vector.load %arg17[%c0_83, %c5] : memref<8x18xf32, #tpu.memory_space<vmem>>, vector<8x1xf32>
    tpu.vector_store %arg17[%c0_83, %c5], %299 {strides = array<i32>} : memref<8x18xf32, #tpu.memory_space<vmem>>, vector<8x1xf32>,
    %301 = vector.broadcast %16 : vector<1x64xf32> to vector<8x64xf32>
    %302 = arith.mulf %295, %301 : vector<8x64xf32>
    %cst_84 = arith.constant dense<0.000000e+00> : vector<8xf32>
    %303 = vector.multi_reduction <add>, %302, %cst_84 [1] : vector<8x64xf32> to vector<8xf32>
    %304 = vector.shape_cast %303 : vector<8xf32> to vector<8x1xf32>
    %c0_85 = arith.constant 0 : index
    %c12 = arith.constant 12 : index
    %305 = vector.load %arg18[%c0_85, %c12] : memref<8x18xf32, #tpu.memory_space<vmem>>, vector<8x1xf32>
    tpu.vector_store %arg18[%c0_85, %c12], %304 {strides = array<i32>} : memref<8x18xf32, #tpu.memory_space<vmem>>, vector<8x1xf32>,
    %c48 = arith.constant 48 : index
    %c0_86 = arith.constant 0 : index
    %306 = vector.load %arg15[%c48, %c0_86] : memref<144x256xf32, #tpu.memory_space<vmem>>, vector<8x256xf32>
    %c88 = arith.constant 88 : index
    %c0_87 = arith.constant 0 : index
    %307 = vector.load %arg16[%c88, %c0_87] : memref<144x256xf32, #tpu.memory_space<vmem>>, vector<8x256xf32>
    %cst_88 = arith.constant dense<0.000000e+00> : vector<8x256xf32>
    %308 = tpu.matmul %277, %13, %cst_88 {dimension_numbers = #tpu.dot_dimension_numbers<[1], [0], [0], [1], [0, 0, 1, 1], [], []>} : vector<8x64xf32>, vector<64x256xf32>, vector<8x256xf32> -> vector<8x256xf32>
    %309 = arith.addf %306, %308 : vector<8x256xf32>
    %310 = vector.extract_strided_slice %309 {offsets = [0, 0], sizes = [8, 192], strides = [1, 1]} : vector<8x256xf32> to vector<8x192xf32>
    %311 = arith.negf %310 : vector<8x192xf32>
    %312 = math.exp %311 : vector<8x192xf32>
    %cst_89 = arith.constant 1.000000e+00 : f32
    %313 = vector.broadcast %cst_89 : f32 to vector<8x192xf32>
    %314 = arith.addf %313, %312 : vector<8x192xf32>
    %315 = arith.divf %313, %314 : vector<8x192xf32>
    %316 = vector.extract_strided_slice %309 {offsets = [0, 192], sizes = [8, 64], strides = [1, 1]} : vector<8x256xf32> to vector<8x64xf32>
    %317 = math.tanh %316 : vector<8x64xf32>
    %318 = vector.extract_strided_slice %315 {offsets = [0, 64], sizes = [8, 64], strides = [1, 1]} : vector<8x192xf32> to vector<8x64xf32>
    %319 = arith.mulf %318, %274 : vector<8x64xf32>
    %320 = vector.extract_strided_slice %315 {offsets = [0, 0], sizes = [8, 64], strides = [1, 1]} : vector<8x192xf32> to vector<8x64xf32>
    %321 = arith.mulf %320, %317 : vector<8x64xf32>
    %322 = arith.addf %319, %321 : vector<8x64xf32>
    %323 = vector.extract_strided_slice %315 {offsets = [0, 128], sizes = [8, 64], strides = [1, 1]} : vector<8x192xf32> to vector<8x64xf32>
    %324 = math.tanh %322 : vector<8x64xf32>
    %325 = arith.mulf %323, %324 : vector<8x64xf32>
    %cst_90 = arith.constant dense<0.000000e+00> : vector<8x256xf32>
    %326 = tpu.matmul %295, %14, %cst_90 {dimension_numbers = #tpu.dot_dimension_numbers<[1], [0], [0], [1], [0, 0, 1, 1], [], []>} : vector<8x64xf32>, vector<64x256xf32>, vector<8x256xf32> -> vector<8x256xf32>
    %327 = arith.addf %307, %326 : vector<8x256xf32>
    %328 = vector.extract_strided_slice %327 {offsets = [0, 0], sizes = [8, 192], strides = [1, 1]} : vector<8x256xf32> to vector<8x192xf32>
    %329 = arith.negf %328 : vector<8x192xf32>
    %330 = math.exp %329 : vector<8x192xf32>
    %cst_91 = arith.constant 1.000000e+00 : f32
    %331 = vector.broadcast %cst_91 : f32 to vector<8x192xf32>
    %332 = arith.addf %331, %330 : vector<8x192xf32>
    %333 = arith.divf %331, %332 : vector<8x192xf32>
    %334 = vector.extract_strided_slice %327 {offsets = [0, 192], sizes = [8, 64], strides = [1, 1]} : vector<8x256xf32> to vector<8x64xf32>
    %335 = math.tanh %334 : vector<8x64xf32>
    %336 = vector.extract_strided_slice %333 {offsets = [0, 64], sizes = [8, 64], strides = [1, 1]} : vector<8x192xf32> to vector<8x64xf32>
    %337 = arith.mulf %336, %292 : vector<8x64xf32>
    %338 = vector.extract_strided_slice %333 {offsets = [0, 0], sizes = [8, 64], strides = [1, 1]} : vector<8x192xf32> to vector<8x64xf32>
    %339 = arith.mulf %338, %335 : vector<8x64xf32>
    %340 = arith.addf %337, %339 : vector<8x64xf32>
    %341 = vector.extract_strided_slice %333 {offsets = [0, 128], sizes = [8, 64], strides = [1, 1]} : vector<8x192xf32> to vector<8x64xf32>
    %342 = math.tanh %340 : vector<8x64xf32>
    %343 = arith.mulf %341, %342 : vector<8x64xf32>
    %344 = vector.broadcast %15 : vector<1x64xf32> to vector<8x64xf32>
    %345 = arith.mulf %325, %344 : vector<8x64xf32>
    %cst_92 = arith.constant dense<0.000000e+00> : vector<8xf32>
    %346 = vector.multi_reduction <add>, %345, %cst_92 [1] : vector<8x64xf32> to vector<8xf32>
    %347 = vector.shape_cast %346 : vector<8xf32> to vector<8x1xf32>
    %c0_93 = arith.constant 0 : index
    %c6 = arith.constant 6 : index
    %348 = vector.load %arg17[%c0_93, %c6] : memref<8x18xf32, #tpu.memory_space<vmem>>, vector<8x1xf32>
    tpu.vector_store %arg17[%c0_93, %c6], %347 {strides = array<i32>} : memref<8x18xf32, #tpu.memory_space<vmem>>, vector<8x1xf32>,
    %349 = vector.broadcast %16 : vector<1x64xf32> to vector<8x64xf32>
    %350 = arith.mulf %343, %349 : vector<8x64xf32>
    %cst_94 = arith.constant dense<0.000000e+00> : vector<8xf32>
    %351 = vector.multi_reduction <add>, %350, %cst_94 [1] : vector<8x64xf32> to vector<8xf32>
    %352 = vector.shape_cast %351 : vector<8xf32> to vector<8x1xf32>
    %c0_95 = arith.constant 0 : index
    %c11 = arith.constant 11 : index
    %353 = vector.load %arg18[%c0_95, %c11] : memref<8x18xf32, #tpu.memory_space<vmem>>, vector<8x1xf32>
    tpu.vector_store %arg18[%c0_95, %c11], %352 {strides = array<i32>} : memref<8x18xf32, #tpu.memory_space<vmem>>, vector<8x1xf32>,
    %c56 = arith.constant 56 : index
    %c0_96 = arith.constant 0 : index
    %354 = vector.load %arg15[%c56, %c0_96] : memref<144x256xf32, #tpu.memory_space<vmem>>, vector<8x256xf32>
    %c80 = arith.constant 80 : index
    %c0_97 = arith.constant 0 : index
    %355 = vector.load %arg16[%c80, %c0_97] : memref<144x256xf32, #tpu.memory_space<vmem>>, vector<8x256xf32>
    %cst_98 = arith.constant dense<0.000000e+00> : vector<8x256xf32>
    %356 = tpu.matmul %325, %13, %cst_98 {dimension_numbers = #tpu.dot_dimension_numbers<[1], [0], [0], [1], [0, 0, 1, 1], [], []>} : vector<8x64xf32>, vector<64x256xf32>, vector<8x256xf32> -> vector<8x256xf32>
    %357 = arith.addf %354, %356 : vector<8x256xf32>
    %358 = vector.extract_strided_slice %357 {offsets = [0, 0], sizes = [8, 192], strides = [1, 1]} : vector<8x256xf32> to vector<8x192xf32>
    %359 = arith.negf %358 : vector<8x192xf32>
    %360 = math.exp %359 : vector<8x192xf32>
    %cst_99 = arith.constant 1.000000e+00 : f32
    %361 = vector.broadcast %cst_99 : f32 to vector<8x192xf32>
    %362 = arith.addf %361, %360 : vector<8x192xf32>
    %363 = arith.divf %361, %362 : vector<8x192xf32>
    %364 = vector.extract_strided_slice %357 {offsets = [0, 192], sizes = [8, 64], strides = [1, 1]} : vector<8x256xf32> to vector<8x64xf32>
    %365 = math.tanh %364 : vector<8x64xf32>
    %366 = vector.extract_strided_slice %363 {offsets = [0, 64], sizes = [8, 64], strides = [1, 1]} : vector<8x192xf32> to vector<8x64xf32>
    %367 = arith.mulf %366, %322 : vector<8x64xf32>
    %368 = vector.extract_strided_slice %363 {offsets = [0, 0], sizes = [8, 64], strides = [1, 1]} : vector<8x192xf32> to vector<8x64xf32>
    %369 = arith.mulf %368, %365 : vector<8x64xf32>
    %370 = arith.addf %367, %369 : vector<8x64xf32>
    %371 = vector.extract_strided_slice %363 {offsets = [0, 128], sizes = [8, 64], strides = [1, 1]} : vector<8x192xf32> to vector<8x64xf32>
    %372 = math.tanh %370 : vector<8x64xf32>
    %373 = arith.mulf %371, %372 : vector<8x64xf32>
    %cst_100 = arith.constant dense<0.000000e+00> : vector<8x256xf32>
    %374 = tpu.matmul %343, %14, %cst_100 {dimension_numbers = #tpu.dot_dimension_numbers<[1], [0], [0], [1], [0, 0, 1, 1], [], []>} : vector<8x64xf32>, vector<64x256xf32>, vector<8x256xf32> -> vector<8x256xf32>
    %375 = arith.addf %355, %374 : vector<8x256xf32>
    %376 = vector.extract_strided_slice %375 {offsets = [0, 0], sizes = [8, 192], strides = [1, 1]} : vector<8x256xf32> to vector<8x192xf32>
    %377 = arith.negf %376 : vector<8x192xf32>
    %378 = math.exp %377 : vector<8x192xf32>
    %cst_101 = arith.constant 1.000000e+00 : f32
    %379 = vector.broadcast %cst_101 : f32 to vector<8x192xf32>
    %380 = arith.addf %379, %378 : vector<8x192xf32>
    %381 = arith.divf %379, %380 : vector<8x192xf32>
    %382 = vector.extract_strided_slice %375 {offsets = [0, 192], sizes = [8, 64], strides = [1, 1]} : vector<8x256xf32> to vector<8x64xf32>
    %383 = math.tanh %382 : vector<8x64xf32>
    %384 = vector.extract_strided_slice %381 {offsets = [0, 64], sizes = [8, 64], strides = [1, 1]} : vector<8x192xf32> to vector<8x64xf32>
    %385 = arith.mulf %384, %340 : vector<8x64xf32>
    %386 = vector.extract_strided_slice %381 {offsets = [0, 0], sizes = [8, 64], strides = [1, 1]} : vector<8x192xf32> to vector<8x64xf32>
    %387 = arith.mulf %386, %383 : vector<8x64xf32>
    %388 = arith.addf %385, %387 : vector<8x64xf32>
    %389 = vector.extract_strided_slice %381 {offsets = [0, 128], sizes = [8, 64], strides = [1, 1]} : vector<8x192xf32> to vector<8x64xf32>
    %390 = math.tanh %388 : vector<8x64xf32>
    %391 = arith.mulf %389, %390 : vector<8x64xf32>
    %392 = vector.broadcast %15 : vector<1x64xf32> to vector<8x64xf32>
    %393 = arith.mulf %373, %392 : vector<8x64xf32>
    %cst_102 = arith.constant dense<0.000000e+00> : vector<8xf32>
    %394 = vector.multi_reduction <add>, %393, %cst_102 [1] : vector<8x64xf32> to vector<8xf32>
    %395 = vector.shape_cast %394 : vector<8xf32> to vector<8x1xf32>
    %c0_103 = arith.constant 0 : index
    %c7 = arith.constant 7 : index
    %396 = vector.load %arg17[%c0_103, %c7] : memref<8x18xf32, #tpu.memory_space<vmem>>, vector<8x1xf32>
    tpu.vector_store %arg17[%c0_103, %c7], %395 {strides = array<i32>} : memref<8x18xf32, #tpu.memory_space<vmem>>, vector<8x1xf32>,
    %397 = vector.broadcast %16 : vector<1x64xf32> to vector<8x64xf32>
    %398 = arith.mulf %391, %397 : vector<8x64xf32>
    %cst_104 = arith.constant dense<0.000000e+00> : vector<8xf32>
    %399 = vector.multi_reduction <add>, %398, %cst_104 [1] : vector<8x64xf32> to vector<8xf32>
    %400 = vector.shape_cast %399 : vector<8xf32> to vector<8x1xf32>
    %c0_105 = arith.constant 0 : index
    %c10 = arith.constant 10 : index
    %401 = vector.load %arg18[%c0_105, %c10] : memref<8x18xf32, #tpu.memory_space<vmem>>, vector<8x1xf32>
    tpu.vector_store %arg18[%c0_105, %c10], %400 {strides = array<i32>} : memref<8x18xf32, #tpu.memory_space<vmem>>, vector<8x1xf32>,
    %c64 = arith.constant 64 : index
    %c0_106 = arith.constant 0 : index
    %402 = vector.load %arg15[%c64, %c0_106] : memref<144x256xf32, #tpu.memory_space<vmem>>, vector<8x256xf32>
    %c72 = arith.constant 72 : index
    %c0_107 = arith.constant 0 : index
    %403 = vector.load %arg16[%c72, %c0_107] : memref<144x256xf32, #tpu.memory_space<vmem>>, vector<8x256xf32>
    %cst_108 = arith.constant dense<0.000000e+00> : vector<8x256xf32>
    %404 = tpu.matmul %373, %13, %cst_108 {dimension_numbers = #tpu.dot_dimension_numbers<[1], [0], [0], [1], [0, 0, 1, 1], [], []>} : vector<8x64xf32>, vector<64x256xf32>, vector<8x256xf32> -> vector<8x256xf32>
    %405 = arith.addf %402, %404 : vector<8x256xf32>
    %406 = vector.extract_strided_slice %405 {offsets = [0, 0], sizes = [8, 192], strides = [1, 1]} : vector<8x256xf32> to vector<8x192xf32>
    %407 = arith.negf %406 : vector<8x192xf32>
    %408 = math.exp %407 : vector<8x192xf32>
    %cst_109 = arith.constant 1.000000e+00 : f32
    %409 = vector.broadcast %cst_109 : f32 to vector<8x192xf32>
    %410 = arith.addf %409, %408 : vector<8x192xf32>
    %411 = arith.divf %409, %410 : vector<8x192xf32>
    %412 = vector.extract_strided_slice %405 {offsets = [0, 192], sizes = [8, 64], strides = [1, 1]} : vector<8x256xf32> to vector<8x64xf32>
    %413 = math.tanh %412 : vector<8x64xf32>
    %414 = vector.extract_strided_slice %411 {offsets = [0, 64], sizes = [8, 64], strides = [1, 1]} : vector<8x192xf32> to vector<8x64xf32>
    %415 = arith.mulf %414, %370 : vector<8x64xf32>
    %416 = vector.extract_strided_slice %411 {offsets = [0, 0], sizes = [8, 64], strides = [1, 1]} : vector<8x192xf32> to vector<8x64xf32>
    %417 = arith.mulf %416, %413 : vector<8x64xf32>
    %418 = arith.addf %415, %417 : vector<8x64xf32>
    %419 = vector.extract_strided_slice %411 {offsets = [0, 128], sizes = [8, 64], strides = [1, 1]} : vector<8x192xf32> to vector<8x64xf32>
    %420 = math.tanh %418 : vector<8x64xf32>
    %421 = arith.mulf %419, %420 : vector<8x64xf32>
    %cst_110 = arith.constant dense<0.000000e+00> : vector<8x256xf32>
    %422 = tpu.matmul %391, %14, %cst_110 {dimension_numbers = #tpu.dot_dimension_numbers<[1], [0], [0], [1], [0, 0, 1, 1], [], []>} : vector<8x64xf32>, vector<64x256xf32>, vector<8x256xf32> -> vector<8x256xf32>
    %423 = arith.addf %403, %422 : vector<8x256xf32>
    %424 = vector.extract_strided_slice %423 {offsets = [0, 0], sizes = [8, 192], strides = [1, 1]} : vector<8x256xf32> to vector<8x192xf32>
    %425 = arith.negf %424 : vector<8x192xf32>
    %426 = math.exp %425 : vector<8x192xf32>
    %cst_111 = arith.constant 1.000000e+00 : f32
    %427 = vector.broadcast %cst_111 : f32 to vector<8x192xf32>
    %428 = arith.addf %427, %426 : vector<8x192xf32>
    %429 = arith.divf %427, %428 : vector<8x192xf32>
    %430 = vector.extract_strided_slice %423 {offsets = [0, 192], sizes = [8, 64], strides = [1, 1]} : vector<8x256xf32> to vector<8x64xf32>
    %431 = math.tanh %430 : vector<8x64xf32>
    %432 = vector.extract_strided_slice %429 {offsets = [0, 64], sizes = [8, 64], strides = [1, 1]} : vector<8x192xf32> to vector<8x64xf32>
    %433 = arith.mulf %432, %388 : vector<8x64xf32>
    %434 = vector.extract_strided_slice %429 {offsets = [0, 0], sizes = [8, 64], strides = [1, 1]} : vector<8x192xf32> to vector<8x64xf32>
    %435 = arith.mulf %434, %431 : vector<8x64xf32>
    %436 = arith.addf %433, %435 : vector<8x64xf32>
    %437 = vector.extract_strided_slice %429 {offsets = [0, 128], sizes = [8, 64], strides = [1, 1]} : vector<8x192xf32> to vector<8x64xf32>
    %438 = math.tanh %436 : vector<8x64xf32>
    %439 = arith.mulf %437, %438 : vector<8x64xf32>
    %440 = vector.broadcast %15 : vector<1x64xf32> to vector<8x64xf32>
    %441 = arith.mulf %421, %440 : vector<8x64xf32>
    %cst_112 = arith.constant dense<0.000000e+00> : vector<8xf32>
    %442 = vector.multi_reduction <add>, %441, %cst_112 [1] : vector<8x64xf32> to vector<8xf32>
    %443 = vector.shape_cast %442 : vector<8xf32> to vector<8x1xf32>
    %c0_113 = arith.constant 0 : index
    %c8_114 = arith.constant 8 : index
    %444 = vector.load %arg17[%c0_113, %c8_114] : memref<8x18xf32, #tpu.memory_space<vmem>>, vector<8x1xf32>
    tpu.vector_store %arg17[%c0_113, %c8_114], %443 {strides = array<i32>} : memref<8x18xf32, #tpu.memory_space<vmem>>, vector<8x1xf32>,
    %445 = vector.broadcast %16 : vector<1x64xf32> to vector<8x64xf32>
    %446 = arith.mulf %439, %445 : vector<8x64xf32>
    %cst_115 = arith.constant dense<0.000000e+00> : vector<8xf32>
    %447 = vector.multi_reduction <add>, %446, %cst_115 [1] : vector<8x64xf32> to vector<8xf32>
    %448 = vector.shape_cast %447 : vector<8xf32> to vector<8x1xf32>
    %c0_116 = arith.constant 0 : index
    %c9 = arith.constant 9 : index
    %449 = vector.load %arg18[%c0_116, %c9] : memref<8x18xf32, #tpu.memory_space<vmem>>, vector<8x1xf32>
    tpu.vector_store %arg18[%c0_116, %c9], %448 {strides = array<i32>} : memref<8x18xf32, #tpu.memory_space<vmem>>, vector<8x1xf32>,
    %c72_117 = arith.constant 72 : index
    %c0_118 = arith.constant 0 : index
    %450 = vector.load %arg15[%c72_117, %c0_118] : memref<144x256xf32, #tpu.memory_space<vmem>>, vector<8x256xf32>
    %c64_119 = arith.constant 64 : index
    %c0_120 = arith.constant 0 : index
    %451 = vector.load %arg16[%c64_119, %c0_120] : memref<144x256xf32, #tpu.memory_space<vmem>>, vector<8x256xf32>
    %cst_121 = arith.constant dense<0.000000e+00> : vector<8x256xf32>
    %452 = tpu.matmul %421, %13, %cst_121 {dimension_numbers = #tpu.dot_dimension_numbers<[1], [0], [0], [1], [0, 0, 1, 1], [], []>} : vector<8x64xf32>, vector<64x256xf32>, vector<8x256xf32> -> vector<8x256xf32>
    %453 = arith.addf %450, %452 : vector<8x256xf32>
    %454 = vector.extract_strided_slice %453 {offsets = [0, 0], sizes = [8, 192], strides = [1, 1]} : vector<8x256xf32> to vector<8x192xf32>
    %455 = arith.negf %454 : vector<8x192xf32>
    %456 = math.exp %455 : vector<8x192xf32>
    %cst_122 = arith.constant 1.000000e+00 : f32
    %457 = vector.broadcast %cst_122 : f32 to vector<8x192xf32>
    %458 = arith.addf %457, %456 : vector<8x192xf32>
    %459 = arith.divf %457, %458 : vector<8x192xf32>
    %460 = vector.extract_strided_slice %453 {offsets = [0, 192], sizes = [8, 64], strides = [1, 1]} : vector<8x256xf32> to vector<8x64xf32>
    %461 = math.tanh %460 : vector<8x64xf32>
    %462 = vector.extract_strided_slice %459 {offsets = [0, 64], sizes = [8, 64], strides = [1, 1]} : vector<8x192xf32> to vector<8x64xf32>
    %463 = arith.mulf %462, %418 : vector<8x64xf32>
    %464 = vector.extract_strided_slice %459 {offsets = [0, 0], sizes = [8, 64], strides = [1, 1]} : vector<8x192xf32> to vector<8x64xf32>
    %465 = arith.mulf %464, %461 : vector<8x64xf32>
    %466 = arith.addf %463, %465 : vector<8x64xf32>
    %467 = vector.extract_strided_slice %459 {offsets = [0, 128], sizes = [8, 64], strides = [1, 1]} : vector<8x192xf32> to vector<8x64xf32>
    %468 = math.tanh %466 : vector<8x64xf32>
    %469 = arith.mulf %467, %468 : vector<8x64xf32>
    %cst_123 = arith.constant dense<0.000000e+00> : vector<8x256xf32>
    %470 = tpu.matmul %439, %14, %cst_123 {dimension_numbers = #tpu.dot_dimension_numbers<[1], [0], [0], [1], [0, 0, 1, 1], [], []>} : vector<8x64xf32>, vector<64x256xf32>, vector<8x256xf32> -> vector<8x256xf32>
    %471 = arith.addf %451, %470 : vector<8x256xf32>
    %472 = vector.extract_strided_slice %471 {offsets = [0, 0], sizes = [8, 192], strides = [1, 1]} : vector<8x256xf32> to vector<8x192xf32>
    %473 = arith.negf %472 : vector<8x192xf32>
    %474 = math.exp %473 : vector<8x192xf32>
    %cst_124 = arith.constant 1.000000e+00 : f32
    %475 = vector.broadcast %cst_124 : f32 to vector<8x192xf32>
    %476 = arith.addf %475, %474 : vector<8x192xf32>
    %477 = arith.divf %475, %476 : vector<8x192xf32>
    %478 = vector.extract_strided_slice %471 {offsets = [0, 192], sizes = [8, 64], strides = [1, 1]} : vector<8x256xf32> to vector<8x64xf32>
    %479 = math.tanh %478 : vector<8x64xf32>
    %480 = vector.extract_strided_slice %477 {offsets = [0, 64], sizes = [8, 64], strides = [1, 1]} : vector<8x192xf32> to vector<8x64xf32>
    %481 = arith.mulf %480, %436 : vector<8x64xf32>
    %482 = vector.extract_strided_slice %477 {offsets = [0, 0], sizes = [8, 64], strides = [1, 1]} : vector<8x192xf32> to vector<8x64xf32>
    %483 = arith.mulf %482, %479 : vector<8x64xf32>
    %484 = arith.addf %481, %483 : vector<8x64xf32>
    %485 = vector.extract_strided_slice %477 {offsets = [0, 128], sizes = [8, 64], strides = [1, 1]} : vector<8x192xf32> to vector<8x64xf32>
    %486 = math.tanh %484 : vector<8x64xf32>
    %487 = arith.mulf %485, %486 : vector<8x64xf32>
    %488 = vector.broadcast %15 : vector<1x64xf32> to vector<8x64xf32>
    %489 = arith.mulf %469, %488 : vector<8x64xf32>
    %cst_125 = arith.constant dense<0.000000e+00> : vector<8xf32>
    %490 = vector.multi_reduction <add>, %489, %cst_125 [1] : vector<8x64xf32> to vector<8xf32>
    %491 = vector.shape_cast %490 : vector<8xf32> to vector<8x1xf32>
    %c0_126 = arith.constant 0 : index
    %c9_127 = arith.constant 9 : index
    %492 = vector.load %arg17[%c0_126, %c9_127] : memref<8x18xf32, #tpu.memory_space<vmem>>, vector<8x1xf32>
    tpu.vector_store %arg17[%c0_126, %c9_127], %491 {strides = array<i32>} : memref<8x18xf32, #tpu.memory_space<vmem>>, vector<8x1xf32>,
    %493 = vector.broadcast %16 : vector<1x64xf32> to vector<8x64xf32>
    %494 = arith.mulf %487, %493 : vector<8x64xf32>
    %cst_128 = arith.constant dense<0.000000e+00> : vector<8xf32>
    %495 = vector.multi_reduction <add>, %494, %cst_128 [1] : vector<8x64xf32> to vector<8xf32>
    %496 = vector.shape_cast %495 : vector<8xf32> to vector<8x1xf32>
    %c0_129 = arith.constant 0 : index
    %c8_130 = arith.constant 8 : index
    %497 = vector.load %arg18[%c0_129, %c8_130] : memref<8x18xf32, #tpu.memory_space<vmem>>, vector<8x1xf32>
    tpu.vector_store %arg18[%c0_129, %c8_130], %496 {strides = array<i32>} : memref<8x18xf32, #tpu.memory_space<vmem>>, vector<8x1xf32>,
    %c80_131 = arith.constant 80 : index
    %c0_132 = arith.constant 0 : index
    %498 = vector.load %arg15[%c80_131, %c0_132] : memref<144x256xf32, #tpu.memory_space<vmem>>, vector<8x256xf32>
    %c56_133 = arith.constant 56 : index
    %c0_134 = arith.constant 0 : index
    %499 = vector.load %arg16[%c56_133, %c0_134] : memref<144x256xf32, #tpu.memory_space<vmem>>, vector<8x256xf32>
    %cst_135 = arith.constant dense<0.000000e+00> : vector<8x256xf32>
    %500 = tpu.matmul %469, %13, %cst_135 {dimension_numbers = #tpu.dot_dimension_numbers<[1], [0], [0], [1], [0, 0, 1, 1], [], []>} : vector<8x64xf32>, vector<64x256xf32>, vector<8x256xf32> -> vector<8x256xf32>
    %501 = arith.addf %498, %500 : vector<8x256xf32>
    %502 = vector.extract_strided_slice %501 {offsets = [0, 0], sizes = [8, 192], strides = [1, 1]} : vector<8x256xf32> to vector<8x192xf32>
    %503 = arith.negf %502 : vector<8x192xf32>
    %504 = math.exp %503 : vector<8x192xf32>
    %cst_136 = arith.constant 1.000000e+00 : f32
    %505 = vector.broadcast %cst_136 : f32 to vector<8x192xf32>
    %506 = arith.addf %505, %504 : vector<8x192xf32>
    %507 = arith.divf %505, %506 : vector<8x192xf32>
    %508 = vector.extract_strided_slice %501 {offsets = [0, 192], sizes = [8, 64], strides = [1, 1]} : vector<8x256xf32> to vector<8x64xf32>
    %509 = math.tanh %508 : vector<8x64xf32>
    %510 = vector.extract_strided_slice %507 {offsets = [0, 64], sizes = [8, 64], strides = [1, 1]} : vector<8x192xf32> to vector<8x64xf32>
    %511 = arith.mulf %510, %466 : vector<8x64xf32>
    %512 = vector.extract_strided_slice %507 {offsets = [0, 0], sizes = [8, 64], strides = [1, 1]} : vector<8x192xf32> to vector<8x64xf32>
    %513 = arith.mulf %512, %509 : vector<8x64xf32>
    %514 = arith.addf %511, %513 : vector<8x64xf32>
    %515 = vector.extract_strided_slice %507 {offsets = [0, 128], sizes = [8, 64], strides = [1, 1]} : vector<8x192xf32> to vector<8x64xf32>
    %516 = math.tanh %514 : vector<8x64xf32>
    %517 = arith.mulf %515, %516 : vector<8x64xf32>
    %cst_137 = arith.constant dense<0.000000e+00> : vector<8x256xf32>
    %518 = tpu.matmul %487, %14, %cst_137 {dimension_numbers = #tpu.dot_dimension_numbers<[1], [0], [0], [1], [0, 0, 1, 1], [], []>} : vector<8x64xf32>, vector<64x256xf32>, vector<8x256xf32> -> vector<8x256xf32>
    %519 = arith.addf %499, %518 : vector<8x256xf32>
    %520 = vector.extract_strided_slice %519 {offsets = [0, 0], sizes = [8, 192], strides = [1, 1]} : vector<8x256xf32> to vector<8x192xf32>
    %521 = arith.negf %520 : vector<8x192xf32>
    %522 = math.exp %521 : vector<8x192xf32>
    %cst_138 = arith.constant 1.000000e+00 : f32
    %523 = vector.broadcast %cst_138 : f32 to vector<8x192xf32>
    %524 = arith.addf %523, %522 : vector<8x192xf32>
    %525 = arith.divf %523, %524 : vector<8x192xf32>
    %526 = vector.extract_strided_slice %519 {offsets = [0, 192], sizes = [8, 64], strides = [1, 1]} : vector<8x256xf32> to vector<8x64xf32>
    %527 = math.tanh %526 : vector<8x64xf32>
    %528 = vector.extract_strided_slice %525 {offsets = [0, 64], sizes = [8, 64], strides = [1, 1]} : vector<8x192xf32> to vector<8x64xf32>
    %529 = arith.mulf %528, %484 : vector<8x64xf32>
    %530 = vector.extract_strided_slice %525 {offsets = [0, 0], sizes = [8, 64], strides = [1, 1]} : vector<8x192xf32> to vector<8x64xf32>
    %531 = arith.mulf %530, %527 : vector<8x64xf32>
    %532 = arith.addf %529, %531 : vector<8x64xf32>
    %533 = vector.extract_strided_slice %525 {offsets = [0, 128], sizes = [8, 64], strides = [1, 1]} : vector<8x192xf32> to vector<8x64xf32>
    %534 = math.tanh %532 : vector<8x64xf32>
    %535 = arith.mulf %533, %534 : vector<8x64xf32>
    %536 = vector.broadcast %15 : vector<1x64xf32> to vector<8x64xf32>
    %537 = arith.mulf %517, %536 : vector<8x64xf32>
    %cst_139 = arith.constant dense<0.000000e+00> : vector<8xf32>
    %538 = vector.multi_reduction <add>, %537, %cst_139 [1] : vector<8x64xf32> to vector<8xf32>
    %539 = vector.shape_cast %538 : vector<8xf32> to vector<8x1xf32>
    %c0_140 = arith.constant 0 : index
    %c10_141 = arith.constant 10 : index
    %540 = vector.load %arg17[%c0_140, %c10_141] : memref<8x18xf32, #tpu.memory_space<vmem>>, vector<8x1xf32>
    tpu.vector_store %arg17[%c0_140, %c10_141], %539 {strides = array<i32>} : memref<8x18xf32, #tpu.memory_space<vmem>>, vector<8x1xf32>,
    %541 = vector.broadcast %16 : vector<1x64xf32> to vector<8x64xf32>
    %542 = arith.mulf %535, %541 : vector<8x64xf32>
    %cst_142 = arith.constant dense<0.000000e+00> : vector<8xf32>
    %543 = vector.multi_reduction <add>, %542, %cst_142 [1] : vector<8x64xf32> to vector<8xf32>
    %544 = vector.shape_cast %543 : vector<8xf32> to vector<8x1xf32>
    %c0_143 = arith.constant 0 : index
    %c7_144 = arith.constant 7 : index
    %545 = vector.load %arg18[%c0_143, %c7_144] : memref<8x18xf32, #tpu.memory_space<vmem>>, vector<8x1xf32>
    tpu.vector_store %arg18[%c0_143, %c7_144], %544 {strides = array<i32>} : memref<8x18xf32, #tpu.memory_space<vmem>>, vector<8x1xf32>,
    %c88_145 = arith.constant 88 : index
    %c0_146 = arith.constant 0 : index
    %546 = vector.load %arg15[%c88_145, %c0_146] : memref<144x256xf32, #tpu.memory_space<vmem>>, vector<8x256xf32>
    %c48_147 = arith.constant 48 : index
    %c0_148 = arith.constant 0 : index
    %547 = vector.load %arg16[%c48_147, %c0_148] : memref<144x256xf32, #tpu.memory_space<vmem>>, vector<8x256xf32>
    %cst_149 = arith.constant dense<0.000000e+00> : vector<8x256xf32>
    %548 = tpu.matmul %517, %13, %cst_149 {dimension_numbers = #tpu.dot_dimension_numbers<[1], [0], [0], [1], [0, 0, 1, 1], [], []>} : vector<8x64xf32>, vector<64x256xf32>, vector<8x256xf32> -> vector<8x256xf32>
    %549 = arith.addf %546, %548 : vector<8x256xf32>
    %550 = vector.extract_strided_slice %549 {offsets = [0, 0], sizes = [8, 192], strides = [1, 1]} : vector<8x256xf32> to vector<8x192xf32>
    %551 = arith.negf %550 : vector<8x192xf32>
    %552 = math.exp %551 : vector<8x192xf32>
    %cst_150 = arith.constant 1.000000e+00 : f32
    %553 = vector.broadcast %cst_150 : f32 to vector<8x192xf32>
    %554 = arith.addf %553, %552 : vector<8x192xf32>
    %555 = arith.divf %553, %554 : vector<8x192xf32>
    %556 = vector.extract_strided_slice %549 {offsets = [0, 192], sizes = [8, 64], strides = [1, 1]} : vector<8x256xf32> to vector<8x64xf32>
    %557 = math.tanh %556 : vector<8x64xf32>
    %558 = vector.extract_strided_slice %555 {offsets = [0, 64], sizes = [8, 64], strides = [1, 1]} : vector<8x192xf32> to vector<8x64xf32>
    %559 = arith.mulf %558, %514 : vector<8x64xf32>
    %560 = vector.extract_strided_slice %555 {offsets = [0, 0], sizes = [8, 64], strides = [1, 1]} : vector<8x192xf32> to vector<8x64xf32>
    %561 = arith.mulf %560, %557 : vector<8x64xf32>
    %562 = arith.addf %559, %561 : vector<8x64xf32>
    %563 = vector.extract_strided_slice %555 {offsets = [0, 128], sizes = [8, 64], strides = [1, 1]} : vector<8x192xf32> to vector<8x64xf32>
    %564 = math.tanh %562 : vector<8x64xf32>
    %565 = arith.mulf %563, %564 : vector<8x64xf32>
    %cst_151 = arith.constant dense<0.000000e+00> : vector<8x256xf32>
    %566 = tpu.matmul %535, %14, %cst_151 {dimension_numbers = #tpu.dot_dimension_numbers<[1], [0], [0], [1], [0, 0, 1, 1], [], []>} : vector<8x64xf32>, vector<64x256xf32>, vector<8x256xf32> -> vector<8x256xf32>
    %567 = arith.addf %547, %566 : vector<8x256xf32>
    %568 = vector.extract_strided_slice %567 {offsets = [0, 0], sizes = [8, 192], strides = [1, 1]} : vector<8x256xf32> to vector<8x192xf32>
    %569 = arith.negf %568 : vector<8x192xf32>
    %570 = math.exp %569 : vector<8x192xf32>
    %cst_152 = arith.constant 1.000000e+00 : f32
    %571 = vector.broadcast %cst_152 : f32 to vector<8x192xf32>
    %572 = arith.addf %571, %570 : vector<8x192xf32>
    %573 = arith.divf %571, %572 : vector<8x192xf32>
    %574 = vector.extract_strided_slice %567 {offsets = [0, 192], sizes = [8, 64], strides = [1, 1]} : vector<8x256xf32> to vector<8x64xf32>
    %575 = math.tanh %574 : vector<8x64xf32>
    %576 = vector.extract_strided_slice %573 {offsets = [0, 64], sizes = [8, 64], strides = [1, 1]} : vector<8x192xf32> to vector<8x64xf32>
    %577 = arith.mulf %576, %532 : vector<8x64xf32>
    %578 = vector.extract_strided_slice %573 {offsets = [0, 0], sizes = [8, 64], strides = [1, 1]} : vector<8x192xf32> to vector<8x64xf32>
    %579 = arith.mulf %578, %575 : vector<8x64xf32>
    %580 = arith.addf %577, %579 : vector<8x64xf32>
    %581 = vector.extract_strided_slice %573 {offsets = [0, 128], sizes = [8, 64], strides = [1, 1]} : vector<8x192xf32> to vector<8x64xf32>
    %582 = math.tanh %580 : vector<8x64xf32>
    %583 = arith.mulf %581, %582 : vector<8x64xf32>
    %584 = vector.broadcast %15 : vector<1x64xf32> to vector<8x64xf32>
    %585 = arith.mulf %565, %584 : vector<8x64xf32>
    %cst_153 = arith.constant dense<0.000000e+00> : vector<8xf32>
    %586 = vector.multi_reduction <add>, %585, %cst_153 [1] : vector<8x64xf32> to vector<8xf32>
    %587 = vector.shape_cast %586 : vector<8xf32> to vector<8x1xf32>
    %c0_154 = arith.constant 0 : index
    %c11_155 = arith.constant 11 : index
    %588 = vector.load %arg17[%c0_154, %c11_155] : memref<8x18xf32, #tpu.memory_space<vmem>>, vector<8x1xf32>
    tpu.vector_store %arg17[%c0_154, %c11_155], %587 {strides = array<i32>} : memref<8x18xf32, #tpu.memory_space<vmem>>, vector<8x1xf32>,
    %589 = vector.broadcast %16 : vector<1x64xf32> to vector<8x64xf32>
    %590 = arith.mulf %583, %589 : vector<8x64xf32>
    %cst_156 = arith.constant dense<0.000000e+00> : vector<8xf32>
    %591 = vector.multi_reduction <add>, %590, %cst_156 [1] : vector<8x64xf32> to vector<8xf32>
    %592 = vector.shape_cast %591 : vector<8xf32> to vector<8x1xf32>
    %c0_157 = arith.constant 0 : index
    %c6_158 = arith.constant 6 : index
    %593 = vector.load %arg18[%c0_157, %c6_158] : memref<8x18xf32, #tpu.memory_space<vmem>>, vector<8x1xf32>
    tpu.vector_store %arg18[%c0_157, %c6_158], %592 {strides = array<i32>} : memref<8x18xf32, #tpu.memory_space<vmem>>, vector<8x1xf32>,
    %c96_159 = arith.constant 96 : index
    %c0_160 = arith.constant 0 : index
    %594 = vector.load %arg15[%c96_159, %c0_160] : memref<144x256xf32, #tpu.memory_space<vmem>>, vector<8x256xf32>
    %c40_161 = arith.constant 40 : index
    %c0_162 = arith.constant 0 : index
    %595 = vector.load %arg16[%c40_161, %c0_162] : memref<144x256xf32, #tpu.memory_space<vmem>>, vector<8x256xf32>
    %cst_163 = arith.constant dense<0.000000e+00> : vector<8x256xf32>
    %596 = tpu.matmul %565, %13, %cst_163 {dimension_numbers = #tpu.dot_dimension_numbers<[1], [0], [0], [1], [0, 0, 1, 1], [], []>} : vector<8x64xf32>, vector<64x256xf32>, vector<8x256xf32> -> vector<8x256xf32>
    %597 = arith.addf %594, %596 : vector<8x256xf32>
    %598 = vector.extract_strided_slice %597 {offsets = [0, 0], sizes = [8, 192], strides = [1, 1]} : vector<8x256xf32> to vector<8x192xf32>
    %599 = arith.negf %598 : vector<8x192xf32>
    %600 = math.exp %599 : vector<8x192xf32>
    %cst_164 = arith.constant 1.000000e+00 : f32
    %601 = vector.broadcast %cst_164 : f32 to vector<8x192xf32>
    %602 = arith.addf %601, %600 : vector<8x192xf32>
    %603 = arith.divf %601, %602 : vector<8x192xf32>
    %604 = vector.extract_strided_slice %597 {offsets = [0, 192], sizes = [8, 64], strides = [1, 1]} : vector<8x256xf32> to vector<8x64xf32>
    %605 = math.tanh %604 : vector<8x64xf32>
    %606 = vector.extract_strided_slice %603 {offsets = [0, 64], sizes = [8, 64], strides = [1, 1]} : vector<8x192xf32> to vector<8x64xf32>
    %607 = arith.mulf %606, %562 : vector<8x64xf32>
    %608 = vector.extract_strided_slice %603 {offsets = [0, 0], sizes = [8, 64], strides = [1, 1]} : vector<8x192xf32> to vector<8x64xf32>
    %609 = arith.mulf %608, %605 : vector<8x64xf32>
    %610 = arith.addf %607, %609 : vector<8x64xf32>
    %611 = vector.extract_strided_slice %603 {offsets = [0, 128], sizes = [8, 64], strides = [1, 1]} : vector<8x192xf32> to vector<8x64xf32>
    %612 = math.tanh %610 : vector<8x64xf32>
    %613 = arith.mulf %611, %612 : vector<8x64xf32>
    %cst_165 = arith.constant dense<0.000000e+00> : vector<8x256xf32>
    %614 = tpu.matmul %583, %14, %cst_165 {dimension_numbers = #tpu.dot_dimension_numbers<[1], [0], [0], [1], [0, 0, 1, 1], [], []>} : vector<8x64xf32>, vector<64x256xf32>, vector<8x256xf32> -> vector<8x256xf32>
    %615 = arith.addf %595, %614 : vector<8x256xf32>
    %616 = vector.extract_strided_slice %615 {offsets = [0, 0], sizes = [8, 192], strides = [1, 1]} : vector<8x256xf32> to vector<8x192xf32>
    %617 = arith.negf %616 : vector<8x192xf32>
    %618 = math.exp %617 : vector<8x192xf32>
    %cst_166 = arith.constant 1.000000e+00 : f32
    %619 = vector.broadcast %cst_166 : f32 to vector<8x192xf32>
    %620 = arith.addf %619, %618 : vector<8x192xf32>
    %621 = arith.divf %619, %620 : vector<8x192xf32>
    %622 = vector.extract_strided_slice %615 {offsets = [0, 192], sizes = [8, 64], strides = [1, 1]} : vector<8x256xf32> to vector<8x64xf32>
    %623 = math.tanh %622 : vector<8x64xf32>
    %624 = vector.extract_strided_slice %621 {offsets = [0, 64], sizes = [8, 64], strides = [1, 1]} : vector<8x192xf32> to vector<8x64xf32>
    %625 = arith.mulf %624, %580 : vector<8x64xf32>
    %626 = vector.extract_strided_slice %621 {offsets = [0, 0], sizes = [8, 64], strides = [1, 1]} : vector<8x192xf32> to vector<8x64xf32>
    %627 = arith.mulf %626, %623 : vector<8x64xf32>
    %628 = arith.addf %625, %627 : vector<8x64xf32>
    %629 = vector.extract_strided_slice %621 {offsets = [0, 128], sizes = [8, 64], strides = [1, 1]} : vector<8x192xf32> to vector<8x64xf32>
    %630 = math.tanh %628 : vector<8x64xf32>
    %631 = arith.mulf %629, %630 : vector<8x64xf32>
    %632 = vector.broadcast %15 : vector<1x64xf32> to vector<8x64xf32>
    %633 = arith.mulf %613, %632 : vector<8x64xf32>
    %cst_167 = arith.constant dense<0.000000e+00> : vector<8xf32>
    %634 = vector.multi_reduction <add>, %633, %cst_167 [1] : vector<8x64xf32> to vector<8xf32>
    %635 = vector.shape_cast %634 : vector<8xf32> to vector<8x1xf32>
    %c0_168 = arith.constant 0 : index
    %c12_169 = arith.constant 12 : index
    %636 = vector.load %arg17[%c0_168, %c12_169] : memref<8x18xf32, #tpu.memory_space<vmem>>, vector<8x1xf32>
    tpu.vector_store %arg17[%c0_168, %c12_169], %635 {strides = array<i32>} : memref<8x18xf32, #tpu.memory_space<vmem>>, vector<8x1xf32>,
    %637 = vector.broadcast %16 : vector<1x64xf32> to vector<8x64xf32>
    %638 = arith.mulf %631, %637 : vector<8x64xf32>
    %cst_170 = arith.constant dense<0.000000e+00> : vector<8xf32>
    %639 = vector.multi_reduction <add>, %638, %cst_170 [1] : vector<8x64xf32> to vector<8xf32>
    %640 = vector.shape_cast %639 : vector<8xf32> to vector<8x1xf32>
    %c0_171 = arith.constant 0 : index
    %c5_172 = arith.constant 5 : index
    %641 = vector.load %arg18[%c0_171, %c5_172] : memref<8x18xf32, #tpu.memory_space<vmem>>, vector<8x1xf32>
    tpu.vector_store %arg18[%c0_171, %c5_172], %640 {strides = array<i32>} : memref<8x18xf32, #tpu.memory_space<vmem>>, vector<8x1xf32>,
    %c104_173 = arith.constant 104 : index
    %c0_174 = arith.constant 0 : index
    %642 = vector.load %arg15[%c104_173, %c0_174] : memref<144x256xf32, #tpu.memory_space<vmem>>, vector<8x256xf32>
    %c32_175 = arith.constant 32 : index
    %c0_176 = arith.constant 0 : index
    %643 = vector.load %arg16[%c32_175, %c0_176] : memref<144x256xf32, #tpu.memory_space<vmem>>, vector<8x256xf32>
    %cst_177 = arith.constant dense<0.000000e+00> : vector<8x256xf32>
    %644 = tpu.matmul %613, %13, %cst_177 {dimension_numbers = #tpu.dot_dimension_numbers<[1], [0], [0], [1], [0, 0, 1, 1], [], []>} : vector<8x64xf32>, vector<64x256xf32>, vector<8x256xf32> -> vector<8x256xf32>
    %645 = arith.addf %642, %644 : vector<8x256xf32>
    %646 = vector.extract_strided_slice %645 {offsets = [0, 0], sizes = [8, 192], strides = [1, 1]} : vector<8x256xf32> to vector<8x192xf32>
    %647 = arith.negf %646 : vector<8x192xf32>
    %648 = math.exp %647 : vector<8x192xf32>
    %cst_178 = arith.constant 1.000000e+00 : f32
    %649 = vector.broadcast %cst_178 : f32 to vector<8x192xf32>
    %650 = arith.addf %649, %648 : vector<8x192xf32>
    %651 = arith.divf %649, %650 : vector<8x192xf32>
    %652 = vector.extract_strided_slice %645 {offsets = [0, 192], sizes = [8, 64], strides = [1, 1]} : vector<8x256xf32> to vector<8x64xf32>
    %653 = math.tanh %652 : vector<8x64xf32>
    %654 = vector.extract_strided_slice %651 {offsets = [0, 64], sizes = [8, 64], strides = [1, 1]} : vector<8x192xf32> to vector<8x64xf32>
    %655 = arith.mulf %654, %610 : vector<8x64xf32>
    %656 = vector.extract_strided_slice %651 {offsets = [0, 0], sizes = [8, 64], strides = [1, 1]} : vector<8x192xf32> to vector<8x64xf32>
    %657 = arith.mulf %656, %653 : vector<8x64xf32>
    %658 = arith.addf %655, %657 : vector<8x64xf32>
    %659 = vector.extract_strided_slice %651 {offsets = [0, 128], sizes = [8, 64], strides = [1, 1]} : vector<8x192xf32> to vector<8x64xf32>
    %660 = math.tanh %658 : vector<8x64xf32>
    %661 = arith.mulf %659, %660 : vector<8x64xf32>
    %cst_179 = arith.constant dense<0.000000e+00> : vector<8x256xf32>
    %662 = tpu.matmul %631, %14, %cst_179 {dimension_numbers = #tpu.dot_dimension_numbers<[1], [0], [0], [1], [0, 0, 1, 1], [], []>} : vector<8x64xf32>, vector<64x256xf32>, vector<8x256xf32> -> vector<8x256xf32>
    %663 = arith.addf %643, %662 : vector<8x256xf32>
    %664 = vector.extract_strided_slice %663 {offsets = [0, 0], sizes = [8, 192], strides = [1, 1]} : vector<8x256xf32> to vector<8x192xf32>
    %665 = arith.negf %664 : vector<8x192xf32>
    %666 = math.exp %665 : vector<8x192xf32>
    %cst_180 = arith.constant 1.000000e+00 : f32
    %667 = vector.broadcast %cst_180 : f32 to vector<8x192xf32>
    %668 = arith.addf %667, %666 : vector<8x192xf32>
    %669 = arith.divf %667, %668 : vector<8x192xf32>
    %670 = vector.extract_strided_slice %663 {offsets = [0, 192], sizes = [8, 64], strides = [1, 1]} : vector<8x256xf32> to vector<8x64xf32>
    %671 = math.tanh %670 : vector<8x64xf32>
    %672 = vector.extract_strided_slice %669 {offsets = [0, 64], sizes = [8, 64], strides = [1, 1]} : vector<8x192xf32> to vector<8x64xf32>
    %673 = arith.mulf %672, %628 : vector<8x64xf32>
    %674 = vector.extract_strided_slice %669 {offsets = [0, 0], sizes = [8, 64], strides = [1, 1]} : vector<8x192xf32> to vector<8x64xf32>
    %675 = arith.mulf %674, %671 : vector<8x64xf32>
    %676 = arith.addf %673, %675 : vector<8x64xf32>
    %677 = vector.extract_strided_slice %669 {offsets = [0, 128], sizes = [8, 64], strides = [1, 1]} : vector<8x192xf32> to vector<8x64xf32>
    %678 = math.tanh %676 : vector<8x64xf32>
    %679 = arith.mulf %677, %678 : vector<8x64xf32>
    %680 = vector.broadcast %15 : vector<1x64xf32> to vector<8x64xf32>
    %681 = arith.mulf %661, %680 : vector<8x64xf32>
    %cst_181 = arith.constant dense<0.000000e+00> : vector<8xf32>
    %682 = vector.multi_reduction <add>, %681, %cst_181 [1] : vector<8x64xf32> to vector<8xf32>
    %683 = vector.shape_cast %682 : vector<8xf32> to vector<8x1xf32>
    %c0_182 = arith.constant 0 : index
    %c13_183 = arith.constant 13 : index
    %684 = vector.load %arg17[%c0_182, %c13_183] : memref<8x18xf32, #tpu.memory_space<vmem>>, vector<8x1xf32>
    tpu.vector_store %arg17[%c0_182, %c13_183], %683 {strides = array<i32>} : memref<8x18xf32, #tpu.memory_space<vmem>>, vector<8x1xf32>,
    %685 = vector.broadcast %16 : vector<1x64xf32> to vector<8x64xf32>
    %686 = arith.mulf %679, %685 : vector<8x64xf32>
    %cst_184 = arith.constant dense<0.000000e+00> : vector<8xf32>
    %687 = vector.multi_reduction <add>, %686, %cst_184 [1] : vector<8x64xf32> to vector<8xf32>
    %688 = vector.shape_cast %687 : vector<8xf32> to vector<8x1xf32>
    %c0_185 = arith.constant 0 : index
    %c4_186 = arith.constant 4 : index
    %689 = vector.load %arg18[%c0_185, %c4_186] : memref<8x18xf32, #tpu.memory_space<vmem>>, vector<8x1xf32>
    tpu.vector_store %arg18[%c0_185, %c4_186], %688 {strides = array<i32>} : memref<8x18xf32, #tpu.memory_space<vmem>>, vector<8x1xf32>,
    %c112_187 = arith.constant 112 : index
    %c0_188 = arith.constant 0 : index
    %690 = vector.load %arg15[%c112_187, %c0_188] : memref<144x256xf32, #tpu.memory_space<vmem>>, vector<8x256xf32>
    %c24_189 = arith.constant 24 : index
    %c0_190 = arith.constant 0 : index
    %691 = vector.load %arg16[%c24_189, %c0_190] : memref<144x256xf32, #tpu.memory_space<vmem>>, vector<8x256xf32>
    %cst_191 = arith.constant dense<0.000000e+00> : vector<8x256xf32>
    %692 = tpu.matmul %661, %13, %cst_191 {dimension_numbers = #tpu.dot_dimension_numbers<[1], [0], [0], [1], [0, 0, 1, 1], [], []>} : vector<8x64xf32>, vector<64x256xf32>, vector<8x256xf32> -> vector<8x256xf32>
    %693 = arith.addf %690, %692 : vector<8x256xf32>
    %694 = vector.extract_strided_slice %693 {offsets = [0, 0], sizes = [8, 192], strides = [1, 1]} : vector<8x256xf32> to vector<8x192xf32>
    %695 = arith.negf %694 : vector<8x192xf32>
    %696 = math.exp %695 : vector<8x192xf32>
    %cst_192 = arith.constant 1.000000e+00 : f32
    %697 = vector.broadcast %cst_192 : f32 to vector<8x192xf32>
    %698 = arith.addf %697, %696 : vector<8x192xf32>
    %699 = arith.divf %697, %698 : vector<8x192xf32>
    %700 = vector.extract_strided_slice %693 {offsets = [0, 192], sizes = [8, 64], strides = [1, 1]} : vector<8x256xf32> to vector<8x64xf32>
    %701 = math.tanh %700 : vector<8x64xf32>
    %702 = vector.extract_strided_slice %699 {offsets = [0, 64], sizes = [8, 64], strides = [1, 1]} : vector<8x192xf32> to vector<8x64xf32>
    %703 = arith.mulf %702, %658 : vector<8x64xf32>
    %704 = vector.extract_strided_slice %699 {offsets = [0, 0], sizes = [8, 64], strides = [1, 1]} : vector<8x192xf32> to vector<8x64xf32>
    %705 = arith.mulf %704, %701 : vector<8x64xf32>
    %706 = arith.addf %703, %705 : vector<8x64xf32>
    %707 = vector.extract_strided_slice %699 {offsets = [0, 128], sizes = [8, 64], strides = [1, 1]} : vector<8x192xf32> to vector<8x64xf32>
    %708 = math.tanh %706 : vector<8x64xf32>
    %709 = arith.mulf %707, %708 : vector<8x64xf32>
    %cst_193 = arith.constant dense<0.000000e+00> : vector<8x256xf32>
    %710 = tpu.matmul %679, %14, %cst_193 {dimension_numbers = #tpu.dot_dimension_numbers<[1], [0], [0], [1], [0, 0, 1, 1], [], []>} : vector<8x64xf32>, vector<64x256xf32>, vector<8x256xf32> -> vector<8x256xf32>
    %711 = arith.addf %691, %710 : vector<8x256xf32>
    %712 = vector.extract_strided_slice %711 {offsets = [0, 0], sizes = [8, 192], strides = [1, 1]} : vector<8x256xf32> to vector<8x192xf32>
    %713 = arith.negf %712 : vector<8x192xf32>
    %714 = math.exp %713 : vector<8x192xf32>
    %cst_194 = arith.constant 1.000000e+00 : f32
    %715 = vector.broadcast %cst_194 : f32 to vector<8x192xf32>
    %716 = arith.addf %715, %714 : vector<8x192xf32>
    %717 = arith.divf %715, %716 : vector<8x192xf32>
    %718 = vector.extract_strided_slice %711 {offsets = [0, 192], sizes = [8, 64], strides = [1, 1]} : vector<8x256xf32> to vector<8x64xf32>
    %719 = math.tanh %718 : vector<8x64xf32>
    %720 = vector.extract_strided_slice %717 {offsets = [0, 64], sizes = [8, 64], strides = [1, 1]} : vector<8x192xf32> to vector<8x64xf32>
    %721 = arith.mulf %720, %676 : vector<8x64xf32>
    %722 = vector.extract_strided_slice %717 {offsets = [0, 0], sizes = [8, 64], strides = [1, 1]} : vector<8x192xf32> to vector<8x64xf32>
    %723 = arith.mulf %722, %719 : vector<8x64xf32>
    %724 = arith.addf %721, %723 : vector<8x64xf32>
    %725 = vector.extract_strided_slice %717 {offsets = [0, 128], sizes = [8, 64], strides = [1, 1]} : vector<8x192xf32> to vector<8x64xf32>
    %726 = math.tanh %724 : vector<8x64xf32>
    %727 = arith.mulf %725, %726 : vector<8x64xf32>
    %728 = vector.broadcast %15 : vector<1x64xf32> to vector<8x64xf32>
    %729 = arith.mulf %709, %728 : vector<8x64xf32>
    %cst_195 = arith.constant dense<0.000000e+00> : vector<8xf32>
    %730 = vector.multi_reduction <add>, %729, %cst_195 [1] : vector<8x64xf32> to vector<8xf32>
    %731 = vector.shape_cast %730 : vector<8xf32> to vector<8x1xf32>
    %c0_196 = arith.constant 0 : index
    %c14_197 = arith.constant 14 : index
    %732 = vector.load %arg17[%c0_196, %c14_197] : memref<8x18xf32, #tpu.memory_space<vmem>>, vector<8x1xf32>
    tpu.vector_store %arg17[%c0_196, %c14_197], %731 {strides = array<i32>} : memref<8x18xf32, #tpu.memory_space<vmem>>, vector<8x1xf32>,
    %733 = vector.broadcast %16 : vector<1x64xf32> to vector<8x64xf32>
    %734 = arith.mulf %727, %733 : vector<8x64xf32>
    %cst_198 = arith.constant dense<0.000000e+00> : vector<8xf32>
    %735 = vector.multi_reduction <add>, %734, %cst_198 [1] : vector<8x64xf32> to vector<8xf32>
    %736 = vector.shape_cast %735 : vector<8xf32> to vector<8x1xf32>
    %c0_199 = arith.constant 0 : index
    %c3_200 = arith.constant 3 : index
    %737 = vector.load %arg18[%c0_199, %c3_200] : memref<8x18xf32, #tpu.memory_space<vmem>>, vector<8x1xf32>
    tpu.vector_store %arg18[%c0_199, %c3_200], %736 {strides = array<i32>} : memref<8x18xf32, #tpu.memory_space<vmem>>, vector<8x1xf32>,
    %c120_201 = arith.constant 120 : index
    %c0_202 = arith.constant 0 : index
    %738 = vector.load %arg15[%c120_201, %c0_202] : memref<144x256xf32, #tpu.memory_space<vmem>>, vector<8x256xf32>
    %c16_203 = arith.constant 16 : index
    %c0_204 = arith.constant 0 : index
    %739 = vector.load %arg16[%c16_203, %c0_204] : memref<144x256xf32, #tpu.memory_space<vmem>>, vector<8x256xf32>
    %cst_205 = arith.constant dense<0.000000e+00> : vector<8x256xf32>
    %740 = tpu.matmul %709, %13, %cst_205 {dimension_numbers = #tpu.dot_dimension_numbers<[1], [0], [0], [1], [0, 0, 1, 1], [], []>} : vector<8x64xf32>, vector<64x256xf32>, vector<8x256xf32> -> vector<8x256xf32>
    %741 = arith.addf %738, %740 : vector<8x256xf32>
    %742 = vector.extract_strided_slice %741 {offsets = [0, 0], sizes = [8, 192], strides = [1, 1]} : vector<8x256xf32> to vector<8x192xf32>
    %743 = arith.negf %742 : vector<8x192xf32>
    %744 = math.exp %743 : vector<8x192xf32>
    %cst_206 = arith.constant 1.000000e+00 : f32
    %745 = vector.broadcast %cst_206 : f32 to vector<8x192xf32>
    %746 = arith.addf %745, %744 : vector<8x192xf32>
    %747 = arith.divf %745, %746 : vector<8x192xf32>
    %748 = vector.extract_strided_slice %741 {offsets = [0, 192], sizes = [8, 64], strides = [1, 1]} : vector<8x256xf32> to vector<8x64xf32>
    %749 = math.tanh %748 : vector<8x64xf32>
    %750 = vector.extract_strided_slice %747 {offsets = [0, 64], sizes = [8, 64], strides = [1, 1]} : vector<8x192xf32> to vector<8x64xf32>
    %751 = arith.mulf %750, %706 : vector<8x64xf32>
    %752 = vector.extract_strided_slice %747 {offsets = [0, 0], sizes = [8, 64], strides = [1, 1]} : vector<8x192xf32> to vector<8x64xf32>
    %753 = arith.mulf %752, %749 : vector<8x64xf32>
    %754 = arith.addf %751, %753 : vector<8x64xf32>
    %755 = vector.extract_strided_slice %747 {offsets = [0, 128], sizes = [8, 64], strides = [1, 1]} : vector<8x192xf32> to vector<8x64xf32>
    %756 = math.tanh %754 : vector<8x64xf32>
    %757 = arith.mulf %755, %756 : vector<8x64xf32>
    %cst_207 = arith.constant dense<0.000000e+00> : vector<8x256xf32>
    %758 = tpu.matmul %727, %14, %cst_207 {dimension_numbers = #tpu.dot_dimension_numbers<[1], [0], [0], [1], [0, 0, 1, 1], [], []>} : vector<8x64xf32>, vector<64x256xf32>, vector<8x256xf32> -> vector<8x256xf32>
    %759 = arith.addf %739, %758 : vector<8x256xf32>
    %760 = vector.extract_strided_slice %759 {offsets = [0, 0], sizes = [8, 192], strides = [1, 1]} : vector<8x256xf32> to vector<8x192xf32>
    %761 = arith.negf %760 : vector<8x192xf32>
    %762 = math.exp %761 : vector<8x192xf32>
    %cst_208 = arith.constant 1.000000e+00 : f32
    %763 = vector.broadcast %cst_208 : f32 to vector<8x192xf32>
    %764 = arith.addf %763, %762 : vector<8x192xf32>
    %765 = arith.divf %763, %764 : vector<8x192xf32>
    %766 = vector.extract_strided_slice %759 {offsets = [0, 192], sizes = [8, 64], strides = [1, 1]} : vector<8x256xf32> to vector<8x64xf32>
    %767 = math.tanh %766 : vector<8x64xf32>
    %768 = vector.extract_strided_slice %765 {offsets = [0, 64], sizes = [8, 64], strides = [1, 1]} : vector<8x192xf32> to vector<8x64xf32>
    %769 = arith.mulf %768, %724 : vector<8x64xf32>
    %770 = vector.extract_strided_slice %765 {offsets = [0, 0], sizes = [8, 64], strides = [1, 1]} : vector<8x192xf32> to vector<8x64xf32>
    %771 = arith.mulf %770, %767 : vector<8x64xf32>
    %772 = arith.addf %769, %771 : vector<8x64xf32>
    %773 = vector.extract_strided_slice %765 {offsets = [0, 128], sizes = [8, 64], strides = [1, 1]} : vector<8x192xf32> to vector<8x64xf32>
    %774 = math.tanh %772 : vector<8x64xf32>
    %775 = arith.mulf %773, %774 : vector<8x64xf32>
    %776 = vector.broadcast %15 : vector<1x64xf32> to vector<8x64xf32>
    %777 = arith.mulf %757, %776 : vector<8x64xf32>
    %cst_209 = arith.constant dense<0.000000e+00> : vector<8xf32>
    %778 = vector.multi_reduction <add>, %777, %cst_209 [1] : vector<8x64xf32> to vector<8xf32>
    %779 = vector.shape_cast %778 : vector<8xf32> to vector<8x1xf32>
    %c0_210 = arith.constant 0 : index
    %c15_211 = arith.constant 15 : index
    %780 = vector.load %arg17[%c0_210, %c15_211] : memref<8x18xf32, #tpu.memory_space<vmem>>, vector<8x1xf32>
    tpu.vector_store %arg17[%c0_210, %c15_211], %779 {strides = array<i32>} : memref<8x18xf32, #tpu.memory_space<vmem>>, vector<8x1xf32>,
    %781 = vector.broadcast %16 : vector<1x64xf32> to vector<8x64xf32>
    %782 = arith.mulf %775, %781 : vector<8x64xf32>
    %cst_212 = arith.constant dense<0.000000e+00> : vector<8xf32>
    %783 = vector.multi_reduction <add>, %782, %cst_212 [1] : vector<8x64xf32> to vector<8xf32>
    %784 = vector.shape_cast %783 : vector<8xf32> to vector<8x1xf32>
    %c0_213 = arith.constant 0 : index
    %c2_214 = arith.constant 2 : index
    %785 = vector.load %arg18[%c0_213, %c2_214] : memref<8x18xf32, #tpu.memory_space<vmem>>, vector<8x1xf32>
    tpu.vector_store %arg18[%c0_213, %c2_214], %784 {strides = array<i32>} : memref<8x18xf32, #tpu.memory_space<vmem>>, vector<8x1xf32>,
    %c128_215 = arith.constant 128 : index
    %c0_216 = arith.constant 0 : index
    %786 = vector.load %arg15[%c128_215, %c0_216] : memref<144x256xf32, #tpu.memory_space<vmem>>, vector<8x256xf32>
    %c8_217 = arith.constant 8 : index
    %c0_218 = arith.constant 0 : index
    %787 = vector.load %arg16[%c8_217, %c0_218] : memref<144x256xf32, #tpu.memory_space<vmem>>, vector<8x256xf32>
    %cst_219 = arith.constant dense<0.000000e+00> : vector<8x256xf32>
    %788 = tpu.matmul %757, %13, %cst_219 {dimension_numbers = #tpu.dot_dimension_numbers<[1], [0], [0], [1], [0, 0, 1, 1], [], []>} : vector<8x64xf32>, vector<64x256xf32>, vector<8x256xf32> -> vector<8x256xf32>
    %789 = arith.addf %786, %788 : vector<8x256xf32>
    %790 = vector.extract_strided_slice %789 {offsets = [0, 0], sizes = [8, 192], strides = [1, 1]} : vector<8x256xf32> to vector<8x192xf32>
    %791 = arith.negf %790 : vector<8x192xf32>
    %792 = math.exp %791 : vector<8x192xf32>
    %cst_220 = arith.constant 1.000000e+00 : f32
    %793 = vector.broadcast %cst_220 : f32 to vector<8x192xf32>
    %794 = arith.addf %793, %792 : vector<8x192xf32>
    %795 = arith.divf %793, %794 : vector<8x192xf32>
    %796 = vector.extract_strided_slice %789 {offsets = [0, 192], sizes = [8, 64], strides = [1, 1]} : vector<8x256xf32> to vector<8x64xf32>
    %797 = math.tanh %796 : vector<8x64xf32>
    %798 = vector.extract_strided_slice %795 {offsets = [0, 64], sizes = [8, 64], strides = [1, 1]} : vector<8x192xf32> to vector<8x64xf32>
    %799 = arith.mulf %798, %754 : vector<8x64xf32>
    %800 = vector.extract_strided_slice %795 {offsets = [0, 0], sizes = [8, 64], strides = [1, 1]} : vector<8x192xf32> to vector<8x64xf32>
    %801 = arith.mulf %800, %797 : vector<8x64xf32>
    %802 = arith.addf %799, %801 : vector<8x64xf32>
    %803 = vector.extract_strided_slice %795 {offsets = [0, 128], sizes = [8, 64], strides = [1, 1]} : vector<8x192xf32> to vector<8x64xf32>
    %804 = math.tanh %802 : vector<8x64xf32>
    %805 = arith.mulf %803, %804 : vector<8x64xf32>
    %cst_221 = arith.constant dense<0.000000e+00> : vector<8x256xf32>
    %806 = tpu.matmul %775, %14, %cst_221 {dimension_numbers = #tpu.dot_dimension_numbers<[1], [0], [0], [1], [0, 0, 1, 1], [], []>} : vector<8x64xf32>, vector<64x256xf32>, vector<8x256xf32> -> vector<8x256xf32>
    %807 = arith.addf %787, %806 : vector<8x256xf32>
    %808 = vector.extract_strided_slice %807 {offsets = [0, 0], sizes = [8, 192], strides = [1, 1]} : vector<8x256xf32> to vector<8x192xf32>
    %809 = arith.negf %808 : vector<8x192xf32>
    %810 = math.exp %809 : vector<8x192xf32>
    %cst_222 = arith.constant 1.000000e+00 : f32
    %811 = vector.broadcast %cst_222 : f32 to vector<8x192xf32>
    %812 = arith.addf %811, %810 : vector<8x192xf32>
    %813 = arith.divf %811, %812 : vector<8x192xf32>
    %814 = vector.extract_strided_slice %807 {offsets = [0, 192], sizes = [8, 64], strides = [1, 1]} : vector<8x256xf32> to vector<8x64xf32>
    %815 = math.tanh %814 : vector<8x64xf32>
    %816 = vector.extract_strided_slice %813 {offsets = [0, 64], sizes = [8, 64], strides = [1, 1]} : vector<8x192xf32> to vector<8x64xf32>
    %817 = arith.mulf %816, %772 : vector<8x64xf32>
    %818 = vector.extract_strided_slice %813 {offsets = [0, 0], sizes = [8, 64], strides = [1, 1]} : vector<8x192xf32> to vector<8x64xf32>
    %819 = arith.mulf %818, %815 : vector<8x64xf32>
    %820 = arith.addf %817, %819 : vector<8x64xf32>
    %821 = vector.extract_strided_slice %813 {offsets = [0, 128], sizes = [8, 64], strides = [1, 1]} : vector<8x192xf32> to vector<8x64xf32>
    %822 = math.tanh %820 : vector<8x64xf32>
    %823 = arith.mulf %821, %822 : vector<8x64xf32>
    %824 = vector.broadcast %15 : vector<1x64xf32> to vector<8x64xf32>
    %825 = arith.mulf %805, %824 : vector<8x64xf32>
    %cst_223 = arith.constant dense<0.000000e+00> : vector<8xf32>
    %826 = vector.multi_reduction <add>, %825, %cst_223 [1] : vector<8x64xf32> to vector<8xf32>
    %827 = vector.shape_cast %826 : vector<8xf32> to vector<8x1xf32>
    %c0_224 = arith.constant 0 : index
    %c16_225 = arith.constant 16 : index
    %828 = vector.load %arg17[%c0_224, %c16_225] : memref<8x18xf32, #tpu.memory_space<vmem>>, vector<8x1xf32>
    tpu.vector_store %arg17[%c0_224, %c16_225], %827 {strides = array<i32>} : memref<8x18xf32, #tpu.memory_space<vmem>>, vector<8x1xf32>,
    %829 = vector.broadcast %16 : vector<1x64xf32> to vector<8x64xf32>
    %830 = arith.mulf %823, %829 : vector<8x64xf32>
    %cst_226 = arith.constant dense<0.000000e+00> : vector<8xf32>
    %831 = vector.multi_reduction <add>, %830, %cst_226 [1] : vector<8x64xf32> to vector<8xf32>
    %832 = vector.shape_cast %831 : vector<8xf32> to vector<8x1xf32>
    %c0_227 = arith.constant 0 : index
    %c1_228 = arith.constant 1 : index
    %833 = vector.load %arg18[%c0_227, %c1_228] : memref<8x18xf32, #tpu.memory_space<vmem>>, vector<8x1xf32>
    tpu.vector_store %arg18[%c0_227, %c1_228], %832 {strides = array<i32>} : memref<8x18xf32, #tpu.memory_space<vmem>>, vector<8x1xf32>,
    %c136_229 = arith.constant 136 : index
    %c0_230 = arith.constant 0 : index
    %834 = vector.load %arg15[%c136_229, %c0_230] : memref<144x256xf32, #tpu.memory_space<vmem>>, vector<8x256xf32>
    %c0_231 = arith.constant 0 : index
    %c0_232 = arith.constant 0 : index
    %835 = vector.load %arg16[%c0_231, %c0_232] : memref<144x256xf32, #tpu.memory_space<vmem>>, vector<8x256xf32>
    %cst_233 = arith.constant dense<0.000000e+00> : vector<8x256xf32>
    %836 = tpu.matmul %805, %13, %cst_233 {dimension_numbers = #tpu.dot_dimension_numbers<[1], [0], [0], [1], [0, 0, 1, 1], [], []>} : vector<8x64xf32>, vector<64x256xf32>, vector<8x256xf32> -> vector<8x256xf32>
    %837 = arith.addf %834, %836 : vector<8x256xf32>
    %838 = vector.extract_strided_slice %837 {offsets = [0, 0], sizes = [8, 192], strides = [1, 1]} : vector<8x256xf32> to vector<8x192xf32>
    %839 = arith.negf %838 : vector<8x192xf32>
    %840 = math.exp %839 : vector<8x192xf32>
    %cst_234 = arith.constant 1.000000e+00 : f32
    %841 = vector.broadcast %cst_234 : f32 to vector<8x192xf32>
    %842 = arith.addf %841, %840 : vector<8x192xf32>
    %843 = arith.divf %841, %842 : vector<8x192xf32>
    %844 = vector.extract_strided_slice %837 {offsets = [0, 192], sizes = [8, 64], strides = [1, 1]} : vector<8x256xf32> to vector<8x64xf32>
    %845 = math.tanh %844 : vector<8x64xf32>
    %846 = vector.extract_strided_slice %843 {offsets = [0, 64], sizes = [8, 64], strides = [1, 1]} : vector<8x192xf32> to vector<8x64xf32>
    %847 = arith.mulf %846, %802 : vector<8x64xf32>
    %848 = vector.extract_strided_slice %843 {offsets = [0, 0], sizes = [8, 64], strides = [1, 1]} : vector<8x192xf32> to vector<8x64xf32>
    %849 = arith.mulf %848, %845 : vector<8x64xf32>
    %850 = arith.addf %847, %849 : vector<8x64xf32>
    %851 = vector.extract_strided_slice %843 {offsets = [0, 128], sizes = [8, 64], strides = [1, 1]} : vector<8x192xf32> to vector<8x64xf32>
    %852 = math.tanh %850 : vector<8x64xf32>
    %853 = arith.mulf %851, %852 : vector<8x64xf32>
    %cst_235 = arith.constant dense<0.000000e+00> : vector<8x256xf32>
    %854 = tpu.matmul %823, %14, %cst_235 {dimension_numbers = #tpu.dot_dimension_numbers<[1], [0], [0], [1], [0, 0, 1, 1], [], []>} : vector<8x64xf32>, vector<64x256xf32>, vector<8x256xf32> -> vector<8x256xf32>
    %855 = arith.addf %835, %854 : vector<8x256xf32>
    %856 = vector.extract_strided_slice %855 {offsets = [0, 0], sizes = [8, 192], strides = [1, 1]} : vector<8x256xf32> to vector<8x192xf32>
    %857 = arith.negf %856 : vector<8x192xf32>
    %858 = math.exp %857 : vector<8x192xf32>
    %cst_236 = arith.constant 1.000000e+00 : f32
    %859 = vector.broadcast %cst_236 : f32 to vector<8x192xf32>
    %860 = arith.addf %859, %858 : vector<8x192xf32>
    %861 = arith.divf %859, %860 : vector<8x192xf32>
    %862 = vector.extract_strided_slice %855 {offsets = [0, 192], sizes = [8, 64], strides = [1, 1]} : vector<8x256xf32> to vector<8x64xf32>
    %863 = math.tanh %862 : vector<8x64xf32>
    %864 = vector.extract_strided_slice %861 {offsets = [0, 64], sizes = [8, 64], strides = [1, 1]} : vector<8x192xf32> to vector<8x64xf32>
    %865 = arith.mulf %864, %820 : vector<8x64xf32>
    %866 = vector.extract_strided_slice %861 {offsets = [0, 0], sizes = [8, 64], strides = [1, 1]} : vector<8x192xf32> to vector<8x64xf32>
    %867 = arith.mulf %866, %863 : vector<8x64xf32>
    %868 = arith.addf %865, %867 : vector<8x64xf32>
    %869 = vector.extract_strided_slice %861 {offsets = [0, 128], sizes = [8, 64], strides = [1, 1]} : vector<8x192xf32> to vector<8x64xf32>
    %870 = math.tanh %868 : vector<8x64xf32>
    %871 = arith.mulf %869, %870 : vector<8x64xf32>
    %872 = vector.broadcast %15 : vector<1x64xf32> to vector<8x64xf32>
    %873 = arith.mulf %853, %872 : vector<8x64xf32>
    %cst_237 = arith.constant dense<0.000000e+00> : vector<8xf32>
    %874 = vector.multi_reduction <add>, %873, %cst_237 [1] : vector<8x64xf32> to vector<8xf32>
    %875 = vector.shape_cast %874 : vector<8xf32> to vector<8x1xf32>
    %c0_238 = arith.constant 0 : index
    %c17_239 = arith.constant 17 : index
    %876 = vector.load %arg17[%c0_238, %c17_239] : memref<8x18xf32, #tpu.memory_space<vmem>>, vector<8x1xf32>
    tpu.vector_store %arg17[%c0_238, %c17_239], %875 {strides = array<i32>} : memref<8x18xf32, #tpu.memory_space<vmem>>, vector<8x1xf32>,
    %877 = vector.broadcast %16 : vector<1x64xf32> to vector<8x64xf32>
    %878 = arith.mulf %871, %877 : vector<8x64xf32>
    %cst_240 = arith.constant dense<0.000000e+00> : vector<8xf32>
    %879 = vector.multi_reduction <add>, %878, %cst_240 [1] : vector<8x64xf32> to vector<8xf32>
    %880 = vector.shape_cast %879 : vector<8xf32> to vector<8x1xf32>
    %c0_241 = arith.constant 0 : index
    %c0_242 = arith.constant 0 : index
    %881 = vector.load %arg18[%c0_241, %c0_242] : memref<8x18xf32, #tpu.memory_space<vmem>>, vector<8x1xf32>
    tpu.vector_store %arg18[%c0_241, %c0_242], %880 {strides = array<i32>} : memref<8x18xf32, #tpu.memory_space<vmem>>, vector<8x1xf32>,
    %c0_243 = arith.constant 0 : index
    %c0_244 = arith.constant 0 : index
    %882 = vector.load %arg17[%c0_243, %c0_244] : memref<8x18xf32, #tpu.memory_space<vmem>>, vector<8x18xf32>
    %c0_245 = arith.constant 0 : index
    %c0_246 = arith.constant 0 : index
    %883 = vector.load %arg18[%c0_245, %c0_246] : memref<8x18xf32, #tpu.memory_space<vmem>>, vector<8x18xf32>
    %884 = arith.addf %882, %883 : vector<8x18xf32>
    %c0_247 = arith.constant 0 : index
    %c0_248 = arith.constant 0 : index
    %885 = vector.load %arg9[%c0_247, %c0_248] : memref<1x1xf32, #tpu.memory_space<vmem>>, vector<1x1xf32>
    %886 = vector.broadcast %885 : vector<1x1xf32> to vector<8x18xf32>
    %887 = arith.addf %884, %886 : vector<8x18xf32>
    %888 = math.tanh %887 : vector<8x18xf32>
    %c0_249 = arith.constant 0 : index
    %c0_250 = arith.constant 0 : index
    %889 = vector.load %arg10[%c0_249, %c0_250] : memref<18x128xf32, #tpu.memory_space<vmem>>, vector<18x128xf32>
    %cst_251 = arith.constant dense<0.000000e+00> : vector<8x128xf32>
    %890 = tpu.matmul %888, %889, %cst_251 {dimension_numbers = #tpu.dot_dimension_numbers<[1], [0], [0], [1], [0, 0, 1, 1], [], []>} : vector<8x18xf32>, vector<18x128xf32>, vector<8x128xf32> -> vector<8x128xf32>
    %c0_252 = arith.constant 0 : index
    %c0_253 = arith.constant 0 : index
    %891 = vector.load %arg11[%c0_252, %c0_253] : memref<1x128xf32, #tpu.memory_space<vmem>>, vector<1x128xf32>
    %892 = vector.broadcast %891 : vector<1x128xf32> to vector<8x128xf32>
    %893 = arith.addf %890, %892 : vector<8x128xf32>
    %894 = math.tanh %893 : vector<8x128xf32>
    %c0_254 = arith.constant 0 : index
    %c0_255 = arith.constant 0 : index
    %895 = vector.load %arg12[%c0_254, %c0_255] : memref<128x1xf32, #tpu.memory_space<vmem>>, vector<128x1xf32>
    %cst_256 = arith.constant dense<0.000000e+00> : vector<8x1xf32>
    %896 = tpu.matmul %894, %895, %cst_256 {dimension_numbers = #tpu.dot_dimension_numbers<[1], [0], [0], [1], [0, 0, 1, 1], [], []>} : vector<8x128xf32>, vector<128x1xf32>, vector<8x1xf32> -> vector<8x1xf32>
    %c0_257 = arith.constant 0 : index
    %c0_258 = arith.constant 0 : index
    %897 = vector.load %arg13[%c0_257, %c0_258] : memref<1x1xf32, #tpu.memory_space<vmem>>, vector<1x1xf32>
    %898 = vector.broadcast %897 : vector<1x1xf32> to vector<8x1xf32>
    %899 = arith.addf %896, %898 : vector<8x1xf32>
    %900 = math.tanh %899 : vector<8x1xf32>
    %c0_259 = arith.constant 0 : index
    %c0_260 = arith.constant 0 : index
    %901 = vector.load %arg14[%c0_259, %c0_260] : memref<8x1xf32, #tpu.memory_space<vmem>>, vector<8x1xf32>
    tpu.vector_store %arg14[%c0_259, %c0_260], %900 {strides = array<i32>} : memref<8x1xf32, #tpu.memory_space<vmem>>, vector<8x1xf32>,
    return
  }
}

</mosaic_0001>

<bundles_post_ra>
// kernel: tpu_custom_call.1
= control target key start
LH: loop header
LB: loop body
LE: loop exit
PB: predicated region body
PF: predicated region fallthrough
CT: control target
= control target key end

     0   :  { %s8115_s0 = inlined_call_operand.vmem [shape: f32[144,24], index: 0, kind: input, shape index: {}]   ;;  %s8116_s1 = inlined_call_operand.hbm [shape: f32[24,256], index: 1, kind: input, shape index: {}]   ;;  %s8117_s2 = inlined_call_operand.vmem [shape: f32[64,256], index: 2, kind: input, shape index: {}]   ;;  %s8118_s3 = inlined_call_operand.hbm [shape: f32[1,256], index: 3, kind: input, shape index: {}]   ;;  %s8119_s4 = inlined_call_operand.hbm [shape: f32[24,256], index: 4, kind: input, shape index: {}]   ;;  %s8120_s5 = inlined_call_operand.vmem [shape: f32[64,256], index: 5, kind: input, shape index: {}]   ;;  %s8121_s6 = inlined_call_operand.vmem [shape: f32[1,256], index: 6, kind: input, shape index: {}]   ;;  %s8122_s7 = inlined_call_operand.vmem [shape: f32[1,64], index: 7, kind: input, shape index: {}]   ;;  %s8123_s8 = inlined_call_operand.vmem [shape: f32[1,64], index: 8, kind: input, shape index: {}]   ;;  %s8124_s9 = inlined_call_operand.<no memory space> [shape: f32[1,1], index: 9, kind: input, shape index: {}]   ;;  %s8125_s10 = inlined_call_operand.vmem [shape: f32[18,128], index: 10, kind: input, shape index: {}]   ;;  %s8126_s11 = inlined_call_operand.vmem [shape: f32[1,128], index: 11, kind: input, shape index: {}]   ;;  %s8127_s12 = inlined_call_operand.vmem [shape: f32[128,1], index: 12, kind: input, shape index: {}]   ;;  %s8128_s14 = inlined_call_operand.vmem [shape: f32[8,1], index: 14, kind: output, shape index: {}]   ;;  %s8129_s13 = inlined_call_operand.<no memory space> [shape: f32[1,1], index: 13, kind: input, shape index: {}]  }
   0x1   :  { %v19_v0 = vstv %s8124_s9  ;;  %v21_v1 = vstv %s8129_s13 }
   0x2   :  { %20 = vst [vmem:[#allocation6] sm:$0x1] %v19_v0  ;;  %22 = vst [vmem:[#allocation7] sm:$0x1] %v21_v1 }
   0x3   :  { %23 = vsyncpa [#allocation9], 0 }
   0x4   :  { %24 = vsyncpa [#allocation11], 0  ;;  %s5775_s17 = smov [#allocation10]   ;;  %s5776_s19 = smov [#allocation8]  }
   0x5   :  { %s47_s18 = sshll.u32 %s5775_s17, 4  ;;  %s32_s20 = sshll.u32 %s5776_s19, 4  ;;  %s48_s18 = int_to_ptr.vmem [resolvable:$true] %s47_s18  ;;  %s33_s20 = int_to_ptr.vmem [resolvable:$true] %s32_s20 }
   0x6   :  { %s5719_s21 = scalar_lea.vmem %s48_s18, 32  ;;  %p5724_p1 = scmp.lt.s32.totalorder %s48_s18, %s48_s18 }
   0x7   :  { %p5720_p0 = scmp.ne.s32.totalorder %s48_s18, %s5719_s21  ;;  %p5725_p2 = scmp.lt.s32.totalorder %s5719_s21, %s5719_s21 }
   0x9   :  { %p5726_p3 = por %p5725_p2, %p5724_p1 }
   0xb   :  { %p5727_p4 = pnand %p5726_p3, %p5720_p0 }
   0xd   :  { %5730 = shalt.err (!%p5727_p4)
}
   0xe   :  { %50 = dma.hbm_to_vmem [thread:$0]  %s8118_s3, 32, %s48_s18, [#allocation11]  }
   0xf   :  { %s5739_s13 = scalar_lea.vmem %s33_s20, 768  ;;  %p5744_p6 = scmp.lt.s32.totalorder %s33_s20, %s33_s20 }
  0x10   :  { %p5740_p5 = scmp.ne.s32.totalorder %s33_s20, %s5739_s13  ;;  %p5745_p7 = scmp.lt.s32.totalorder %s5739_s13, %s5739_s13 }
  0x12   :  { %p5746_p8 = por %p5745_p7, %p5744_p6 }
  0x14   :  { %p5747_p9 = pnand %p5746_p8, %p5740_p5 }
  0x16   :  { %5750 = shalt.err (!%p5747_p9)
}
  0x17   :  { %s5777_s23 = smov 256   ;;  %s5778_s24 = smov 16  }
  0x18   :  { %38 = dma.hbm_to_vmem [thread:$0]  %s8116_s1, 768, %s33_s20, [#allocation9], %s5777_s23, %s5777_s23, %s5778_s24  }
  0x19   :  { %s5779_s27 = smov [#allocation12]  }
  0x1a   :  { %s56_s28 = sshll.u32 %s5779_s27, 4  ;;  %s57_s28 = int_to_ptr.vmem [resolvable:$true] %s56_s28 }
  0x1b   :  { %s5759_s29 = scalar_lea.vmem %s57_s28, 768  ;;  %p5764_p11 = scmp.lt.s32.totalorder %s57_s28, %s57_s28 }
  0x1c   :  { %p5760_p10 = scmp.ne.s32.totalorder %s57_s28, %s5759_s29  ;;  %p5765_p12 = scmp.lt.s32.totalorder %s5759_s29, %s5759_s29 }
  0x1e   :  { %p5766_p13 = por %p5765_p12, %p5764_p11 }
  0x20   :  { %p5767_p0 = pnand %p5766_p13, %p5760_p10 }
  0x22   :  { %5770 = shalt.err (!%p5767_p0)
}
  0x23   :  { %62 = dma.hbm_to_vmem [thread:$0]  %s8119_s4, 768, %s57_s28, [#allocation11], %s5777_s23, %s5777_s23, %s5778_s24  }
  0x24   :  { %5771 = dma.done.wait [#allocation9], 768  }
  0x25   :  { %5772 = vsyncadd [#allocation9], 4294966528 }
  0x26   :  { %5773 = dma.done.wait [#allocation11], 800  }
  0x27   :  { %5774 = vsyncadd [#allocation11], 4294966496  ;;  %v8130_v2 = vmov 0.0   ;;  %v113_v3 = vld [vmem:[#allocation8 + $0x28] sm:$0xff]  ;;  %v112_v4 = vld [vmem:[#allocation8 + $0x20] sm:$0xff]  ;;  %vm126_vm0 = vcmask 195584  }
  0x28   :  { %245 = vmatprep.mubr.f32.mxu0 %v8130_v2  ;;  %472 = vmatprep.mubr.f32.mxu1 %v8130_v2  ;;  %v111_v5 = vld [vmem:[#allocation8 + $0x18] sm:$0xff]  ;;  %v110_v6 = vld [vmem:[#allocation8 + $0x10] sm:$0xff]  ;;  %v109_v7 = vld [vmem:[#allocation8 + $0x8] sm:$0xff]  ;;  %s5781_s28 = smov 64   ;;  %vm655_vm1 = vcmask 523264   ;;  %vm8151_vm2 = vcmask 7168  }
  0x29   :  { %207 = vmatprep.subr.mxu0 %v113_v3  ;;  %v108_v8 = vld [vmem:[#allocation8] sm:$0xff]  ;;  %v90_v9 = vld [vmem:[%s8115_s0] sm:$0xff]  ;;  %v5892_v14 = vld [vmem:[%s8117_s2 + $0x68] sm:$0xff]  ;;  %vm8152_vm3 = vcmask 146568   ;;  %vm1109_vm4 = vcmask 15368   ;;  %vm1337_vm5 = vcmask 23568  }
  0x2a   :  { %208 = vmatpush1.msra.mxu0 %v112_v4  ;;  %v5882_v10 = vld [vmem:[%s8117_s2 + $0x78] sm:$0xff]  ;;  %v395_v11 = vld [vmem:[#allocation12 + $0x28] sm:$0xff]  ;;  %v394_v12 = vld [vmem:[#allocation12 + $0x20] sm:$0xff]  ;;  %vm1565_vm6 = vcmask 31768   ;;  %vm8153_vm7 = vcmask 138368   ;;  %vm1343_vm8 = vcmask 130168  }
  0x2b   :  { %209 = vmatprep.subr.mxu0 %v111_v5  ;;  %v5887_v13 = vld [vmem:[%s8117_s2 + $0x70] sm:$0xff]  ;;  %434 = vmatprep.subr.mxu1 %v395_v11  ;;  %v393_v15 = vld [vmem:[#allocation12 + $0x18] sm:$0xff]  ;;  %v91_v18 = vld [vmem:[%s8115_s0 + $0x8] sm:$0xff]  ;;  %vm1571_vm9 = vcmask 121968   ;;  %vm1799_vm10 = vcmask 113768   ;;  %vm2027_vm11 = vcmask 105568  }
  0x2c   :  { %210 = vmatpush1.msra.mxu0 %v110_v6  ;;  %435 = vmatpush1.msra.mxu1 %v394_v12  ;;  %v5899_v16 = vld [vmem:[%s8117_s2 + $0x60] sm:$0xff]  ;;  %v392_v17 = vld [vmem:[#allocation12 + $0x10] sm:$0xff]  ;;  %v391_v19 = vld [vmem:[#allocation12 + $0x8] sm:$0xff]  ;;  %vm1793_vm12 = vcmask 39968   ;;  %vm2021_vm13 = vcmask 48168   ;;  %vm2249_vm14 = vcmask 56368  }
  0x2d   :  { %211 = vmatprep.subr.mxu0 %v109_v7  ;;  %436 = vmatprep.subr.mxu1 %v393_v15  ;;  %v390_v20 = vld [vmem:[#allocation12] sm:$0xff]  ;;  %v5911_v21 = vld [vmem:[%s8117_s2 + $0x58] sm:$0xff]  ;;  %v5917_v22 = vld [vmem:[%s8117_s2 + $0x50] sm:$0xff]  ;;  %vm2477_vm15 = vcmask 64568  }
  0x2e   :  { %212 = vmatpush1.msra.mxu0 %v108_v8  ;;  %437 = vmatpush1.msra.mxu1 %v392_v17  ;;  %v92_v23 = vld [vmem:[%s8115_s0 + $0x10] sm:$0xff]  ;;  %v5926_v24 = vld [vmem:[%s8117_s2 + $0x48] sm:$0xff]  ;;  %v5933_v25 = vld [vmem:[%s8117_s2 + $0x40] sm:$0xff] }
  0x2f   :  { %4952 = vmatmul.mubr.msk.f32.vlgmr.msra.gmra.mxu0 %vm126_vm0, %v90_v9  ;;  %675 = vmatprep.subr.mxu0 %v5882_v10  ;;  %v5940_v26 = vld [vmem:[%s8117_s2 + $0x38] sm:$0xff]  ;;  %v5947_v27 = vld [vmem:[%s8117_s2 + $0x30] sm:$0xff]  ;;  %v5957_v29 = vld [vmem:[%s8117_s2 + $0x28] sm:$0xff] }
  0x30   :  { %676 = vmatpush1.msra.mxu0 %v5887_v13  ;;  %251 = vmatprep.mubr.f32.mxu0 %v8130_v2  ;;  %v93_v28 = vld [vmem:[%s8115_s0 + $0x18] sm:$0xff]  ;;  %v5964_v30 = vld [vmem:[%s8117_s2 + $0x20] sm:$0xff]  ;;  %v5978_v32 = vld [vmem:[%s8117_s2 + $0x10] sm:$0xff] }
  0x31   :  { %677 = vmatprep.subr.mxu0 %v5892_v14  ;;  %438 = vmatprep.subr.mxu1 %v391_v19  ;;  %v5971_v31 = vld [vmem:[%s8117_s2 + $0x18] sm:$0xff]  ;;  %v94_v33 = vld [vmem:[%s8115_s0 + $0x20] sm:$0xff]  ;;  %v5988_v34 = vld [vmem:[%s8117_s2 + $0x8] sm:$0xff] }
  0x32   :  { %678 = vmatpush1.msra.mxu0 %v5899_v16  ;;  %439 = vmatpush1.msra.mxu1 %v390_v20  ;;  %v5995_v35 = vld [vmem:[%s8117_s2] sm:$0xff]  ;;  %v6002_v36 = vld [vmem:[%s8120_s5 + $0x78] sm:$0xff]  ;;  %v95_v37 = vld [vmem:[%s8115_s0 + $0x28] sm:$0xff] }
  0x33   :  { %4953 = vmatmul.mubr.msk.f32.gmra.mxu0 %vm126_vm0, %v91_v18  ;;  %4970 = vmatmul.mubr.msk.f32.vlgmr.msra.gmra.mxu1 %vm126_vm0, %v90_v9  ;;  %v6017_v38 = vld [vmem:[%s8120_s5 + $0x70] sm:$0xff]  ;;  %v6024_v39 = vld [vmem:[%s8120_s5 + $0x68] sm:$0xff]  ;;  %v6036_v41 = vld [vmem:[%s8120_s5 + $0x60] sm:$0xff] }
  0x34   :  { %257 = vmatprep.mubr.f32.mxu0 %v8130_v2  ;;  %679 = vmatprep.subr.mxu0 %v5911_v21  ;;  %v96_v40 = vld [vmem:[%s8115_s0 + $0x30] sm:$0xff]  ;;  %v6042_v42 = vld [vmem:[%s8120_s5 + $0x58] sm:$0xff]  ;;  %v6059_v45 = vld [vmem:[%s8120_s5 + $0x48] sm:$0xff] }
  0x35   :  { %478 = vmatprep.mubr.f32.mxu1 %v8130_v2  ;;  %680 = vmatpush1.msra.mxu0 %v5917_v22  ;;  %v6049_v43 = vld [vmem:[%s8120_s5 + $0x50] sm:$0xff]  ;;  %v97_v44 = vld [vmem:[%s8115_s0 + $0x38] sm:$0xff]  ;;  %v6066_v46 = vld [vmem:[%s8120_s5 + $0x40] sm:$0xff] }
  0x36   :  { %681 = vmatprep.subr.mxu0 %v5926_v24  ;;  %1018 = vmatprep.subr.mxu1 %v6002_v36  ;;  %v6073_v47 = vld [vmem:[%s8120_s5 + $0x38] sm:$0xff]  ;;  %v6080_v48 = vld [vmem:[%s8120_s5 + $0x30] sm:$0xff]  ;;  %v98_v49 = vld [vmem:[%s8115_s0 + $0x40] sm:$0xff] }
  0x37   :  { %4954 = vmatmul.mubr.msk.f32.gmra.mxu0 %vm126_vm0, %v92_v23  ;;  %4971 = vmatmul.mubr.msk.f32.gmra.mxu1 %vm126_vm0, %v91_v18  ;;  %v6090_v50 = vld [vmem:[%s8120_s5 + $0x28] sm:$0xff]  ;;  %v6097_v51 = vld [vmem:[%s8120_s5 + $0x20] sm:$0xff]  ;;  %v6104_v52 = vld [vmem:[%s8120_s5 + $0x18] sm:$0xff] }
  0x38   :  { %263 = vmatprep.mubr.f32.mxu0 %v8130_v2  ;;  %682 = vmatpush1.msra.mxu0 %v5933_v25  ;;  %v6111_v53 = vld [vmem:[%s8120_s5 + $0x10] sm:$0xff]  ;;  %v99_v54 = vld [vmem:[%s8115_s0 + $0x48] sm:$0xff]  ;;  %v6128_v56 = vld [vmem:[%s8120_s5] sm:$0xff] }
  0x39   :  { %683 = vmatprep.subr.mxu0 %v5940_v26  ;;  %484 = vmatprep.mubr.f32.mxu1 %v8130_v2  ;;  %v6121_v55 = vld [vmem:[%s8120_s5 + $0x8] sm:$0xff]  ;;  %v100_v57 = vld [vmem:[%s8115_s0 + $0x50] sm:$0xff]  ;;  %v101_v58 = vld [vmem:[%s8115_s0 + $0x58] sm:$0xff] }
  0x3a   :  { %684 = vmatpush1.msra.mxu0 %v5947_v27  ;;  %1019 = vmatpush1.msra.mxu1 %v6017_v38  ;;  %v102_v59 = vld [vmem:[%s8115_s0 + $0x60] sm:$0xff]  ;;  %v103_v60 = vld [vmem:[%s8115_s0 + $0x68] sm:$0xff]  ;;  %v104_v61 = vld [vmem:[%s8115_s0 + $0x70] sm:$0xff] }
  0x3b   :  { %4955 = vmatmul.mubr.msk.f32.gmra.mxu0 %vm126_vm0, %v93_v28  ;;  %685 = vmatprep.subr.mxu0 %v5957_v29  ;;  %v105_v62 = vld [vmem:[%s8115_s0 + $0x78] sm:$0xff]  ;;  %v106_v63 = vld [vmem:[%s8115_s0 + $0x80] sm:$0xff]  ;;  %v107_v0 = vld [vmem:[%s8115_s0 + $0x88] sm:$0xff] }
  0x3c   :  { %269 = vmatprep.mubr.f32.mxu0 %v8130_v2  ;;  %686 = vmatpush1.msra.mxu0 %v5964_v30 }
  0x3d   :  { %4972 = vmatmul.mubr.msk.f32.gmra.mxu1 %vm126_vm0, %v92_v23  ;;  %687 = vmatprep.subr.mxu0 %v5971_v31 }
  0x3e   :  { %490 = vmatprep.mubr.f32.mxu1 %v8130_v2  ;;  %688 = vmatpush1.msra.mxu0 %v5978_v32 }
  0x3f   :  { %4956 = vmatmul.mubr.msk.f32.gmra.mxu0 %vm126_vm0, %v94_v33  ;;  %689 = vmatprep.subr.mxu0 %v5988_v34 }
  0x40   :  { %275 = vmatprep.mubr.f32.mxu0 %v8130_v2  ;;  %690 = vmatpush1.msra.mxu0 %v5995_v35 }
  0x41   :  { %4973 = vmatmul.mubr.msk.f32.gmra.mxu1 %vm126_vm0, %v93_v28  ;;  %778 = vmatprep.subr.mxu0 %v6002_v36 }
  0x42   :  { %496 = vmatprep.mubr.f32.mxu1 %v8130_v2  ;;  %1020 = vmatprep.subr.mxu1 %v6024_v39 }
  0x43   :  { %4957 = vmatmul.mubr.msk.f32.gmra.mxu0 %vm126_vm0, %v95_v37  ;;  %1021 = vmatpush1.msra.mxu1 %v6036_v41 }
  0x44   :  { %281 = vmatprep.mubr.f32.mxu0 %v8130_v2  ;;  %1022 = vmatprep.subr.mxu1 %v6042_v42 }
  0x45   :  { %4974 = vmatmul.mubr.msk.f32.gmra.mxu1 %vm126_vm0, %v94_v33 }
  0x46   :  { %502 = vmatprep.mubr.f32.mxu1 %v8130_v2  ;;  %1023 = vmatpush1.msra.mxu1 %v6049_v43 }
  0x47   :  { %4958 = vmatmul.mubr.msk.f32.gmra.mxu0 %vm126_vm0, %v96_v40  ;;  %1024 = vmatprep.subr.mxu1 %v6059_v45 }
  0x48   :  { %287 = vmatprep.mubr.f32.mxu0 %v8130_v2  ;;  %1025 = vmatpush1.msra.mxu1 %v6066_v46 }
  0x49   :  { %4975 = vmatmul.mubr.msk.f32.gmra.mxu1 %vm126_vm0, %v95_v37  ;;  %1026 = vmatprep.subr.mxu1 %v6073_v47 }
  0x4a   :  { %508 = vmatprep.mubr.f32.mxu1 %v8130_v2  ;;  %1027 = vmatpush1.msra.mxu1 %v6080_v48 }
  0x4b   :  { %4959 = vmatmul.mubr.msk.f32.gmra.mxu0 %vm126_vm0, %v97_v44  ;;  %1028 = vmatprep.subr.mxu1 %v6090_v50 }
  0x4c   :  { %293 = vmatprep.mubr.f32.mxu0 %v8130_v2  ;;  %1029 = vmatpush1.msra.mxu1 %v6097_v51 }
  0x4d   :  { %4976 = vmatmul.mubr.msk.f32.gmra.mxu1 %vm126_vm0, %v96_v40  ;;  %1030 = vmatprep.subr.mxu1 %v6104_v52 }
  0x4e   :  { %514 = vmatprep.mubr.f32.mxu1 %v8130_v2  ;;  %1031 = vmatpush1.msra.mxu1 %v6111_v53 }
  0x4f   :  { %4960 = vmatmul.mubr.msk.f32.gmra.mxu0 %vm126_vm0, %v98_v49  ;;  %1032 = vmatprep.subr.mxu1 %v6121_v55 }
  0x50   :  { %299 = vmatprep.mubr.f32.mxu0 %v8130_v2  ;;  %1033 = vmatpush1.msra.mxu1 %v6128_v56 }
  0x51   :  { %4977 = vmatmul.mubr.msk.f32.gmra.mxu1 %vm126_vm0, %v97_v44  ;;  %1246 = vmatprep.subr.mxu1 %v6002_v36 }
  0x52   :  { %520 = vmatprep.mubr.f32.mxu1 %v8130_v2 }
  0x53   :  { %4961 = vmatmul.mubr.msk.f32.gmra.mxu0 %vm126_vm0, %v99_v54 }
  0x54   :  { %305 = vmatprep.mubr.f32.mxu0 %v8130_v2 }
  0x55   :  { %4978 = vmatmul.mubr.msk.f32.gmra.mxu1 %vm126_vm0, %v98_v49 }
  0x56   :  { %526 = vmatprep.mubr.f32.mxu1 %v8130_v2 }
  0x57   :  { %4962 = vmatmul.mubr.msk.f32.gmra.mxu0 %vm126_vm0, %v100_v57 }
  0x58   :  { %311 = vmatprep.mubr.f32.mxu0 %v8130_v2 }
  0x59   :  { %4979 = vmatmul.mubr.msk.f32.gmra.mxu1 %vm126_vm0, %v99_v54 }
  0x5a   :  { %532 = vmatprep.mubr.f32.mxu1 %v8130_v2 }
  0x5b   :  { %4963 = vmatmul.mubr.msk.f32.gmra.mxu0 %vm126_vm0, %v101_v58 }
  0x5c   :  { %317 = vmatprep.mubr.f32.mxu0 %v8130_v2 }
  0x5d   :  { %4980 = vmatmul.mubr.msk.f32.gmra.mxu1 %vm126_vm0, %v100_v57 }
  0x5e   :  { %538 = vmatprep.mubr.f32.mxu1 %v8130_v2 }
  0x5f   :  { %4964 = vmatmul.mubr.msk.f32.gmra.mxu0 %vm126_vm0, %v102_v59 }
  0x60   :  { %323 = vmatprep.mubr.f32.mxu0 %v8130_v2 }
  0x61   :  { %4981 = vmatmul.mubr.msk.f32.gmra.mxu1 %vm126_vm0, %v101_v58 }
  0x62   :  { %544 = vmatprep.mubr.f32.mxu1 %v8130_v2 }
  0x63   :  { %4965 = vmatmul.mubr.msk.f32.gmra.mxu0 %vm126_vm0, %v103_v60 }
  0x64   :  { %329 = vmatprep.mubr.f32.mxu0 %v8130_v2 }
  0x65   :  { %4982 = vmatmul.mubr.msk.f32.gmra.mxu1 %vm126_vm0, %v102_v59 }
  0x66   :  { %550 = vmatprep.mubr.f32.mxu1 %v8130_v2 }
  0x67   :  { %4966 = vmatmul.mubr.msk.f32.gmra.mxu0 %vm126_vm0, %v104_v61 }
  0x68   :  { %335 = vmatprep.mubr.f32.mxu0 %v8130_v2 }
  0x69   :  { %4983 = vmatmul.mubr.msk.f32.gmra.mxu1 %vm126_vm0, %v103_v60 }
  0x6a   :  { %556 = vmatprep.mubr.f32.mxu1 %v8130_v2 }
  0x6b   :  { %4967 = vmatmul.mubr.msk.f32.gmra.mxu0 %vm126_vm0, %v105_v62 }
  0x6c   :  { %341 = vmatprep.mubr.f32.mxu0 %v8130_v2 }
  0x6d   :  { %4984 = vmatmul.mubr.msk.f32.gmra.mxu1 %vm126_vm0, %v104_v61 }
  0x6e   :  { %562 = vmatprep.mubr.f32.mxu1 %v8130_v2 }
  0x6f   :  { %4968 = vmatmul.mubr.msk.f32.gmra.mxu0 %vm126_vm0, %v106_v63 }
  0x70   :  { %347 = vmatprep.mubr.f32.mxu0 %v8130_v2 }
  0x71   :  { %4985 = vmatmul.mubr.msk.f32.gmra.mxu1 %vm126_vm0, %v105_v62 }
  0x72   :  { %568 = vmatprep.mubr.f32.mxu1 %v8130_v2 }
  0x73   :  { %4969 = vmatmul.mubr.msk.f32.gmra.mxu0 %vm126_vm0, %v107_v0 }
  0x74   :  { %723 = vmatprep.mubr.f32.mxu0 %v8130_v2 }
  0x75   :  { %4986 = vmatmul.mubr.msk.f32.gmra.mxu1 %vm126_vm0, %v106_v63 }
  0x76   :  { %574 = vmatprep.mubr.f32.mxu1 %v8130_v2 }
  0x77   :  { %724 = vmatmul.mubr.f32.vlgmr.msra.gmra.mxu0 %v8130_v2 }
  0x78   :  { %779 = vmatpush1.msra.mxu0 %v6017_v38  ;;  %826 = vmatprep.mubr.f32.mxu0 %v8130_v2 }
  0x79   :  { %780 = vmatprep.subr.mxu0 %v6024_v39  ;;  %4987 = vmatmul.mubr.msk.f32.gmra.mxu1 %vm126_vm0, %v107_v0  ;;  %vm2705_vm0 = vcmask 72768  }
  0x7a   :  { %781 = vmatpush1.msra.mxu0 %v6036_v41  ;;  %1066 = vmatprep.mubr.f32.mxu1 %v8130_v2 }
  0x7b   :  { %782 = vmatprep.subr.mxu0 %v6042_v42 }
  0x7c   :  { %783 = vmatpush1.msra.mxu0 %v6049_v43 }
  0x7d   :  { %784 = vmatprep.subr.mxu0 %v6059_v45 }
  0x7e   :  { %785 = vmatpush1.msra.mxu0 %v6066_v46 }
  0x7f   :  { %786 = vmatprep.subr.mxu0 %v6073_v47 }
  0x80   :  { %787 = vmatpush1.msra.mxu0 %v6080_v48 }
  0x81   :  { %788 = vmatprep.subr.mxu0 %v6090_v50 }
  0x82   :  { %789 = vmatpush1.msra.mxu0 %v6097_v51 }
  0x83   :  { %790 = vmatprep.subr.mxu0 %v6104_v52 }
  0x84   :  { %791 = vmatpush1.msra.mxu0 %v6111_v53 }
  0x85   :  { %792 = vmatprep.subr.mxu0 %v6121_v55 }
  0x86   :  { %793 = vmatpush1.msra.mxu0 %v6128_v56 }
  0x87   :  { %827 = vmatmul.mubr.f32.vlgmr.msra.gmra.mxu0 %v8130_v2  ;;  %912 = vmatprep.subr.mxu0 %v5882_v10 }
  0x88   :  { %913 = vmatpush1.msra.mxu0 %v5887_v13  ;;  %960 = vmatprep.mubr.f32.mxu0 %v8130_v2 }
  0x89   :  { %914 = vmatprep.subr.mxu0 %v5892_v14 }
  0x8a   :  { %915 = vmatpush1.msra.mxu0 %v5899_v16 }
  0x8b   :  { %916 = vmatprep.subr.mxu0 %v5911_v21 }
  0x8c   :  { %917 = vmatpush1.msra.mxu0 %v5917_v22 }
  0x8d   :  { %918 = vmatprep.subr.mxu0 %v5926_v24 }
  0x8e   :  { %919 = vmatpush1.msra.mxu0 %v5933_v25 }
  0x8f   :  { %920 = vmatprep.subr.mxu0 %v5940_v26 }
  0x90   :  { %921 = vmatpush1.msra.mxu0 %v5947_v27 }
  0x91   :  { %922 = vmatprep.subr.mxu0 %v5957_v29 }
  0x92   :  { %923 = vmatpush1.msra.mxu0 %v5964_v30 }
  0x93   :  { %924 = vmatprep.subr.mxu0 %v5971_v31 }
  0x94   :  { %925 = vmatpush1.msra.mxu0 %v5978_v32 }
  0x95   :  { %926 = vmatprep.subr.mxu0 %v5988_v34 }
  0x96   :  { %927 = vmatpush1.msra.mxu0 %v5995_v35 }
  0x97   :  { %1140 = vmatprep.subr.mxu0 %v5882_v10 }
  0xef   :  { %v6232_v1 = vpop.f32.mrf.mxu0 }
  0xf1   :  { %v6234_v3 = vpop.f32.mrf.mxu0 }
  0xf3   :  { %v6236_v4 = vpop.f32.mrf.mxu0  ;;  %v6240_v6 = vpop.f32.mrf.mxu1 }
  0xf4   :  { %8154 = vst [vmem:[#allocation15_spill] sm:$0xff] %v6240_v6 }
  0xf5   :  { %v6238_v5 = vpop.f32.mrf.mxu0  ;;  %v6244_v8 = vpop.f32.mrf.mxu1 }
  0xf6   :  { %8155 = vst [vmem:[#allocation16_spill] sm:$0xff] %v6244_v8 }
  0xf7   :  { %v6242_v7 = vpop.f32.mrf.mxu0  ;;  %v6248_v11 = vpop.f32.mrf.mxu1 }
  0xf8   :  { %8156 = vst [vmem:[#allocation17_spill] sm:$0xff] %v6248_v11 }
  0xf9   :  { %v6246_v9 = vpop.f32.mrf.mxu0  ;;  %v6252_v15 = vpop.f32.mrf.mxu1 }
  0xfa   :  { %8157 = vst [vmem:[#allocation18_spill] sm:$0xff] %v6252_v15 }
  0xfb   :  { %v6250_v12 = vpop.f32.mrf.mxu0 }
  0xfd   :  { %v6254_v17 = vpop.f32.mrf.mxu0  ;;  %v6256_v18 = vpop.f32.mrf.mxu1 }
  0xfe   :  { %8158 = vst [vmem:[#allocation19_spill] sm:$0xff] %v6256_v18 }
  0xff   :  { %v6258_v19 = vpop.f32.mrf.mxu0  ;;  %v6260_v20 = vpop.f32.mrf.mxu1 }
 0x100   :  { %8159 = vst [vmem:[#allocation20_spill] sm:$0xff] %v6258_v19  ;;  %8160 = vst [vmem:[#allocation21_spill] sm:$0xff] %v6260_v20 }
 0x101   :  { %v6262_v23 = vpop.f32.mrf.mxu0  ;;  %v6264_v28 = vpop.f32.mrf.mxu1 }
 0x102   :  { %8161 = vst [vmem:[#allocation22_spill] sm:$0xff] %v6262_v23  ;;  %8162 = vst [vmem:[#allocation23_spill] sm:$0xff] %v6264_v28 }
 0x103   :  { %v6266_v33 = vpop.f32.mrf.mxu0  ;;  %v6268_v37 = vpop.f32.mrf.mxu1 }
 0x104   :  { %8163 = vst [vmem:[#allocation24_spill] sm:$0xff] %v6266_v33  ;;  %8164 = vst [vmem:[#allocation25_spill] sm:$0xff] %v6268_v37 }
 0x105   :  { %v6270_v40 = vpop.f32.mrf.mxu0  ;;  %v6272_v44 = vpop.f32.mrf.mxu1 }
 0x106   :  { %8165 = vst [vmem:[#allocation26_spill] sm:$0xff] %v6270_v40  ;;  %8166 = vst [vmem:[#allocation27_spill] sm:$0xff] %v6272_v44 }
 0x107   :  { %v6274_v49 = vpop.f32.mrf.mxu0  ;;  %v6276_v54 = vpop.f32.mrf.mxu1 }
 0x108   :  { %8167 = vst [vmem:[#allocation28_spill] sm:$0xff] %v6274_v49  ;;  %8168 = vst [vmem:[#allocation29_spill] sm:$0xff] %v6276_v54 }
 0x109   :  { %v6278_v57 = vpop.f32.mrf.mxu0  ;;  %v6280_v58 = vpop.f32.mrf.mxu1 }
 0x10a   :  { %8169 = vst [vmem:[#allocation30_spill] sm:$0xff] %v6278_v57  ;;  %8170 = vst [vmem:[#allocation31_spill] sm:$0xff] %v6280_v58 }
 0x10b   :  { %v6282_v59 = vpop.f32.mrf.mxu0  ;;  %v6284_v60 = vpop.f32.mrf.mxu1 }
 0x10c   :  { %8171 = vst [vmem:[#allocation32_spill] sm:$0xff] %v6282_v59  ;;  %8172 = vst [vmem:[#allocation33_spill] sm:$0xff] %v6284_v60 }
 0x10d   :  { %v6286_v61 = vpop.f32.mrf.mxu0  ;;  %v6288_v62 = vpop.f32.mrf.mxu1 }
 0x10e   :  { %8173 = vst [vmem:[#allocation34_spill] sm:$0xff] %v6286_v61  ;;  %8174 = vst [vmem:[#allocation35_spill] sm:$0xff] %v6288_v62 }
 0x10f   :  { %v6290_v63 = vpop.f32.mrf.mxu0  ;;  %v6292_v0 = vpop.f32.mrf.mxu1 }
 0x110   :  { %8175 = vst [vmem:[#allocation36_spill] sm:$0xff] %v6290_v63  ;;  %8176 = vst [vmem:[#allocation37_spill] sm:$0xff] %v6292_v0 }
 0x111   :  { %v6294_v2 = vpop.f32.mrf.mxu0  ;;  %v6296_v8 = vpop.f32.mrf.mxu1 }
 0x112   :  { %8177 = vst [vmem:[#allocation38_spill] sm:$0xff] %v6294_v2  ;;  %8178 = vst [vmem:[#allocation39_spill] sm:$0xff] %v6296_v8 }
 0x113   :  { %v6298_v6 = vpop.f32.mrf.mxu0  ;;  %v6300_v15 = vpop.f32.mrf.mxu1 }
 0x114   :  { %8179 = vst [vmem:[#allocation40_spill] sm:$0xff] %v6298_v6  ;;  %8180 = vst [vmem:[#allocation41_spill] sm:$0xff] %v6300_v15 }
 0x115   :  { %v6302_v11 = vpop.f32.mrf.mxu0  ;;  %v6304_v20 = vpop.f32.mrf.mxu1 }
 0x116   :  { %8181 = vst [vmem:[#allocation42_spill] sm:$0xff] %v6302_v11  ;;  %8182 = vst [vmem:[#allocation43_spill] sm:$0xff] %v6304_v20  ;;  %v116_v11 = vlaneseq }
 0x117   :  { %v6306_v18 = vpop.f32.mrf.mxu0  ;;  %v6308_v37 = vpop.f32.mrf.mxu1 }
 0x118   :  { %8183 = vst [vmem:[#allocation44_spill] sm:$0xff] %v6306_v18  ;;  %8184 = vst [vmem:[#allocation45_spill] sm:$0xff] %v6308_v37 }
 0x119   :  { %v6310_v28 = vpop.f32.mrf.mxu0  ;;  %v6312_v54 = vpop.f32.mrf.mxu1 }
 0x11a   :  { %8185 = vst [vmem:[#allocation46_spill] sm:$0xff] %v6310_v28  ;;  %8186 = vst [vmem:[#allocation47_spill] sm:$0xff] %v6312_v54 }
 0x11b   :  { %v6314_v44 = vpop.f32.mrf.mxu0  ;;  %v6316_v60 = vpop.f32.mrf.mxu1 }
 0x11c   :  { %8187 = vst [vmem:[#allocation48_spill] sm:$0xff] %v6314_v44  ;;  %8188 = vst [vmem:[#allocation49_spill] sm:$0xff] %v6316_v60 }
 0x11d   :  { %v6318_v58 = vpop.f32.mrf.mxu0  ;;  %v6320_v0 = vpop.f32.mrf.mxu1 }
 0x11e   :  { %8189 = vst [vmem:[#allocation50_spill] sm:$0xff] %v6318_v58  ;;  %8190 = vst [vmem:[#allocation51_spill] sm:$0xff] %v6320_v0 }
 0x11f   :  { %v6322_v62 = vpop.f32.mrf.mxu0  ;;  %v6324_v15 = vpop.f32.mrf.mxu1 }
 0x120   :  { %8191 = vst [vmem:[#allocation52_spill] sm:$0xff] %v6322_v62  ;;  %8192 = vst [vmem:[#allocation53_spill] sm:$0xff] %v6324_v15  ;;  %v114_v15 = vld [vmem:[#allocation10] sm:$0x3] }
 0x121   :  { %v6326_v8 = vpop.f32.mrf.mxu0  ;;  %v6328_v18 = vpop.f32.mrf.mxu1 }
 0x122   :  { %8193 = vst [vmem:[#allocation54_spill] sm:$0xff] %v6326_v8  ;;  %8194 = vst [vmem:[#allocation55_spill] sm:$0xff] %v6328_v18  ;;  %v117_v8 = vshrl.u32 %v116_v11, 7 }
 0x123   :  { %v6330_v37 = vpop.f32.mrf.mxu0  ;;  %v6332_v28 = vpop.f32.mrf.mxu1 }
 0x124   :  { %8195 = vst [vmem:[#allocation56_spill] sm:$0xff] %v6330_v37  ;;  %8196 = vst [vmem:[#allocation57_spill] sm:$0xff] %v6332_v28  ;;  %v122_v61 = vsub.s32 1, %v117_v8 }
 0x125   :  { %v6334_v20 = vpop.f32.mrf.mxu0  ;;  %v6336_v44 = vpop.f32.mrf.mxu1 }
 0x126   :  { %8197 = vst [vmem:[#allocation58_spill] sm:$0xff] %v6334_v20  ;;  %8198 = vst [vmem:[#allocation59_spill] sm:$0xff] %v6336_v44  ;;  %v118_v20 = vsub.s32 0, %v117_v8  ;;  %v6366_v28 = vrot.slane %v114_v15, %v122_v61 }
 0x127   :  { %v6338_v58 = vpop.f32.mrf.mxu0  ;;  %v6340_v6 = vpop.f32.mrf.mxu1 }
 0x128   :  { %8199 = vst [vmem:[#allocation60_spill] sm:$0xff] %v6338_v58  ;;  %8200 = vst [vmem:[#allocation61_spill] sm:$0xff] %v6340_v6  ;;  %v250_v8 = vadd.f32 %v6234_v3, %v6366_v28 }
 0x129   :  { %v6342_v62 = vpop.f32.mrf.mxu0  ;;  %v6344_v60 = vpop.f32.mrf.mxu1 }
 0x12a   :  { %8201 = vst [vmem:[#allocation62_spill] sm:$0xff] %v6342_v62  ;;  %8202 = vst [vmem:[#allocation63_spill] sm:$0xff] %v6344_v60  ;;  %v6360_v62 = vrot.slane %v114_v15, %v118_v20  ;;  %v396_v15 = vld [vmem:[%s8121_s6] sm:$0x3] }
 0x12b   :  { %v6346_v54 = vpop.f32.mrf.mxu0  ;;  %v6348_v2 = vpop.f32.mrf.mxu1  ;;  %v6386_v3 = vrot.slane %v396_v15, %v122_v61 }
 0x12c   :  { %8203 = vst [vmem:[#allocation64_spill] sm:$0xff] %v6346_v54  ;;  %8204 = vst [vmem:[#allocation65_spill] sm:$0xff] %v6348_v2  ;;  %v248_v18 = vadd.f32 %v6232_v1, %v6360_v62 }
 0x12d   :  { %v6350_v37 = vpop.f32.mrf.mxu0  ;;  %v6352_v63 = vpop.f32.mrf.mxu1 }
 0x12e   :  { %8205 = vst [vmem:[#allocation66_spill] sm:$0xff] %v6350_v37 }
 0x12f   :  { %v6354_v0 = vpop.f32.mrf.mxu0  ;;  %v6356_v58 = vpop.f32.mrf.mxu1 }
 0x130   :  { %8206 = vst [vmem:[#allocation67_spill] sm:$0xff] %v6354_v0  ;;  %8207 = vst [vmem:[#allocation68_spill] sm:$0xff] %v6356_v58 }
 0x131   :  { %v6358_v59 = vpop.f32.mrf.mxu0  ;;  %v6364_v54 = vpop.f32.mrf.mxu1 }
 0x132   :  { %8208 = vst [vmem:[#allocation69_spill] sm:$0xff] %v6358_v59 }
 0x133   :  { %v6362_v11 = vpop.f32.mrf.mxu0  ;;  %v6372_v0 = vpop.f32.mrf.mxu1 }
 0x134   :  { %8209 = vst [vmem:[#allocation70_spill] sm:$0xff] %v6362_v11  ;;  %v6383_v11 = vrot.slane %v396_v15, %v118_v20 }
 0x135   :  { %v6368_v37 = vpop.f32.mrf.mxu0  ;;  %v6376_v44 = vpop.f32.mrf.mxu1 }
 0x136   :  { %8210 = vst [vmem:[#allocation71_spill] sm:$0xff] %v6368_v37 }
 0x137   :  { %v725_v57 = vpop.f32.mrf.mxu0  ;;  %v6381_v37 = vpop.f32.mrf.mxu1 }
 0x138   :  { %v730_v59 = vadd.f32 %v725_v57, %v248_v18 }
 0x139   :  { %v727_v49 = vpop.f32.mrf.mxu0  ;;  %v576_v1 = vpop.f32.mrf.mxu1 }
 0x13a   :  { %v731_v6 = vadd.f32 %v727_v49, %v250_v8  ;;  %v577_v40 = vadd.f32 %v576_v1, %v6383_v11  ;;  %v4988_v20 = vmul.f32 -1.442695, %v730_v59 }
 0x13b   :  { %v578_v33 = vpop.f32.mrf.mxu1 }
 0x13c   :  { %5177 = vtanh.f32 %v731_v6  ;;  %v579_v8 = vadd.f32 %v578_v33, %v6386_v3 }
 0x147   :  { %v828_v2 = vpop.f32.mrf.mxu0 }
 0x148   :  { %v833_v18 = vadd.f32 %v828_v2, %v577_v40 }
 0x149   :  { %v830_v49 = vpop.f32.mrf.mxu0  ;;  %v5178_v57 = vpop.eup %5177 }
 0x14a   :  { %747 = vrot.lane.b32.xlu0 %v5178_v57, %s5781_s28  ;;  %v834_v60 = vadd.f32 %v830_v49, %v579_v8  ;;  %v4990_v19 = vmul.f32 -1.442695, %v833_v18 }
 0x14c   :  { %5179 = vtanh.f32 %v834_v60 }
 0x14d   :  { %5181 = vpow2.f32 %v4988_v20 }
 0x14e   :  { %5183 = vpow2.f32 %v4990_v19 }
 0x159   :  { %v5180_v23 = vpop.eup %5179 }
 0x15a   :  { %850 = vrot.lane.b32.xlu0 %v5180_v23, %s5781_s28  ;;  %v5182_v1 = vpop.eup %5181 }
 0x15b   :  { %v738_v58 = vadd.f32 1.0, %v5182_v1  ;;  %v5184_v2 = vpop.eup %5183 }
 0x15c   :  { %v841_v33 = vadd.f32 1.0, %v5184_v2 }
 0x15d   :  { %5185 = vrcp.f32 %v738_v58 }
 0x15e   :  { %5187 = vrcp.f32 %v841_v33 }
 0x16a   :  { %v5186_v40 = vpop.eup %5185 }
 0x16b   :  { %v5188_v49 = vpop.eup %5187  ;;  %v745_v23 = vmul.f32 0.0, %v5186_v40 }
 0x16c   :  { %v848_v58 = vmul.f32 0.0, %v5188_v49 }
 0x1bc   :  { %v748_v61 = vpop.permute.xlu0 %747 }
 0x1bd   :  { %v750_v15 = vmul.f32 %v5186_v40, %v748_v61  ;;  %v4989_v61 = vmul.f32 -1.442695, %v731_v6 }
 0x1bf   :  { %752 = vrot.lane.b32.xlu1 %v750_v15, %s5781_s28  ;;  %v4991_v15 = vmul.f32 -1.442695, %v834_v60 }
 0x1cc   :  { %v851_v57 = vpop.permute.xlu0 %850 }
 0x1cd   :  { %v853_v8 = vmul.f32 %v5188_v49, %v851_v57 }
 0x1cf   :  { %855 = vrot.lane.b32.xlu1 %v853_v8, %s5781_s28 }
 0x231   :  { %v753_v59 = vpop.permute.xlu1 %752 }
 0x232   :  { %v6393_v20 = vadd.f32 %v753_v59, %v745_v23 }
 0x234   :  { %5189 = vtanh.f32 %v6393_v20 }
 0x241   :  { %v5190_v19 = vpop.eup %5189  ;;  %v856_v18 = vpop.permute.xlu1 %855 }
 0x242   :  { %758 = vrot.lane.b32.xlu0 %v5190_v19, %s5781_s28  ;;  %v6397_v1 = vadd.f32 %v856_v18, %v848_v58  ;;  %v8212_v19 = vmov 0.0   ;;  %v254_v18 = vadd.f32 %v6236_v4, %v6360_v62 }
 0x244   :  { %5191 = vtanh.f32 %v6397_v1 }
 0x245   :  { %5193 = vpow2.f32 %v4989_v61  ;;  %v256_v61 = vadd.f32 %v6238_v5, %v6366_v28 }
 0x246   :  { %5195 = vpow2.f32 %v4991_v15 }
 0x251   :  { %v5192_v2 = vpop.eup %5191 }
 0x252   :  { %861 = vrot.lane.b32.xlu1 %v5192_v2, %s5781_s28  ;;  %v5194_v40 = vpop.eup %5193 }
 0x253   :  { %v739_v33 = vadd.f32 1.0, %v5194_v40  ;;  %v5196_v57 = vpop.eup %5195 }
 0x254   :  { %v842_v59 = vadd.f32 1.0, %v5196_v57  ;;  %v571_v57 = vadd.f32 %v6376_v44, %v6383_v11 }
 0x255   :  { %5197 = vrcp.f32 %v739_v33 }
 0x256   :  { %5199 = vrcp.f32 %v842_v59  ;;  %v573_v59 = vadd.f32 %v6381_v37, %v6386_v3 }
 0x262   :  { %v5198_v8 = vpop.eup %5197 }
 0x263   :  { %v5200_v6 = vpop.eup %5199 }
 0x2b4   :  { %v759_v23 = vpop.permute.xlu0 %758 }
 0x2b5   :  { %v6401_v49 = vmul.f32 %v5198_v8, %v759_v23 }
 0x2b7   :  { %8211 = vst [vmem:[#allocation72_spill] sm:$0xff] %v6401_v49  ;;  %4994 = vmatmul.mubr.msk.f32.vlgmr.msra.gmra.mxu0 %vm655_vm1, %v6401_v49 }
 0x2b8   :  { %1141 = vmatpush1.msra.mxu0 %v5887_v13  ;;  %1188 = vmatprep.mubr.f32.mxu0 %v8212_v19 }
 0x2b9   :  { %1142 = vmatprep.subr.mxu0 %v5892_v14 }
 0x2ba   :  { %1143 = vmatpush1.msra.mxu0 %v5899_v16 }
 0x2bb   :  { %1144 = vmatprep.subr.mxu0 %v5911_v21 }
 0x2bc   :  { %1145 = vmatpush1.msra.mxu0 %v5917_v22 }
 0x2bd   :  { %1146 = vmatprep.subr.mxu0 %v5926_v24 }
 0x2be   :  { %1147 = vmatpush1.msra.mxu0 %v5933_v25 }
 0x2bf   :  { %1148 = vmatprep.subr.mxu0 %v5940_v26 }
 0x2c0   :  { %1149 = vmatpush1.msra.mxu0 %v5947_v27 }
 0x2c1   :  { %1150 = vmatprep.subr.mxu0 %v5957_v29 }
 0x2c2   :  { %1151 = vmatpush1.msra.mxu0 %v5964_v30 }
 0x2c3   :  { %1152 = vmatprep.subr.mxu0 %v5971_v31 }
 0x2c4   :  { %1153 = vmatpush1.msra.mxu0 %v5978_v32  ;;  %v862_v60 = vpop.permute.xlu1 %861 }
 0x2c5   :  { %1154 = vmatprep.subr.mxu0 %v5988_v34  ;;  %v6422_v58 = vmul.f32 %v5200_v6, %v862_v60 }
 0x2c6   :  { %1155 = vmatpush1.msra.mxu0 %v5995_v35 }
 0x2c7   :  { %1368 = vmatprep.subr.mxu0 %v5882_v10  ;;  %8213 = vst [vmem:[#allocation73_spill] sm:$0xff] %v6422_v58  ;;  %4997 = vmatmul.mubr.msk.f32.vlgmr.msra.gmra.mxu1 %vm655_vm1, %v6422_v58 }
 0x2c8   :  { %1247 = vmatpush1.msra.mxu1 %v6017_v38  ;;  %1294 = vmatprep.mubr.f32.mxu1 %v8212_v19 }
 0x2c9   :  { %1248 = vmatprep.subr.mxu1 %v6024_v39 }
 0x2ca   :  { %1249 = vmatpush1.msra.mxu1 %v6036_v41 }
 0x2cb   :  { %1250 = vmatprep.subr.mxu1 %v6042_v42 }
 0x2cc   :  { %1251 = vmatpush1.msra.mxu1 %v6049_v43 }
 0x2cd   :  { %1252 = vmatprep.subr.mxu1 %v6059_v45 }
 0x2ce   :  { %1253 = vmatpush1.msra.mxu1 %v6066_v46 }
 0x2cf   :  { %1254 = vmatprep.subr.mxu1 %v6073_v47 }
 0x2d0   :  { %1255 = vmatpush1.msra.mxu1 %v6080_v48 }
 0x2d1   :  { %1256 = vmatprep.subr.mxu1 %v6090_v50 }
 0x2d2   :  { %1257 = vmatpush1.msra.mxu1 %v6097_v51 }
 0x2d3   :  { %1258 = vmatprep.subr.mxu1 %v6104_v52 }
 0x2d4   :  { %1259 = vmatpush1.msra.mxu1 %v6111_v53 }
 0x2d5   :  { %1260 = vmatprep.subr.mxu1 %v6121_v55 }
 0x2d6   :  { %1261 = vmatpush1.msra.mxu1 %v6128_v56 }
 0x2d7   :  { %1474 = vmatprep.subr.mxu1 %v6002_v36 }
 0x377   :  { %v962_v2 = vpop.f32.mrf.mxu0 }
 0x378   :  { %v967_v40 = vadd.f32 %v962_v2, %v254_v18 }
 0x379   :  { %v964_v15 = vpop.f32.mrf.mxu0 }
 0x37a   :  { %v968_v33 = vadd.f32 %v964_v15, %v256_v61  ;;  %v4995_v5 = vmul.f32 -1.442695, %v967_v40 }
 0x37c   :  { %5201 = vtanh.f32 %v968_v33 }
 0x387   :  { %v1068_v23 = vpop.f32.mrf.mxu1 }
 0x388   :  { %v1073_v6 = vadd.f32 %v1068_v23, %v571_v57 }
 0x389   :  { %v5202_v8 = vpop.eup %5201  ;;  %v1070_v4 = vpop.f32.mrf.mxu1 }
 0x38a   :  { %984 = vrot.lane.b32.xlu0 %v5202_v8, %s5781_s28  ;;  %v1074_v60 = vadd.f32 %v1070_v4, %v573_v59  ;;  %v4998_v2 = vmul.f32 -1.442695, %v1073_v6 }
 0x38c   :  { %5203 = vtanh.f32 %v1074_v60 }
 0x38d   :  { %5205 = vpow2.f32 %v4995_v5 }
 0x38e   :  { %5207 = vpow2.f32 %v4998_v2 }
 0x399   :  { %v5204_v58 = vpop.eup %5203 }
 0x39a   :  { %1090 = vrot.lane.b32.xlu1 %v5204_v58, %s5781_s28  ;;  %v5206_v18 = vpop.eup %5205 }
 0x39b   :  { %v975_v61 = vadd.f32 1.0, %v5206_v18  ;;  %v5208_v44 = vpop.eup %5207 }
 0x39c   :  { %v1081_v57 = vadd.f32 1.0, %v5208_v44  ;;  %v4999_v44 = vmul.f32 -1.442695, %v1074_v60 }
 0x39d   :  { %5209 = vrcp.f32 %v975_v61  ;;  %v4996_v61 = vmul.f32 -1.442695, %v968_v33 }
 0x39e   :  { %5211 = vrcp.f32 %v1081_v57 }
 0x3aa   :  { %v5210_v15 = vpop.eup %5209 }
 0x3ab   :  { %v5212_v8 = vpop.eup %5211  ;;  %v982_v58 = vmul.f32 %v5210_v15, %v6393_v20 }
 0x3fc   :  { %v985_v49 = vpop.permute.xlu0 %984 }
 0x3fd   :  { %v987_v37 = vmul.f32 %v5210_v15, %v985_v49  ;;  %v1088_v49 = vmul.f32 %v5212_v8, %v6397_v1 }
 0x3ff   :  { %989 = vrot.lane.b32.xlu0 %v987_v37, %s5781_s28 }
 0x40c   :  { %v1091_v23 = vpop.permute.xlu1 %1090 }
 0x40d   :  { %v1093_v59 = vmul.f32 %v5212_v8, %v1091_v23 }
 0x40f   :  { %1095 = vrot.lane.b32.xlu1 %v1093_v59, %s5781_s28 }
 0x471   :  { %v990_v40 = vpop.permute.xlu0 %989 }
 0x472   :  { %v6456_v6 = vadd.f32 %v990_v40, %v982_v58 }
 0x474   :  { %5213 = vtanh.f32 %v6456_v6 }
 0x481   :  { %v5214_v4 = vpop.eup %5213  ;;  %v1096_v5 = vpop.permute.xlu1 %1095 }
 0x482   :  { %995 = vrot.lane.b32.xlu0 %v5214_v4, %s5781_s28  ;;  %v6461_v18 = vadd.f32 %v1096_v5, %v1088_v49 }
 0x484   :  { %5215 = vtanh.f32 %v6461_v18 }
 0x485   :  { %5217 = vpow2.f32 %v4996_v61 }
 0x486   :  { %5219 = vpow2.f32 %v4999_v44 }
 0x491   :  { %v5216_v2 = vpop.eup %5215 }
 0x492   :  { %1101 = vrot.lane.b32.xlu1 %v5216_v2, %s5781_s28  ;;  %v5218_v20 = vpop.eup %5217 }
 0x493   :  { %v976_v15 = vadd.f32 1.0, %v5218_v20  ;;  %v5220_v37 = vpop.eup %5219 }
 0x494   :  { %v1082_v1 = vadd.f32 1.0, %v5220_v37 }
 0x495   :  { %5221 = vrcp.f32 %v976_v15 }
 0x496   :  { %5223 = vrcp.f32 %v1082_v1 }
 0x4a2   :  { %v5222_v57 = vpop.eup %5221 }
 0x4f4   :  { %v996_v23 = vpop.permute.xlu0 %995 }
 0x4f5   :  { %v6465_v59 = vmul.f32 %v5222_v57, %v996_v23 }
 0x4f7   :  { %5000 = vmatmul.mubr.msk.f32.vlgmr.msra.gmra.mxu0 %vm655_vm1, %v6465_v59 }
 0x4f8   :  { %1369 = vmatpush1.msra.mxu0 %v5887_v13  ;;  %1416 = vmatprep.mubr.f32.mxu0 %v8212_v19  ;;  %v5224_v13 = vpop.eup %5223 }
 0x4f9   :  { %1370 = vmatprep.subr.mxu0 %v5892_v14 }
 0x4fa   :  { %1371 = vmatpush1.msra.mxu0 %v5899_v16 }
 0x4fb   :  { %1372 = vmatprep.subr.mxu0 %v5911_v21 }
 0x4fc   :  { %1373 = vmatpush1.msra.mxu0 %v5917_v22  ;;  %v262_v22 = vadd.f32 %v6246_v9, %v6366_v28 }
 0x4fd   :  { %1374 = vmatprep.subr.mxu0 %v5926_v24 }
 0x4fe   :  { %1375 = vmatpush1.msra.mxu0 %v5933_v25 }
 0x4ff   :  { %1376 = vmatprep.subr.mxu0 %v5940_v26 }
 0x500   :  { %1377 = vmatpush1.msra.mxu0 %v5947_v27  ;;  %v565_v27 = vadd.f32 %v6364_v54, %v6383_v11 }
 0x501   :  { %1378 = vmatprep.subr.mxu0 %v5957_v29 }
 0x502   :  { %1379 = vmatpush1.msra.mxu0 %v5964_v30 }
 0x503   :  { %1380 = vmatprep.subr.mxu0 %v5971_v31  ;;  %v567_v31 = vadd.f32 %v6372_v0, %v6386_v3 }
 0x504   :  { %1381 = vmatpush1.msra.mxu0 %v5978_v32  ;;  %v1102_v14 = vpop.permute.xlu1 %1101 }
 0x505   :  { %1382 = vmatprep.subr.mxu0 %v5988_v34  ;;  %v6486_v16 = vmul.f32 %v5224_v13, %v1102_v14 }
 0x506   :  { %1383 = vmatpush1.msra.mxu0 %v5995_v35 }
 0x507   :  { %1596 = vmatprep.subr.mxu0 %v5882_v10  ;;  %5003 = vmatmul.mubr.msk.f32.vlgmr.msra.gmra.mxu1 %vm655_vm1, %v6486_v16  ;;  %v260_v10 = vadd.f32 %v6242_v7, %v6360_v62 }
 0x508   :  { %1475 = vmatpush1.msra.mxu1 %v6017_v38  ;;  %1522 = vmatprep.mubr.f32.mxu1 %v8212_v19 }
 0x509   :  { %1476 = vmatprep.subr.mxu1 %v6024_v39 }
 0x50a   :  { %1477 = vmatpush1.msra.mxu1 %v6036_v41 }
 0x50b   :  { %1478 = vmatprep.subr.mxu1 %v6042_v42 }
 0x50c   :  { %1479 = vmatpush1.msra.mxu1 %v6049_v43 }
 0x50d   :  { %1480 = vmatprep.subr.mxu1 %v6059_v45 }
 0x50e   :  { %1481 = vmatpush1.msra.mxu1 %v6066_v46 }
 0x50f   :  { %1482 = vmatprep.subr.mxu1 %v6073_v47 }
 0x510   :  { %1483 = vmatpush1.msra.mxu1 %v6080_v48 }
 0x511   :  { %1484 = vmatprep.subr.mxu1 %v6090_v50 }
 0x512   :  { %1485 = vmatpush1.msra.mxu1 %v6097_v51 }
 0x513   :  { %1486 = vmatprep.subr.mxu1 %v6104_v52 }
 0x514   :  { %1487 = vmatpush1.msra.mxu1 %v6111_v53 }
 0x515   :  { %1488 = vmatprep.subr.mxu1 %v6121_v55 }
 0x516   :  { %1489 = vmatpush1.msra.mxu1 %v6128_v56 }
 0x517   :  { %1702 = vmatprep.subr.mxu1 %v6002_v36 }
 0x5b7   :  { %v1190_v21 = vpop.f32.mrf.mxu0 }
 0x5b8   :  { %v1195_v24 = vadd.f32 %v1190_v21, %v260_v10 }
 0x5b9   :  { %v1192_v25 = vpop.f32.mrf.mxu0 }
 0x5ba   :  { %v1196_v26 = vadd.f32 %v1192_v25, %v262_v22  ;;  %v5001_v9 = vmul.f32 -1.442695, %v1195_v24 }
 0x5bc   :  { %5225 = vtanh.f32 %v1196_v26  ;;  %v5002_v14 = vmul.f32 -1.442695, %v1196_v26  ;;  %v6543_v26 = vld [vmem:[%s8117_s2 + $0x68] sm:$0xff] }
 0x5c7   :  { %v1296_v30 = vpop.f32.mrf.mxu1 }
 0x5c8   :  { %v1301_v32 = vadd.f32 %v1296_v30, %v565_v27  ;;  %v6549_v30 = vld [vmem:[%s8117_s2 + $0x60] sm:$0xff] }
 0x5c9   :  { %v5226_v29 = vpop.eup %5225  ;;  %v1298_v36 = vpop.f32.mrf.mxu1 }
 0x5ca   :  { %1212 = vrot.lane.b32.xlu0 %v5226_v29, %s5781_s28  ;;  %v1302_v7 = vadd.f32 %v1298_v36, %v567_v31  ;;  %v5004_v8 = vmul.f32 -1.442695, %v1301_v32  ;;  %v6536_v29 = vld [vmem:[%s8117_s2 + $0x70] sm:$0xff]  ;;  %v6555_v31 = vld [vmem:[%s8117_s2 + $0x58] sm:$0xff]  ;;  %v6567_v36 = vld [vmem:[%s8117_s2 + $0x48] sm:$0xff] }
 0x5cb   :  { %v6561_v32 = vld [vmem:[%s8117_s2 + $0x50] sm:$0xff] }
 0x5cc   :  { %5227 = vtanh.f32 %v1302_v7  ;;  %v5005_v10 = vmul.f32 -1.442695, %v1302_v7  ;;  %v6573_v7 = vld [vmem:[%s8117_s2 + $0x40] sm:$0xff] }
 0x5cd   :  { %5229 = vpow2.f32 %v5001_v9  ;;  %v6585_v9 = vld [vmem:[%s8117_s2 + $0x30] sm:$0xff] }
 0x5ce   :  { %5231 = vpow2.f32 %v5004_v8  ;;  %v6597_v8 = vld [vmem:[%s8117_s2 + $0x20] sm:$0xff] }
 0x5d9   :  { %v5228_v33 = vpop.eup %5227 }
 0x5da   :  { %1318 = vrot.lane.b32.xlu1 %v5228_v33, %s5781_s28  ;;  %v5230_v60 = vpop.eup %5229  ;;  %v6579_v33 = vld [vmem:[%s8117_s2 + $0x38] sm:$0xff] }
 0x5db   :  { %v1203_v58 = vadd.f32 1.0, %v5230_v60  ;;  %v5232_v54 = vpop.eup %5231  ;;  %v6591_v60 = vld [vmem:[%s8117_s2 + $0x28] sm:$0xff] }
 0x5dc   :  { %v1309_v49 = vadd.f32 1.0, %v5232_v54  ;;  %v6609_v54 = vld [vmem:[%s8117_s2 + $0x10] sm:$0xff] }
 0x5dd   :  { %5233 = vrcp.f32 %v1203_v58  ;;  %v6603_v58 = vld [vmem:[%s8117_s2 + $0x18] sm:$0xff] }
 0x5de   :  { %5235 = vrcp.f32 %v1309_v49 }
 0x5ea   :  { %v5234_v40 = vpop.eup %5233 }
 0x5eb   :  { %v5236_v5 = vpop.eup %5235  ;;  %v1210_v20 = vmul.f32 %v5234_v40, %v6456_v6 }
 0x5ec   :  { %v1316_v57 = vmul.f32 %v5236_v5, %v6461_v18 }
 0x63c   :  { %v1213_v4 = vpop.permute.xlu0 %1212 }
 0x63d   :  { %v1215_v0 = vmul.f32 %v5234_v40, %v1213_v4 }
 0x63f   :  { %1217 = vrot.lane.b32.xlu0 %v1215_v0, %s5781_s28  ;;  %v6617_v0 = vld [vmem:[%s8117_s2 + $0x78] sm:$0xff] }
 0x64c   :  { %v1319_v2 = vpop.permute.xlu1 %1318 }
 0x64d   :  { %v1321_v61 = vmul.f32 %v5236_v5, %v1319_v2 }
 0x64f   :  { %1323 = vrot.lane.b32.xlu1 %v1321_v61, %s5781_s28 }
 0x6b1   :  { %v1218_v44 = vpop.permute.xlu0 %1217 }
 0x6b2   :  { %v6520_v15 = vadd.f32 %v1218_v44, %v1210_v20 }
 0x6b4   :  { %5237 = vtanh.f32 %v6520_v15 }
 0x6c1   :  { %v5238_v37 = vpop.eup %5237  ;;  %v1324_v23 = vpop.permute.xlu1 %1323 }
 0x6c2   :  { %1223 = vrot.lane.b32.xlu0 %v5238_v37, %s5781_s28  ;;  %v6525_v1 = vadd.f32 %v1324_v23, %v1316_v57 }
 0x6c4   :  { %5239 = vtanh.f32 %v6525_v1 }
 0x6c5   :  { %5241 = vpow2.f32 %v5002_v14 }
 0x6c6   :  { %5243 = vpow2.f32 %v5005_v10 }
 0x6d1   :  { %v5240_v13 = vpop.eup %5239 }
 0x6d2   :  { %1329 = vrot.lane.b32.xlu1 %v5240_v13, %s5781_s28  ;;  %v5242_v6 = vpop.eup %5241 }
 0x6d3   :  { %v1204_v21 = vadd.f32 1.0, %v5242_v6  ;;  %v5244_v22 = vpop.eup %5243 }
 0x6d4   :  { %v1310_v18 = vadd.f32 1.0, %v5244_v22 }
 0x6d5   :  { %5245 = vrcp.f32 %v1204_v21 }
 0x6d6   :  { %5247 = vrcp.f32 %v1310_v18 }
 0x6e2   :  { %v5246_v24 = vpop.eup %5245 }
 0x6e3   :  { %v5248_v40 = vpop.eup %5247 }
 0x734   :  { %v1224_v25 = vpop.permute.xlu0 %1223 }
 0x735   :  { %v6529_v27 = vmul.f32 %v5246_v24, %v1224_v25 }
 0x737   :  { %5006 = vmatmul.mubr.msk.f32.vlgmr.msra.gmra.mxu0 %vm655_vm1, %v6529_v27 }
 0x738   :  { %1597 = vmatpush1.msra.mxu0 %v6536_v29  ;;  %1644 = vmatprep.mubr.f32.mxu0 %v8212_v19 }
 0x739   :  { %1598 = vmatprep.subr.mxu0 %v6543_v26 }
 0x73a   :  { %1599 = vmatpush1.msra.mxu0 %v6549_v30 }
 0x73b   :  { %1600 = vmatprep.subr.mxu0 %v6555_v31 }
 0x73c   :  { %1601 = vmatpush1.msra.mxu0 %v6561_v32 }
 0x73d   :  { %1602 = vmatprep.subr.mxu0 %v6567_v36 }
 0x73e   :  { %1603 = vmatpush1.msra.mxu0 %v6573_v7 }
 0x73f   :  { %1604 = vmatprep.subr.mxu0 %v6579_v33 }
 0x740   :  { %1605 = vmatpush1.msra.mxu0 %v6585_v9 }
 0x741   :  { %1606 = vmatprep.subr.mxu0 %v6591_v60 }
 0x742   :  { %1607 = vmatpush1.msra.mxu0 %v6597_v8 }
 0x743   :  { %1608 = vmatprep.subr.mxu0 %v6603_v58 }
 0x744   :  { %1609 = vmatpush1.msra.mxu0 %v6609_v54  ;;  %v1330_v4 = vpop.permute.xlu1 %1329 }
 0x745   :  { %1610 = vmatprep.subr.mxu0 %v5988_v34  ;;  %v6620_v49 = vmul.f32 %v5248_v40, %v1330_v4  ;;  %v6643_v34 = vld [vmem:[%s8120_s5 + $0x78] sm:$0xff] }
 0x746   :  { %1611 = vmatpush1.msra.mxu0 %v5995_v35  ;;  %v266_v35 = vadd.f32 %v6250_v12, %v6360_v62 }
 0x747   :  { %1824 = vmatprep.subr.mxu0 %v6617_v0  ;;  %5009 = vmatmul.mubr.msk.f32.vlgmr.msra.gmra.mxu1 %vm655_vm1, %v6620_v49 }
 0x748   :  { %1703 = vmatpush1.msra.mxu1 %v6017_v38  ;;  %1750 = vmatprep.mubr.f32.mxu1 %v8212_v19 }
 0x749   :  { %1704 = vmatprep.subr.mxu1 %v6024_v39  ;;  %v268_v39 = vadd.f32 %v6254_v17, %v6366_v28 }
 0x74a   :  { %1705 = vmatpush1.msra.mxu1 %v6036_v41 }
 0x74b   :  { %1706 = vmatprep.subr.mxu1 %v6042_v42 }
 0x74c   :  { %1707 = vmatpush1.msra.mxu1 %v6049_v43 }
 0x74d   :  { %1708 = vmatprep.subr.mxu1 %v6059_v45  ;;  %v559_v45 = vadd.f32 %v6352_v63, %v6383_v11 }
 0x74e   :  { %1709 = vmatpush1.msra.mxu1 %v6066_v46 }
 0x74f   :  { %1710 = vmatprep.subr.mxu1 %v6073_v47 }
 0x750   :  { %1711 = vmatpush1.msra.mxu1 %v6080_v48  ;;  %v8214_v48 = vld [vmem:[#allocation68_spill] sm:$0xff] }
 0x751   :  { %1712 = vmatprep.subr.mxu1 %v6090_v50  ;;  %v561_v50 = vadd.f32 %v8214_v48, %v6386_v3  ;;  %v6706_v48 = vld [vmem:[%s8120_s5 + $0x70] sm:$0xff] }
 0x752   :  { %1713 = vmatpush1.msra.mxu1 %v6097_v51 }
 0x753   :  { %1714 = vmatprep.subr.mxu1 %v6104_v52 }
 0x754   :  { %1715 = vmatpush1.msra.mxu1 %v6111_v53 }
 0x755   :  { %1716 = vmatprep.subr.mxu1 %v6121_v55 }
 0x756   :  { %1717 = vmatpush1.msra.mxu1 %v6128_v56 }
 0x757   :  { %1930 = vmatprep.subr.mxu1 %v6643_v34 }
 0x7f7   :  { %v1418_v38 = vpop.f32.mrf.mxu0 }
 0x7f8   :  { %v1423_v41 = vadd.f32 %v1418_v38, %v266_v35 }
 0x7f9   :  { %v1420_v42 = vpop.f32.mrf.mxu0 }
 0x7fa   :  { %v1424_v43 = vadd.f32 %v1420_v42, %v268_v39  ;;  %v5007_v56 = vmul.f32 -1.442695, %v1423_v41  ;;  %v6689_v42 = vld [vmem:[%s8117_s2 + $0x8] sm:$0xff] }
 0x7fc   :  { %5249 = vtanh.f32 %v1424_v43  ;;  %v5008_v18 = vmul.f32 -1.442695, %v1424_v43  ;;  %v6695_v43 = vld [vmem:[%s8117_s2] sm:$0xff] }
 0x807   :  { %v1524_v47 = vpop.f32.mrf.mxu1 }
 0x808   :  { %v1529_v51 = vadd.f32 %v1524_v47, %v559_v45 }
 0x809   :  { %v5250_v46 = vpop.eup %5249  ;;  %v1526_v52 = vpop.f32.mrf.mxu1 }
 0x80a   :  { %1440 = vrot.lane.b32.xlu0 %v5250_v46, %s5781_s28  ;;  %v1530_v53 = vadd.f32 %v1526_v52, %v561_v50  ;;  %v5010_v17 = vmul.f32 -1.442695, %v1529_v51  ;;  %v6713_v50 = vld [vmem:[%s8120_s5 + $0x68] sm:$0xff]  ;;  %v6719_v51 = vld [vmem:[%s8120_s5 + $0x60] sm:$0xff]  ;;  %v6725_v52 = vld [vmem:[%s8120_s5 + $0x58] sm:$0xff] }
 0x80c   :  { %5251 = vtanh.f32 %v1530_v53  ;;  %v5011_v40 = vmul.f32 -1.442695, %v1530_v53  ;;  %v6731_v53 = vld [vmem:[%s8120_s5 + $0x50] sm:$0xff] }
 0x80d   :  { %5253 = vpow2.f32 %v5007_v56  ;;  %v6743_v56 = vld [vmem:[%s8120_s5 + $0x40] sm:$0xff] }
 0x80e   :  { %5255 = vpow2.f32 %v5010_v17  ;;  %v6755_v17 = vld [vmem:[%s8120_s5 + $0x30] sm:$0xff] }
 0x819   :  { %v5252_v55 = vpop.eup %5251 }
 0x81a   :  { %1546 = vrot.lane.b32.xlu1 %v5252_v55, %s5781_s28  ;;  %v5254_v12 = vpop.eup %5253  ;;  %v6737_v55 = vld [vmem:[%s8120_s5 + $0x48] sm:$0xff] }
 0x81b   :  { %v1431_v5 = vadd.f32 1.0, %v5254_v12  ;;  %v5256_v63 = vpop.eup %5255  ;;  %v6749_v12 = vld [vmem:[%s8120_s5 + $0x38] sm:$0xff] }
 0x81c   :  { %v1537_v44 = vadd.f32 1.0, %v5256_v63  ;;  %v6767_v63 = vld [vmem:[%s8120_s5 + $0x20] sm:$0xff] }
 0x81d   :  { %5257 = vrcp.f32 %v1431_v5  ;;  %v6761_v5 = vld [vmem:[%s8120_s5 + $0x28] sm:$0xff] }
 0x81e   :  { %5259 = vrcp.f32 %v1537_v44  ;;  %v6791_v44 = vld [vmem:[%s8120_s5] sm:$0xff] }
 0x82a   :  { %v5258_v2 = vpop.eup %5257 }
 0x82b   :  { %v5260_v37 = vpop.eup %5259  ;;  %v1438_v13 = vmul.f32 %v5258_v2, %v6520_v15 }
 0x82c   :  { %v1544_v21 = vmul.f32 %v5260_v37, %v6525_v1 }
 0x87c   :  { %v1441_v61 = vpop.permute.xlu0 %1440 }
 0x87d   :  { %v1443_v20 = vmul.f32 %v5258_v2, %v1441_v61  ;;  %v6773_v2 = vld [vmem:[%s8120_s5 + $0x18] sm:$0xff]  ;;  %v6779_v61 = vld [vmem:[%s8120_s5 + $0x10] sm:$0xff] }
 0x87f   :  { %1445 = vrot.lane.b32.xlu0 %v1443_v20, %s5781_s28  ;;  %v6785_v20 = vld [vmem:[%s8120_s5 + $0x8] sm:$0xff] }
 0x88c   :  { %v1547_v57 = vpop.permute.xlu1 %1546 }
 0x88d   :  { %v1549_v23 = vmul.f32 %v5260_v37, %v1547_v57  ;;  %v8215_v37 = vld [vmem:[#allocation20_spill] sm:$0xff] }
 0x88e   :  { %v272_v57 = vadd.f32 %v8215_v37, %v6360_v62 }
 0x88f   :  { %1551 = vrot.lane.b32.xlu1 %v1549_v23, %s5781_s28 }
 0x8f1   :  { %v1446_v14 = vpop.permute.xlu0 %1445 }
 0x8f2   :  { %v6659_v6 = vadd.f32 %v1446_v14, %v1438_v13  ;;  %v8216_v13 = vld [vmem:[#allocation22_spill] sm:$0xff] }
 0x8f3   :  { %v274_v14 = vadd.f32 %v8216_v13, %v6366_v28 }
 0x8f4   :  { %5261 = vtanh.f32 %v6659_v6 }
 0x901   :  { %v5262_v10 = vpop.eup %5261  ;;  %v1552_v22 = vpop.permute.xlu1 %1551 }
 0x902   :  { %1451 = vrot.lane.b32.xlu0 %v5262_v10, %s5781_s28  ;;  %v6664_v24 = vadd.f32 %v1552_v22, %v1544_v21 }
 0x904   :  { %5263 = vtanh.f32 %v6664_v24 }
 0x905   :  { %5265 = vpow2.f32 %v5008_v18 }
 0x906   :  { %5267 = vpow2.f32 %v5011_v40 }
 0x911   :  { %v5264_v25 = vpop.eup %5263 }
 0x912   :  { %1557 = vrot.lane.b32.xlu1 %v5264_v25, %s5781_s28  ;;  %v5266_v15 = vpop.eup %5265  ;;  %v8217_v25 = vld [vmem:[#allocation63_spill] sm:$0xff] }
 0x913   :  { %v1432_v4 = vadd.f32 1.0, %v5266_v15  ;;  %v5268_v35 = vpop.eup %5267  ;;  %v553_v18 = vadd.f32 %v8217_v25, %v6383_v11 }
 0x914   :  { %v1538_v1 = vadd.f32 1.0, %v5268_v35 }
 0x915   :  { %5269 = vrcp.f32 %v1432_v4  ;;  %v8218_v4 = vld [vmem:[#allocation65_spill] sm:$0xff] }
 0x916   :  { %5271 = vrcp.f32 %v1538_v1  ;;  %v555_v35 = vadd.f32 %v8218_v4, %v6386_v3 }
 0x922   :  { %v5270_v38 = vpop.eup %5269 }
 0x923   :  { %v5272_v45 = vpop.eup %5271 }
 0x974   :  { %v1452_v39 = vpop.permute.xlu0 %1451 }
 0x975   :  { %v6668_v41 = vmul.f32 %v5270_v38, %v1452_v39 }
 0x977   :  { %5012 = vmatmul.mubr.msk.f32.vlgmr.msra.gmra.mxu0 %vm655_vm1, %v6668_v41 }
 0x978   :  { %1825 = vmatpush1.msra.mxu0 %v6536_v29  ;;  %1872 = vmatprep.mubr.f32.mxu0 %v8212_v19 }
 0x979   :  { %1826 = vmatprep.subr.mxu0 %v6543_v26 }
 0x97a   :  { %1827 = vmatpush1.msra.mxu0 %v6549_v30 }
 0x97b   :  { %1828 = vmatprep.subr.mxu0 %v6555_v31 }
 0x97c   :  { %1829 = vmatpush1.msra.mxu0 %v6561_v32 }
 0x97d   :  { %1830 = vmatprep.subr.mxu0 %v6567_v36 }
 0x97e   :  { %1831 = vmatpush1.msra.mxu0 %v6573_v7 }
 0x97f   :  { %1832 = vmatprep.subr.mxu0 %v6579_v33 }
 0x980   :  { %1833 = vmatpush1.msra.mxu0 %v6585_v9 }
 0x981   :  { %1834 = vmatprep.subr.mxu0 %v6591_v60 }
 0x982   :  { %1835 = vmatpush1.msra.mxu0 %v6597_v8 }
 0x983   :  { %1836 = vmatprep.subr.mxu0 %v6603_v58 }
 0x984   :  { %1837 = vmatpush1.msra.mxu0 %v6609_v54  ;;  %v1558_v46 = vpop.permute.xlu1 %1557 }
 0x985   :  { %1838 = vmatprep.subr.mxu0 %v6689_v42  ;;  %v6699_v47 = vmul.f32 %v5272_v45, %v1558_v46 }
 0x986   :  { %1839 = vmatpush1.msra.mxu0 %v6695_v43 }
 0x987   :  { %2052 = vmatprep.subr.mxu0 %v6617_v0  ;;  %5015 = vmatmul.mubr.msk.f32.vlgmr.msra.gmra.mxu1 %vm655_vm1, %v6699_v47 }
 0x988   :  { %1931 = vmatpush1.msra.mxu1 %v6706_v48  ;;  %1978 = vmatprep.mubr.f32.mxu1 %v8212_v19 }
 0x989   :  { %1932 = vmatprep.subr.mxu1 %v6713_v50 }
 0x98a   :  { %1933 = vmatpush1.msra.mxu1 %v6719_v51 }
 0x98b   :  { %1934 = vmatprep.subr.mxu1 %v6725_v52 }
 0x98c   :  { %1935 = vmatpush1.msra.mxu1 %v6731_v53 }
 0x98d   :  { %1936 = vmatprep.subr.mxu1 %v6737_v55 }
 0x98e   :  { %1937 = vmatpush1.msra.mxu1 %v6743_v56 }
 0x98f   :  { %1938 = vmatprep.subr.mxu1 %v6749_v12 }
 0x990   :  { %1939 = vmatpush1.msra.mxu1 %v6755_v17 }
 0x991   :  { %1940 = vmatprep.subr.mxu1 %v6761_v5 }
 0x992   :  { %1941 = vmatpush1.msra.mxu1 %v6767_v63 }
 0x993   :  { %1942 = vmatprep.subr.mxu1 %v6773_v2 }
 0x994   :  { %1943 = vmatpush1.msra.mxu1 %v6779_v61 }
 0x995   :  { %1944 = vmatprep.subr.mxu1 %v6785_v20 }
 0x996   :  { %1945 = vmatpush1.msra.mxu1 %v6791_v44 }
 0x997   :  { %2158 = vmatprep.subr.mxu1 %v6643_v34 }
 0xa37   :  { %v1646_v23 = vpop.f32.mrf.mxu0 }
 0xa38   :  { %v1651_v10 = vadd.f32 %v1646_v23, %v272_v57 }
 0xa39   :  { %v1648_v21 = vpop.f32.mrf.mxu0 }
 0xa3a   :  { %v1652_v22 = vadd.f32 %v1648_v21, %v274_v14  ;;  %v5013_v46 = vmul.f32 -1.442695, %v1651_v10 }
 0xa3c   :  { %5273 = vtanh.f32 %v1652_v22 }
 0xa47   :  { %v1752_v40 = vpop.f32.mrf.mxu1 }
 0xa48   :  { %v1757_v38 = vadd.f32 %v1752_v40, %v553_v18 }
 0xa49   :  { %v5274_v15 = vpop.eup %5273  ;;  %v1754_v39 = vpop.f32.mrf.mxu1 }
 0xa4a   :  { %1668 = vrot.lane.b32.xlu0 %v5274_v15, %s5781_s28  ;;  %v1758_v1 = vadd.f32 %v1754_v39, %v555_v35  ;;  %v5016_v57 = vmul.f32 -1.442695, %v1757_v38 }
 0xa4c   :  { %5275 = vtanh.f32 %v1758_v1 }
 0xa4d   :  { %5277 = vpow2.f32 %v5013_v46 }
 0xa4e   :  { %5279 = vpow2.f32 %v5016_v57 }
 0xa59   :  { %v5276_v45 = vpop.eup %5275 }
 0xa5a   :  { %1774 = vrot.lane.b32.xlu1 %v5276_v45, %s5781_s28  ;;  %v5278_v37 = vpop.eup %5277 }
 0xa5b   :  { %v1659_v23 = vadd.f32 1.0, %v5278_v37  ;;  %v5280_v13 = vpop.eup %5279 }
 0xa5c   :  { %v1765_v18 = vadd.f32 1.0, %v5280_v13  ;;  %v5017_v13 = vmul.f32 -1.442695, %v1758_v1 }
 0xa5d   :  { %5281 = vrcp.f32 %v1659_v23  ;;  %v5014_v23 = vmul.f32 -1.442695, %v1652_v22 }
 0xa5e   :  { %5283 = vrcp.f32 %v1765_v18 }
 0xa6a   :  { %v5282_v14 = vpop.eup %5281 }
 0xa6b   :  { %v5284_v15 = vpop.eup %5283  ;;  %v1666_v10 = vmul.f32 %v5282_v14, %v6659_v6 }
 0xa6c   :  { %v1772_v45 = vmul.f32 %v5284_v15, %v6664_v24 }
 0xabc   :  { %v1669_v21 = vpop.permute.xlu0 %1668 }
 0xabd   :  { %v1671_v25 = vmul.f32 %v5282_v14, %v1669_v21 }
 0xabf   :  { %1673 = vrot.lane.b32.xlu0 %v1671_v25, %s5781_s28 }
 0xacc   :  { %v1775_v40 = vpop.permute.xlu1 %1774 }
 0xacd   :  { %v1777_v4 = vmul.f32 %v5284_v15, %v1775_v40 }
 0xacf   :  { %1779 = vrot.lane.b32.xlu1 %v1777_v4, %s5781_s28  ;;  %v8220_v4 = vld [vmem:[#allocation24_spill] sm:$0xff] }
 0xb31   :  { %v1674_v35 = vpop.permute.xlu0 %1673 }
 0xb32   :  { %v6808_v38 = vadd.f32 %v1674_v35, %v1666_v10  ;;  %v278_v10 = vadd.f32 %v8220_v4, %v6360_v62 }
 0xb34   :  { %5285 = vtanh.f32 %v6808_v38 }
 0xb41   :  { %v5286_v39 = vpop.eup %5285  ;;  %v1780_v46 = vpop.permute.xlu1 %1779 }
 0xb42   :  { %1679 = vrot.lane.b32.xlu0 %v5286_v39, %s5781_s28  ;;  %v6813_v37 = vadd.f32 %v1780_v46, %v1772_v45  ;;  %v8221_v39 = vld [vmem:[#allocation26_spill] sm:$0xff] }
 0xb43   :  { %v280_v45 = vadd.f32 %v8221_v39, %v6366_v28 }
 0xb44   :  { %5287 = vtanh.f32 %v6813_v37 }
 0xb45   :  { %5289 = vpow2.f32 %v5014_v23 }
 0xb46   :  { %5291 = vpow2.f32 %v5017_v13 }
 0xb51   :  { %v5288_v57 = vpop.eup %5287 }
 0xb52   :  { %1785 = vrot.lane.b32.xlu1 %v5288_v57, %s5781_s28  ;;  %v5290_v6 = vpop.eup %5289 }
 0xb53   :  { %v1660_v14 = vadd.f32 1.0, %v5290_v6  ;;  %v5292_v21 = vpop.eup %5291  ;;  %v8222_v6 = vld [vmem:[#allocation59_spill] sm:$0xff] }
 0xb54   :  { %v1766_v24 = vadd.f32 1.0, %v5292_v21  ;;  %v547_v13 = vadd.f32 %v8222_v6, %v6383_v11 }
 0xb55   :  { %5293 = vrcp.f32 %v1660_v14 }
 0xb56   :  { %5295 = vrcp.f32 %v1766_v24 }
 0xb62   :  { %v5294_v25 = vpop.eup %5293 }
 0xb63   :  { %v5296_v22 = vpop.eup %5295 }
 0xbb4   :  { %v1680_v18 = vpop.permute.xlu0 %1679 }
 0xbb5   :  { %v6817_v40 = vmul.f32 %v5294_v25, %v1680_v18  ;;  %v8223_v25 = vld [vmem:[#allocation61_spill] sm:$0xff] }
 0xbb6   :  { %v549_v18 = vadd.f32 %v8223_v25, %v6386_v3 }
 0xbb7   :  { %8219 = vst [vmem:[#allocation68_spill] sm:$0xff] %v6817_v40  ;;  %5018 = vmatmul.mubr.msk.f32.vlgmr.msra.gmra.mxu0 %vm655_vm1, %v6817_v40 }
 0xbb8   :  { %2053 = vmatpush1.msra.mxu0 %v6536_v29  ;;  %2100 = vmatprep.mubr.f32.mxu0 %v8212_v19 }
 0xbb9   :  { %2054 = vmatprep.subr.mxu0 %v6543_v26 }
 0xbba   :  { %2055 = vmatpush1.msra.mxu0 %v6549_v30 }
 0xbbb   :  { %2056 = vmatprep.subr.mxu0 %v6555_v31 }
 0xbbc   :  { %2057 = vmatpush1.msra.mxu0 %v6561_v32 }
 0xbbd   :  { %2058 = vmatprep.subr.mxu0 %v6567_v36 }
 0xbbe   :  { %2059 = vmatpush1.msra.mxu0 %v6573_v7 }
 0xbbf   :  { %2060 = vmatprep.subr.mxu0 %v6579_v33 }
 0xbc0   :  { %2061 = vmatpush1.msra.mxu0 %v6585_v9 }
 0xbc1   :  { %2062 = vmatprep.subr.mxu0 %v6591_v60 }
 0xbc2   :  { %2063 = vmatpush1.msra.mxu0 %v6597_v8 }
 0xbc3   :  { %2064 = vmatprep.subr.mxu0 %v6603_v58 }
 0xbc4   :  { %2065 = vmatpush1.msra.mxu0 %v6609_v54  ;;  %v1786_v1 = vpop.permute.xlu1 %1785 }
 0xbc5   :  { %2066 = vmatprep.subr.mxu0 %v6689_v42  ;;  %v6838_v15 = vmul.f32 %v5296_v22, %v1786_v1 }
 0xbc6   :  { %2067 = vmatpush1.msra.mxu0 %v6695_v43 }
 0xbc7   :  { %2280 = vmatprep.subr.mxu0 %v6617_v0  ;;  %5021 = vmatmul.mubr.msk.f32.vlgmr.msra.gmra.mxu1 %vm655_vm1, %v6838_v15 }
 0xbc8   :  { %2159 = vmatpush1.msra.mxu1 %v6706_v48  ;;  %2206 = vmatprep.mubr.f32.mxu1 %v8212_v19 }
 0xbc9   :  { %2160 = vmatprep.subr.mxu1 %v6713_v50 }
 0xbca   :  { %2161 = vmatpush1.msra.mxu1 %v6719_v51 }
 0xbcb   :  { %2162 = vmatprep.subr.mxu1 %v6725_v52 }
 0xbcc   :  { %2163 = vmatpush1.msra.mxu1 %v6731_v53 }
 0xbcd   :  { %2164 = vmatprep.subr.mxu1 %v6737_v55 }
 0xbce   :  { %2165 = vmatpush1.msra.mxu1 %v6743_v56 }
 0xbcf   :  { %2166 = vmatprep.subr.mxu1 %v6749_v12 }
 0xbd0   :  { %2167 = vmatpush1.msra.mxu1 %v6755_v17 }
 0xbd1   :  { %2168 = vmatprep.subr.mxu1 %v6761_v5 }
 0xbd2   :  { %2169 = vmatpush1.msra.mxu1 %v6767_v63 }
 0xbd3   :  { %2170 = vmatprep.subr.mxu1 %v6773_v2 }
 0xbd4   :  { %2171 = vmatpush1.msra.mxu1 %v6779_v61 }
 0xbd5   :  { %2172 = vmatprep.subr.mxu1 %v6785_v20 }
 0xbd6   :  { %2173 = vmatpush1.msra.mxu1 %v6791_v44 }
 0xbd7   :  { %2386 = vmatprep.subr.mxu1 %v6643_v34 }
 0xc77   :  { %v1874_v35 = vpop.f32.mrf.mxu0 }
 0xc78   :  { %v1879_v46 = vadd.f32 %v1874_v35, %v278_v10 }
 0xc79   :  { %v1876_v57 = vpop.f32.mrf.mxu0 }
 0xc7a   :  { %v1880_v23 = vadd.f32 %v1876_v57, %v280_v45  ;;  %v5019_v10 = vmul.f32 -1.442695, %v1879_v46 }
 0xc7c   :  { %5297 = vtanh.f32 %v1880_v23 }
 0xc87   :  { %v1980_v21 = vpop.f32.mrf.mxu1 }
 0xc88   :  { %v1985_v24 = vadd.f32 %v1980_v21, %v547_v13 }
 0xc89   :  { %v5298_v14 = vpop.eup %5297  ;;  %v1982_v22 = vpop.f32.mrf.mxu1 }
 0xc8a   :  { %1896 = vrot.lane.b32.xlu0 %v5298_v14, %s5781_s28  ;;  %v1986_v1 = vadd.f32 %v1982_v22, %v549_v18  ;;  %v5022_v39 = vmul.f32 -1.442695, %v1985_v24 }
 0xc8c   :  { %5299 = vtanh.f32 %v1986_v1 }
 0xc8d   :  { %5301 = vpow2.f32 %v5019_v10 }
 0xc8e   :  { %5303 = vpow2.f32 %v5022_v39 }
 0xc99   :  { %v5300_v4 = vpop.eup %5299 }
 0xc9a   :  { %2002 = vrot.lane.b32.xlu1 %v5300_v4, %s5781_s28  ;;  %v5302_v35 = vpop.eup %5301 }
 0xc9b   :  { %v1887_v45 = vadd.f32 1.0, %v5302_v35  ;;  %v5304_v57 = vpop.eup %5303 }
 0xc9c   :  { %v1993_v13 = vadd.f32 1.0, %v5304_v57  ;;  %v5023_v57 = vmul.f32 -1.442695, %v1986_v1 }
 0xc9d   :  { %5305 = vrcp.f32 %v1887_v45  ;;  %v5020_v45 = vmul.f32 -1.442695, %v1880_v23 }
 0xc9e   :  { %5307 = vrcp.f32 %v1993_v13 }
 0xcaa   :  { %v5306_v6 = vpop.eup %5305 }
 0xcab   :  { %v5308_v14 = vpop.eup %5307  ;;  %v1894_v46 = vmul.f32 %v5306_v6, %v6808_v38 }
 0xcfc   :  { %v1897_v40 = vpop.permute.xlu0 %1896 }
 0xcfd   :  { %v1899_v25 = vmul.f32 %v5306_v6, %v1897_v40  ;;  %v2000_v40 = vmul.f32 %v5308_v14, %v6813_v37 }
 0xcff   :  { %1901 = vrot.lane.b32.xlu0 %v1899_v25, %s5781_s28 }
 0xd0c   :  { %v2003_v21 = vpop.permute.xlu1 %2002 }
 0xd0d   :  { %v2005_v18 = vmul.f32 %v5308_v14, %v2003_v21 }
 0xd0f   :  { %2007 = vrot.lane.b32.xlu1 %v2005_v18, %s5781_s28 }
 0xd71   :  { %v1902_v22 = vpop.permute.xlu0 %1901 }
 0xd72   :  { %v6872_v24 = vadd.f32 %v1902_v22, %v1894_v46  ;;  %v8226_v46 = vld [vmem:[#allocation28_spill] sm:$0xff] }
 0xd73   :  { %v284_v22 = vadd.f32 %v8226_v46, %v6360_v62 }
 0xd74   :  { %5309 = vtanh.f32 %v6872_v24 }
 0xd81   :  { %v5310_v4 = vpop.eup %5309  ;;  %v2008_v10 = vpop.permute.xlu1 %2007 }
 0xd82   :  { %1907 = vrot.lane.b32.xlu0 %v5310_v4, %s5781_s28  ;;  %v6877_v35 = vadd.f32 %v2008_v10, %v2000_v40  ;;  %v8227_v40 = vld [vmem:[#allocation30_spill] sm:$0xff] }
 0xd83   :  { %v286_v10 = vadd.f32 %v8227_v40, %v6366_v28 }
 0xd84   :  { %5311 = vtanh.f32 %v6877_v35 }
 0xd85   :  { %5313 = vpow2.f32 %v5020_v45 }
 0xd86   :  { %5315 = vpow2.f32 %v5023_v57  ;;  %v8228_v57 = vld [vmem:[#allocation55_spill] sm:$0xff] }
 0xd91   :  { %v5312_v39 = vpop.eup %5311 }
 0xd92   :  { %2013 = vrot.lane.b32.xlu1 %v5312_v39, %s5781_s28  ;;  %v5314_v38 = vpop.eup %5313 }
 0xd93   :  { %v1888_v6 = vadd.f32 1.0, %v5314_v38  ;;  %v5316_v25 = vpop.eup %5315 }
 0xd94   :  { %v1994_v37 = vadd.f32 1.0, %v5316_v25 }
 0xd95   :  { %5317 = vrcp.f32 %v1888_v6  ;;  %v541_v6 = vadd.f32 %v8228_v57, %v6383_v11 }
 0xd96   :  { %5319 = vrcp.f32 %v1994_v37 }
 0xda2   :  { %v5318_v13 = vpop.eup %5317 }
 0xda3   :  { %v5320_v23 = vpop.eup %5319 }
 0xdf4   :  { %v1908_v21 = vpop.permute.xlu0 %1907 }
 0xdf5   :  { %v6881_v18 = vmul.f32 %v5318_v13, %v1908_v21  ;;  %v8229_v21 = vld [vmem:[#allocation57_spill] sm:$0xff] }
 0xdf6   :  { %v543_v37 = vadd.f32 %v8229_v21, %v6386_v3 }
 0xdf7   :  { %8224 = vst [vmem:[#allocation20_spill] sm:$0xff] %v6881_v18  ;;  %5024 = vmatmul.mubr.msk.f32.vlgmr.msra.gmra.mxu0 %vm655_vm1, %v6881_v18 }
 0xdf8   :  { %2281 = vmatpush1.msra.mxu0 %v6536_v29  ;;  %2328 = vmatprep.mubr.f32.mxu0 %v8212_v19 }
 0xdf9   :  { %2282 = vmatprep.subr.mxu0 %v6543_v26 }
 0xdfa   :  { %2283 = vmatpush1.msra.mxu0 %v6549_v30 }
 0xdfb   :  { %2284 = vmatprep.subr.mxu0 %v6555_v31 }
 0xdfc   :  { %2285 = vmatpush1.msra.mxu0 %v6561_v32 }
 0xdfd   :  { %2286 = vmatprep.subr.mxu0 %v6567_v36 }
 0xdfe   :  { %2287 = vmatpush1.msra.mxu0 %v6573_v7 }
 0xdff   :  { %2288 = vmatprep.subr.mxu0 %v6579_v33 }
 0xe00   :  { %2289 = vmatpush1.msra.mxu0 %v6585_v9 }
 0xe01   :  { %2290 = vmatprep.subr.mxu0 %v6591_v60 }
 0xe02   :  { %2291 = vmatpush1.msra.mxu0 %v6597_v8 }
 0xe03   :  { %2292 = vmatprep.subr.mxu0 %v6603_v58 }
 0xe04   :  { %2293 = vmatpush1.msra.mxu0 %v6609_v54  ;;  %v2014_v1 = vpop.permute.xlu1 %2013 }
 0xe05   :  { %2294 = vmatprep.subr.mxu0 %v6689_v42  ;;  %v6902_v14 = vmul.f32 %v5320_v23, %v2014_v1 }
 0xe06   :  { %2295 = vmatpush1.msra.mxu0 %v6695_v43 }
 0xe07   :  { %2508 = vmatprep.subr.mxu0 %v6617_v0  ;;  %8225 = vst [vmem:[#allocation22_spill] sm:$0xff] %v6902_v14  ;;  %5027 = vmatmul.mubr.msk.f32.vlgmr.msra.gmra.mxu1 %vm655_vm1, %v6902_v14 }
 0xe08   :  { %2387 = vmatpush1.msra.mxu1 %v6706_v48  ;;  %2434 = vmatprep.mubr.f32.mxu1 %v8212_v19 }
 0xe09   :  { %2388 = vmatprep.subr.mxu1 %v6713_v50 }
 0xe0a   :  { %2389 = vmatpush1.msra.mxu1 %v6719_v51 }
 0xe0b   :  { %2390 = vmatprep.subr.mxu1 %v6725_v52 }
 0xe0c   :  { %2391 = vmatpush1.msra.mxu1 %v6731_v53 }
 0xe0d   :  { %2392 = vmatprep.subr.mxu1 %v6737_v55 }
 0xe0e   :  { %2393 = vmatpush1.msra.mxu1 %v6743_v56 }
 0xe0f   :  { %2394 = vmatprep.subr.mxu1 %v6749_v12 }
 0xe10   :  { %2395 = vmatpush1.msra.mxu1 %v6755_v17 }
 0xe11   :  { %2396 = vmatprep.subr.mxu1 %v6761_v5 }
 0xe12   :  { %2397 = vmatpush1.msra.mxu1 %v6767_v63 }
 0xe13   :  { %2398 = vmatprep.subr.mxu1 %v6773_v2 }
 0xe14   :  { %2399 = vmatpush1.msra.mxu1 %v6779_v61 }
 0xe15   :  { %2400 = vmatprep.subr.mxu1 %v6785_v20 }
 0xe16   :  { %2401 = vmatpush1.msra.mxu1 %v6791_v44 }
 0xe17   :  { %2614 = vmatprep.subr.mxu1 %v6643_v34 }
 0xeb7   :  { %v2102_v4 = vpop.f32.mrf.mxu0 }
 0xeb8   :  { %v2107_v39 = vadd.f32 %v2102_v4, %v284_v22 }
 0xeb9   :  { %v2104_v45 = vpop.f32.mrf.mxu0 }
 0xeba   :  { %v2108_v38 = vadd.f32 %v2104_v45, %v286_v10  ;;  %v5025_v22 = vmul.f32 -1.442695, %v2107_v39 }
 0xebc   :  { %5321 = vtanh.f32 %v2108_v38 }
 0xec7   :  { %v2208_v13 = vpop.f32.mrf.mxu1 }
 0xec8   :  { %v2213_v23 = vadd.f32 %v2208_v13, %v541_v6 }
 0xec9   :  { %v5322_v25 = vpop.eup %5321  ;;  %v2210_v1 = vpop.f32.mrf.mxu1 }
 0xeca   :  { %2124 = vrot.lane.b32.xlu0 %v5322_v25, %s5781_s28  ;;  %v2214_v46 = vadd.f32 %v2210_v1, %v543_v37  ;;  %v5028_v40 = vmul.f32 -1.442695, %v2213_v23 }
 0xecc   :  { %5323 = vtanh.f32 %v2214_v46 }
 0xecd   :  { %5325 = vpow2.f32 %v5025_v22 }
 0xece   :  { %5327 = vpow2.f32 %v5028_v40 }
 0xed9   :  { %v5324_v18 = vpop.eup %5323 }
 0xeda   :  { %2230 = vrot.lane.b32.xlu1 %v5324_v18, %s5781_s28  ;;  %v5326_v4 = vpop.eup %5325 }
 0xedb   :  { %v2115_v10 = vadd.f32 1.0, %v5326_v4  ;;  %v5328_v45 = vpop.eup %5327 }
 0xedc   :  { %v2221_v6 = vadd.f32 1.0, %v5328_v45  ;;  %v5029_v45 = vmul.f32 -1.442695, %v2214_v46 }
 0xedd   :  { %5329 = vrcp.f32 %v2115_v10  ;;  %v5026_v10 = vmul.f32 -1.442695, %v2108_v38 }
 0xede   :  { %5331 = vrcp.f32 %v2221_v6 }
 0xeea   :  { %v5330_v57 = vpop.eup %5329 }
 0xeeb   :  { %v5332_v25 = vpop.eup %5331  ;;  %v2122_v18 = vmul.f32 %v5330_v57, %v6872_v24 }
 0xf3c   :  { %v2125_v14 = vpop.permute.xlu0 %2124 }
 0xf3d   :  { %v2127_v21 = vmul.f32 %v5330_v57, %v2125_v14  ;;  %v2228_v14 = vmul.f32 %v5332_v25, %v6877_v35 }
 0xf3f   :  { %2129 = vrot.lane.b32.xlu0 %v2127_v21, %s5781_s28 }
 0xf4c   :  { %v2231_v13 = vpop.permute.xlu1 %2230 }
 0xf4d   :  { %v2233_v37 = vmul.f32 %v5332_v25, %v2231_v13 }
 0xf4f   :  { %2235 = vrot.lane.b32.xlu1 %v2233_v37, %s5781_s28 }
 0xfb1   :  { %v2130_v39 = vpop.permute.xlu0 %2129 }
 0xfb2   :  { %v6936_v23 = vadd.f32 %v2130_v39, %v2122_v18  ;;  %v8232_v18 = vld [vmem:[#allocation32_spill] sm:$0xff] }
 0xfb3   :  { %v290_v39 = vadd.f32 %v8232_v18, %v6360_v62 }
 0xfb4   :  { %5333 = vtanh.f32 %v6936_v23 }
 0xfc1   :  { %v5334_v1 = vpop.eup %5333  ;;  %v2236_v22 = vpop.permute.xlu1 %2235 }
 0xfc2   :  { %2135 = vrot.lane.b32.xlu0 %v5334_v1, %s5781_s28  ;;  %v6941_v4 = vadd.f32 %v2236_v22, %v2228_v14  ;;  %v8233_v14 = vld [vmem:[#allocation34_spill] sm:$0xff] }
 0xfc3   :  { %v292_v22 = vadd.f32 %v8233_v14, %v6366_v28 }
 0xfc4   :  { %5335 = vtanh.f32 %v6941_v4 }
 0xfc5   :  { %5337 = vpow2.f32 %v5026_v10 }
 0xfc6   :  { %5339 = vpow2.f32 %v5029_v45  ;;  %v8234_v45 = vld [vmem:[#allocation51_spill] sm:$0xff] }
 0xfd1   :  { %v5336_v40 = vpop.eup %5335 }
 0xfd2   :  { %2241 = vrot.lane.b32.xlu1 %v5336_v40, %s5781_s28  ;;  %v5338_v24 = vpop.eup %5337 }
 0xfd3   :  { %v2116_v57 = vadd.f32 1.0, %v5338_v24  ;;  %v5340_v21 = vpop.eup %5339 }
 0xfd4   :  { %v2222_v35 = vadd.f32 1.0, %v5340_v21 }
 0xfd5   :  { %5341 = vrcp.f32 %v2116_v57  ;;  %v535_v57 = vadd.f32 %v8234_v45, %v6383_v11 }
 0xfd6   :  { %5343 = vrcp.f32 %v2222_v35 }
 0xfe2   :  { %v5342_v6 = vpop.eup %5341 }
 0xfe3   :  { %v5344_v38 = vpop.eup %5343 }
0x1034   :  { %v2136_v13 = vpop.permute.xlu0 %2135 }
0x1035   :  { %v6945_v37 = vmul.f32 %v5342_v6, %v2136_v13  ;;  %v8235_v13 = vld [vmem:[#allocation53_spill] sm:$0xff] }
0x1036   :  { %v537_v35 = vadd.f32 %v8235_v13, %v6386_v3 }
0x1037   :  { %8230 = vst [vmem:[#allocation63_spill] sm:$0xff] %v6945_v37  ;;  %5030 = vmatmul.mubr.msk.f32.vlgmr.msra.gmra.mxu0 %vm655_vm1, %v6945_v37 }
0x1038   :  { %2509 = vmatpush1.msra.mxu0 %v6536_v29  ;;  %2556 = vmatprep.mubr.f32.mxu0 %v8212_v19 }
0x1039   :  { %2510 = vmatprep.subr.mxu0 %v6543_v26 }
0x103a   :  { %2511 = vmatpush1.msra.mxu0 %v6549_v30 }
0x103b   :  { %2512 = vmatprep.subr.mxu0 %v6555_v31 }
0x103c   :  { %2513 = vmatpush1.msra.mxu0 %v6561_v32 }
0x103d   :  { %2514 = vmatprep.subr.mxu0 %v6567_v36 }
0x103e   :  { %2515 = vmatpush1.msra.mxu0 %v6573_v7 }
0x103f   :  { %2516 = vmatprep.subr.mxu0 %v6579_v33 }
0x1040   :  { %2517 = vmatpush1.msra.mxu0 %v6585_v9 }
0x1041   :  { %2518 = vmatprep.subr.mxu0 %v6591_v60 }
0x1042   :  { %2519 = vmatpush1.msra.mxu0 %v6597_v8 }
0x1043   :  { %2520 = vmatprep.subr.mxu0 %v6603_v58 }
0x1044   :  { %2521 = vmatpush1.msra.mxu0 %v6609_v54  ;;  %v2242_v46 = vpop.permute.xlu1 %2241 }
0x1045   :  { %2522 = vmatprep.subr.mxu0 %v6689_v42  ;;  %v6966_v25 = vmul.f32 %v5344_v38, %v2242_v46 }
0x1046   :  { %2523 = vmatpush1.msra.mxu0 %v6695_v43 }
0x1047   :  { %2736 = vmatprep.subr.mxu0 %v6617_v0  ;;  %8231 = vst [vmem:[#allocation65_spill] sm:$0xff] %v6966_v25  ;;  %5033 = vmatmul.mubr.msk.f32.vlgmr.msra.gmra.mxu1 %vm655_vm1, %v6966_v25 }
0x1048   :  { %2615 = vmatpush1.msra.mxu1 %v6706_v48  ;;  %2662 = vmatprep.mubr.f32.mxu1 %v8212_v19 }
0x1049   :  { %2616 = vmatprep.subr.mxu1 %v6713_v50 }
0x104a   :  { %2617 = vmatpush1.msra.mxu1 %v6719_v51 }
0x104b   :  { %2618 = vmatprep.subr.mxu1 %v6725_v52 }
0x104c   :  { %2619 = vmatpush1.msra.mxu1 %v6731_v53 }
0x104d   :  { %2620 = vmatprep.subr.mxu1 %v6737_v55 }
0x104e   :  { %2621 = vmatpush1.msra.mxu1 %v6743_v56 }
0x104f   :  { %2622 = vmatprep.subr.mxu1 %v6749_v12 }
0x1050   :  { %2623 = vmatpush1.msra.mxu1 %v6755_v17 }
0x1051   :  { %2624 = vmatprep.subr.mxu1 %v6761_v5 }
0x1052   :  { %2625 = vmatpush1.msra.mxu1 %v6767_v63 }
0x1053   :  { %2626 = vmatprep.subr.mxu1 %v6773_v2 }
0x1054   :  { %2627 = vmatpush1.msra.mxu1 %v6779_v61 }
0x1055   :  { %2628 = vmatprep.subr.mxu1 %v6785_v20 }
0x1056   :  { %2629 = vmatpush1.msra.mxu1 %v6791_v44 }
0x1057   :  { %2842 = vmatprep.subr.mxu1 %v6643_v34 }
0x10f7   :  { %v2330_v1 = vpop.f32.mrf.mxu0 }
0x10f8   :  { %v2335_v40 = vadd.f32 %v2330_v1, %v290_v39 }
0x10f9   :  { %v2332_v10 = vpop.f32.mrf.mxu0 }
0x10fa   :  { %v2336_v24 = vadd.f32 %v2332_v10, %v292_v22  ;;  %v5031_v39 = vmul.f32 -1.442695, %v2335_v40 }
0x10fc   :  { %5345 = vtanh.f32 %v2336_v24 }
0x1107   :  { %v2436_v6 = vpop.f32.mrf.mxu1 }
0x1108   :  { %v2441_v38 = vadd.f32 %v2436_v6, %v535_v57 }
0x1109   :  { %v5346_v21 = vpop.eup %5345  ;;  %v2438_v46 = vpop.f32.mrf.mxu1 }
0x110a   :  { %2352 = vrot.lane.b32.xlu0 %v5346_v21, %s5781_s28  ;;  %v2442_v18 = vadd.f32 %v2438_v46, %v537_v35  ;;  %v5034_v14 = vmul.f32 -1.442695, %v2441_v38 }
0x110c   :  { %5347 = vtanh.f32 %v2442_v18 }
0x110d   :  { %5349 = vpow2.f32 %v5031_v39 }
0x110e   :  { %5351 = vpow2.f32 %v5034_v14 }
0x1119   :  { %v5348_v25 = vpop.eup %5347 }
0x111a   :  { %2458 = vrot.lane.b32.xlu1 %v5348_v25, %s5781_s28  ;;  %v5350_v1 = vpop.eup %5349 }
0x111b   :  { %v2343_v22 = vadd.f32 1.0, %v5350_v1  ;;  %v5352_v10 = vpop.eup %5351 }
0x111c   :  { %v2449_v57 = vadd.f32 1.0, %v5352_v10  ;;  %v5035_v10 = vmul.f32 -1.442695, %v2442_v18  ;;  %v8241_v18 = vld [vmem:[#allocation49_spill] sm:$0xff] }
0x111d   :  { %5353 = vrcp.f32 %v2343_v22  ;;  %v5032_v22 = vmul.f32 -1.442695, %v2336_v24 }
0x111e   :  { %5355 = vrcp.f32 %v2449_v57 }
0x112a   :  { %v5354_v45 = vpop.eup %5353 }
0x112b   :  { %v5356_v21 = vpop.eup %5355  ;;  %v2350_v25 = vmul.f32 %v5354_v45, %v6936_v23 }
0x117c   :  { %v2353_v37 = vpop.permute.xlu0 %2352 }
0x117d   :  { %v2355_v13 = vmul.f32 %v5354_v45, %v2353_v37  ;;  %v2456_v37 = vmul.f32 %v5356_v21, %v6941_v4 }
0x117f   :  { %2357 = vrot.lane.b32.xlu0 %v2355_v13, %s5781_s28 }
0x118c   :  { %v2459_v6 = vpop.permute.xlu1 %2458 }
0x118d   :  { %v2461_v35 = vmul.f32 %v5356_v21, %v2459_v6  ;;  %v531_v21 = vadd.f32 %v8241_v18, %v6386_v3 }
0x118f   :  { %2463 = vrot.lane.b32.xlu1 %v2461_v35, %s5781_s28 }
0x11f1   :  { %v2358_v40 = vpop.permute.xlu0 %2357 }
0x11f2   :  { %v7000_v38 = vadd.f32 %v2358_v40, %v2350_v25 }
0x11f4   :  { %5357 = vtanh.f32 %v7000_v38 }
0x1201   :  { %v5358_v46 = vpop.eup %5357  ;;  %v2464_v39 = vpop.permute.xlu1 %2463 }
0x1202   :  { %2363 = vrot.lane.b32.xlu0 %v5358_v46, %s5781_s28  ;;  %v7005_v1 = vadd.f32 %v2464_v39, %v2456_v37 }
0x1204   :  { %5359 = vtanh.f32 %v7005_v1 }
0x1205   :  { %5361 = vpow2.f32 %v5032_v22 }
0x1206   :  { %5363 = vpow2.f32 %v5035_v10 }
0x1211   :  { %v5360_v14 = vpop.eup %5359 }
0x1212   :  { %2469 = vrot.lane.b32.xlu1 %v5360_v14, %s5781_s28  ;;  %v5362_v23 = vpop.eup %5361 }
0x1213   :  { %v2344_v45 = vadd.f32 1.0, %v5362_v23  ;;  %v5364_v13 = vpop.eup %5363 }
0x1214   :  { %v2450_v4 = vadd.f32 1.0, %v5364_v13 }
0x1215   :  { %5365 = vrcp.f32 %v2344_v45 }
0x1216   :  { %5367 = vrcp.f32 %v2450_v4 }
0x1222   :  { %v5366_v57 = vpop.eup %5365 }
0x1274   :  { %v2364_v6 = vpop.permute.xlu0 %2363 }
0x1275   :  { %v7009_v35 = vmul.f32 %v5366_v57, %v2364_v6 }
0x1277   :  { %8236 = vst [vmem:[#allocation24_spill] sm:$0xff] %v7009_v35  ;;  %5036 = vmatmul.mubr.msk.f32.vlgmr.msra.gmra.mxu0 %vm655_vm1, %v7009_v35 }
0x1278   :  { %2737 = vmatpush1.msra.mxu0 %v6536_v29  ;;  %2784 = vmatprep.mubr.f32.mxu0 %v8212_v19  ;;  %v5368_v29 = vpop.eup %5367 }
0x1279   :  { %2738 = vmatprep.subr.mxu0 %v6543_v26 }
0x127a   :  { %2739 = vmatpush1.msra.mxu0 %v6549_v30 }
0x127b   :  { %2740 = vmatprep.subr.mxu0 %v6555_v31  ;;  %v8238_v31 = vld [vmem:[#allocation36_spill] sm:$0xff] }
0x127c   :  { %2741 = vmatpush1.msra.mxu0 %v6561_v32  ;;  %v296_v32 = vadd.f32 %v8238_v31, %v6360_v62 }
0x127d   :  { %2742 = vmatprep.subr.mxu0 %v6567_v36 }
0x127e   :  { %2743 = vmatpush1.msra.mxu0 %v6573_v7  ;;  %v8239_v7 = vld [vmem:[#allocation38_spill] sm:$0xff] }
0x127f   :  { %2744 = vmatprep.subr.mxu0 %v6579_v33  ;;  %v298_v33 = vadd.f32 %v8239_v7, %v6366_v28 }
0x1280   :  { %2745 = vmatpush1.msra.mxu0 %v6585_v9 }
0x1281   :  { %2746 = vmatprep.subr.mxu0 %v6591_v60 }
0x1282   :  { %2747 = vmatpush1.msra.mxu0 %v6597_v8 }
0x1283   :  { %2748 = vmatprep.subr.mxu0 %v6603_v58  ;;  %v8240_v58 = vld [vmem:[#allocation47_spill] sm:$0xff] }
0x1284   :  { %2749 = vmatpush1.msra.mxu0 %v6609_v54  ;;  %v2470_v26 = vpop.permute.xlu1 %2469  ;;  %v529_v54 = vadd.f32 %v8240_v58, %v6383_v11 }
0x1285   :  { %2750 = vmatprep.subr.mxu0 %v6689_v42  ;;  %v7030_v30 = vmul.f32 %v5368_v29, %v2470_v26 }
0x1286   :  { %2751 = vmatpush1.msra.mxu0 %v6695_v43 }
0x1287   :  { %2962 = vmatprep.subr.mxu0 %v6617_v0  ;;  %8237 = vst [vmem:[#allocation26_spill] sm:$0xff] %v7030_v30  ;;  %5039 = vmatmul.mubr.msk.f32.vlgmr.msra.gmra.mxu1 %vm655_vm1, %v7030_v30 }
0x1288   :  { %2843 = vmatpush1.msra.mxu1 %v6706_v48  ;;  %2890 = vmatprep.mubr.f32.mxu1 %v8212_v19 }
0x1289   :  { %2844 = vmatprep.subr.mxu1 %v6713_v50 }
0x128a   :  { %2845 = vmatpush1.msra.mxu1 %v6719_v51 }
0x128b   :  { %2846 = vmatprep.subr.mxu1 %v6725_v52 }
0x128c   :  { %2847 = vmatpush1.msra.mxu1 %v6731_v53 }
0x128d   :  { %2848 = vmatprep.subr.mxu1 %v6737_v55 }
0x128e   :  { %2849 = vmatpush1.msra.mxu1 %v6743_v56 }
0x128f   :  { %2850 = vmatprep.subr.mxu1 %v6749_v12 }
0x1290   :  { %2851 = vmatpush1.msra.mxu1 %v6755_v17 }
0x1291   :  { %2852 = vmatprep.subr.mxu1 %v6761_v5 }
0x1292   :  { %2853 = vmatpush1.msra.mxu1 %v6767_v63 }
0x1293   :  { %2854 = vmatprep.subr.mxu1 %v6773_v2 }
0x1294   :  { %2855 = vmatpush1.msra.mxu1 %v6779_v61 }
0x1295   :  { %2856 = vmatprep.subr.mxu1 %v6785_v20 }
0x1296   :  { %2857 = vmatpush1.msra.mxu1 %v6791_v44 }
0x1297   :  { %3068 = vmatprep.subr.mxu1 %v6643_v34 }
0x1337   :  { %v2558_v36 = vpop.f32.mrf.mxu0 }
0x1338   :  { %v2563_v9 = vadd.f32 %v2558_v36, %v296_v32 }
0x1339   :  { %v2560_v60 = vpop.f32.mrf.mxu0 }
0x133a   :  { %v2564_v8 = vadd.f32 %v2560_v60, %v298_v33  ;;  %v5037_v37 = vmul.f32 -1.442695, %v2563_v9 }
0x133c   :  { %5369 = vtanh.f32 %v2564_v8  ;;  %v5038_v58 = vmul.f32 -1.442695, %v2564_v8  ;;  %v7087_v8 = vld [vmem:[%s8117_s2 + $0x68] sm:$0xff] }
0x1347   :  { %v2664_v24 = vpop.f32.mrf.mxu1 }
0x1348   :  { %v2669_v34 = vadd.f32 %v2664_v24, %v529_v54 }
0x1349   :  { %v5370_v0 = vpop.eup %5369  ;;  %v2666_v25 = vpop.f32.mrf.mxu1 }
0x134a   :  { %2580 = vrot.lane.b32.xlu0 %v5370_v0, %s5781_s28  ;;  %v2670_v40 = vadd.f32 %v2666_v25, %v531_v21  ;;  %v5040_v14 = vmul.f32 -1.442695, %v2669_v34  ;;  %v7080_v25 = vld [vmem:[%s8117_s2 + $0x70] sm:$0xff] }
0x134c   :  { %5371 = vtanh.f32 %v2670_v40  ;;  %v5041_v54 = vmul.f32 -1.442695, %v2670_v40  ;;  %v7093_v40 = vld [vmem:[%s8117_s2 + $0x60] sm:$0xff] }
0x134d   :  { %5373 = vpow2.f32 %v5037_v37  ;;  %v7105_v37 = vld [vmem:[%s8117_s2 + $0x50] sm:$0xff] }
0x134e   :  { %5375 = vpow2.f32 %v5040_v14  ;;  %v7117_v14 = vld [vmem:[%s8117_s2 + $0x40] sm:$0xff] }
0x1359   :  { %v5372_v46 = vpop.eup %5371 }
0x135a   :  { %2686 = vrot.lane.b32.xlu1 %v5372_v46, %s5781_s28  ;;  %v5374_v39 = vpop.eup %5373  ;;  %v7099_v46 = vld [vmem:[%s8117_s2 + $0x58] sm:$0xff] }
0x135b   :  { %v2571_v22 = vadd.f32 1.0, %v5374_v39  ;;  %v5376_v23 = vpop.eup %5375  ;;  %v7111_v39 = vld [vmem:[%s8117_s2 + $0x48] sm:$0xff] }
0x135c   :  { %v2677_v57 = vadd.f32 1.0, %v5376_v23  ;;  %v7129_v23 = vld [vmem:[%s8117_s2 + $0x30] sm:$0xff] }
0x135d   :  { %5377 = vrcp.f32 %v2571_v22  ;;  %v7123_v22 = vld [vmem:[%s8117_s2 + $0x38] sm:$0xff] }
0x135e   :  { %5379 = vrcp.f32 %v2677_v57  ;;  %v7153_v57 = vld [vmem:[%s8117_s2 + $0x10] sm:$0xff] }
0x136a   :  { %v5378_v10 = vpop.eup %5377 }
0x136b   :  { %v5380_v6 = vpop.eup %5379  ;;  %v2578_v26 = vmul.f32 %v5378_v10, %v7000_v38 }
0x136c   :  { %v2684_v7 = vmul.f32 %v5380_v6, %v7005_v1 }
0x13bc   :  { %v2581_v45 = vpop.permute.xlu0 %2580 }
0x13bd   :  { %v2583_v13 = vmul.f32 %v5378_v10, %v2581_v45  ;;  %v7135_v10 = vld [vmem:[%s8117_s2 + $0x28] sm:$0xff]  ;;  %v7141_v45 = vld [vmem:[%s8117_s2 + $0x20] sm:$0xff] }
0x13bf   :  { %2585 = vrot.lane.b32.xlu0 %v2583_v13, %s5781_s28  ;;  %v7147_v13 = vld [vmem:[%s8117_s2 + $0x18] sm:$0xff] }
0x13cc   :  { %v2687_v4 = vpop.permute.xlu1 %2686 }
0x13cd   :  { %v2689_v29 = vmul.f32 %v5380_v6, %v2687_v4 }
0x13cf   :  { %2691 = vrot.lane.b32.xlu1 %v2689_v29, %s5781_s28  ;;  %v7161_v29 = vld [vmem:[%s8117_s2 + $0x78] sm:$0xff] }
0x1431   :  { %v2586_v31 = vpop.permute.xlu0 %2585 }
0x1432   :  { %v7064_v32 = vadd.f32 %v2586_v31, %v2578_v26 }
0x1434   :  { %5381 = vtanh.f32 %v7064_v32 }
0x1441   :  { %v5382_v36 = vpop.eup %5381  ;;  %v2692_v33 = vpop.permute.xlu1 %2691 }
0x1442   :  { %2591 = vrot.lane.b32.xlu0 %v5382_v36, %s5781_s28  ;;  %v7069_v9 = vadd.f32 %v2692_v33, %v2684_v7 }
0x1444   :  { %5383 = vtanh.f32 %v7069_v9 }
0x1445   :  { %5385 = vpow2.f32 %v5038_v58 }
0x1446   :  { %5387 = vpow2.f32 %v5041_v54 }
0x1451   :  { %v5384_v60 = vpop.eup %5383 }
0x1452   :  { %2697 = vrot.lane.b32.xlu1 %v5384_v60, %s5781_s28  ;;  %v5386_v38 = vpop.eup %5385 }
0x1453   :  { %v2572_v0 = vadd.f32 1.0, %v5386_v38  ;;  %v5388_v24 = vpop.eup %5387 }
0x1454   :  { %v2678_v1 = vadd.f32 1.0, %v5388_v24 }
0x1455   :  { %5389 = vrcp.f32 %v2572_v0 }
0x1456   :  { %5391 = vrcp.f32 %v2678_v1 }
0x1462   :  { %v5390_v18 = vpop.eup %5389 }
0x1463   :  { %v5392_v6 = vpop.eup %5391 }
0x14b4   :  { %v2592_v21 = vpop.permute.xlu0 %2591 }
0x14b5   :  { %v7073_v34 = vmul.f32 %v5390_v18, %v2592_v21 }
0x14b7   :  { %8242 = vst [vmem:[#allocation59_spill] sm:$0xff] %v7073_v34  ;;  %5042 = vmatmul.mubr.msk.f32.vlgmr.msra.gmra.mxu0 %vm655_vm1, %v7073_v34 }
0x14b8   :  { %2963 = vmatpush1.msra.mxu0 %v7080_v25  ;;  %3010 = vmatprep.mubr.f32.mxu0 %v8212_v19 }
0x14b9   :  { %2964 = vmatprep.subr.mxu0 %v7087_v8 }
0x14ba   :  { %2965 = vmatpush1.msra.mxu0 %v7093_v40 }
0x14bb   :  { %2966 = vmatprep.subr.mxu0 %v7099_v46 }
0x14bc   :  { %2967 = vmatpush1.msra.mxu0 %v7105_v37 }
0x14bd   :  { %2968 = vmatprep.subr.mxu0 %v7111_v39 }
0x14be   :  { %2969 = vmatpush1.msra.mxu0 %v7117_v14 }
0x14bf   :  { %2970 = vmatprep.subr.mxu0 %v7123_v22 }
0x14c0   :  { %2971 = vmatpush1.msra.mxu0 %v7129_v23 }
0x14c1   :  { %2972 = vmatprep.subr.mxu0 %v7135_v10 }
0x14c2   :  { %2973 = vmatpush1.msra.mxu0 %v7141_v45 }
0x14c3   :  { %2974 = vmatprep.subr.mxu0 %v7147_v13 }
0x14c4   :  { %2975 = vmatpush1.msra.mxu0 %v7153_v57  ;;  %v2698_v4 = vpop.permute.xlu1 %2697 }
0x14c5   :  { %2976 = vmatprep.subr.mxu0 %v6689_v42  ;;  %v7164_v26 = vmul.f32 %v5392_v6, %v2698_v4  ;;  %v7187_v42 = vld [vmem:[%s8120_s5 + $0x78] sm:$0xff] }
0x14c6   :  { %2977 = vmatpush1.msra.mxu0 %v6695_v43  ;;  %v8244_v43 = vld [vmem:[#allocation40_spill] sm:$0xff] }
0x14c7   :  { %3188 = vmatprep.subr.mxu0 %v7161_v29  ;;  %8243 = vst [vmem:[#allocation61_spill] sm:$0xff] %v7164_v26  ;;  %5045 = vmatmul.mubr.msk.f32.vlgmr.msra.gmra.mxu1 %vm655_vm1, %v7164_v26 }
0x14c8   :  { %3069 = vmatpush1.msra.mxu1 %v6706_v48  ;;  %3116 = vmatprep.mubr.f32.mxu1 %v8212_v19  ;;  %v302_v48 = vadd.f32 %v8244_v43, %v6360_v62 }
0x14c9   :  { %3070 = vmatprep.subr.mxu1 %v6713_v50 }
0x14ca   :  { %3071 = vmatpush1.msra.mxu1 %v6719_v51  ;;  %v8245_v51 = vld [vmem:[#allocation42_spill] sm:$0xff] }
0x14cb   :  { %3072 = vmatprep.subr.mxu1 %v6725_v52  ;;  %v304_v52 = vadd.f32 %v8245_v51, %v6366_v28 }
0x14cc   :  { %3073 = vmatpush1.msra.mxu1 %v6731_v53 }
0x14cd   :  { %3074 = vmatprep.subr.mxu1 %v6737_v55 }
0x14ce   :  { %3075 = vmatpush1.msra.mxu1 %v6743_v56 }
0x14cf   :  { %3076 = vmatprep.subr.mxu1 %v6749_v12  ;;  %v8246_v12 = vld [vmem:[#allocation43_spill] sm:$0xff] }
0x14d0   :  { %3077 = vmatpush1.msra.mxu1 %v6755_v17  ;;  %v523_v17 = vadd.f32 %v8246_v12, %v6383_v11 }
0x14d1   :  { %3078 = vmatprep.subr.mxu1 %v6761_v5 }
0x14d2   :  { %3079 = vmatpush1.msra.mxu1 %v6767_v63 }
0x14d3   :  { %3080 = vmatprep.subr.mxu1 %v6773_v2  ;;  %v8247_v2 = vld [vmem:[#allocation45_spill] sm:$0xff] }
0x14d4   :  { %3081 = vmatpush1.msra.mxu1 %v6779_v61  ;;  %v525_v61 = vadd.f32 %v8247_v2, %v6386_v3 }
0x14d5   :  { %3082 = vmatprep.subr.mxu1 %v6785_v20 }
0x14d6   :  { %3083 = vmatpush1.msra.mxu1 %v6791_v44 }
0x14d7   :  { %3294 = vmatprep.subr.mxu1 %v7187_v42 }
0x1577   :  { %v2786_v50 = vpop.f32.mrf.mxu0 }
0x1578   :  { %v2791_v53 = vadd.f32 %v2786_v50, %v302_v48 }
0x1579   :  { %v2788_v55 = vpop.f32.mrf.mxu0 }
0x157a   :  { %v2792_v56 = vadd.f32 %v2788_v55, %v304_v52  ;;  %v5043_v7 = vmul.f32 -1.442695, %v2791_v53 }
0x157c   :  { %5393 = vtanh.f32 %v2792_v56  ;;  %v5044_v12 = vmul.f32 -1.442695, %v2792_v56  ;;  %v7233_v56 = vld [vmem:[%s8117_s2 + $0x8] sm:$0xff] }
0x1587   :  { %v2892_v63 = vpop.f32.mrf.mxu1 }
0x1588   :  { %v2897_v20 = vadd.f32 %v2892_v63, %v523_v17 }
0x1589   :  { %v5394_v5 = vpop.eup %5393  ;;  %v2894_v44 = vpop.f32.mrf.mxu1 }
0x158a   :  { %2808 = vrot.lane.b32.xlu0 %v5394_v5, %s5781_s28  ;;  %v2898_v31 = vadd.f32 %v2894_v44, %v525_v61  ;;  %v5046_v60 = vmul.f32 -1.442695, %v2897_v20  ;;  %v7239_v44 = vld [vmem:[%s8117_s2] sm:$0xff] }
0x158c   :  { %5395 = vtanh.f32 %v2898_v31  ;;  %v5047_v17 = vmul.f32 -1.442695, %v2898_v31 }
0x158d   :  { %5397 = vpow2.f32 %v5043_v7 }
0x158e   :  { %5399 = vpow2.f32 %v5046_v60  ;;  %v7257_v60 = vld [vmem:[%s8120_s5 + $0x68] sm:$0xff] }
0x1599   :  { %v5396_v36 = vpop.eup %5395 }
0x159a   :  { %2914 = vrot.lane.b32.xlu1 %v5396_v36, %s5781_s28  ;;  %v5398_v33 = vpop.eup %5397 }
0x159b   :  { %v2799_v58 = vadd.f32 1.0, %v5398_v33  ;;  %v5400_v38 = vpop.eup %5399  ;;  %v7250_v33 = vld [vmem:[%s8120_s5 + $0x70] sm:$0xff] }
0x159c   :  { %v2905_v18 = vadd.f32 1.0, %v5400_v38  ;;  %v7269_v38 = vld [vmem:[%s8120_s5 + $0x58] sm:$0xff] }
0x159d   :  { %5401 = vrcp.f32 %v2799_v58  ;;  %v7263_v58 = vld [vmem:[%s8120_s5 + $0x60] sm:$0xff] }
0x159e   :  { %5403 = vrcp.f32 %v2905_v18  ;;  %v7293_v18 = vld [vmem:[%s8120_s5 + $0x38] sm:$0xff] }
0x15aa   :  { %v5402_v54 = vpop.eup %5401 }
0x15ab   :  { %v5404_v21 = vpop.eup %5403  ;;  %v2806_v4 = vmul.f32 %v5402_v54, %v7064_v32 }
0x15ac   :  { %v2912_v51 = vmul.f32 %v5404_v21, %v7069_v9 }
0x15fc   :  { %v2809_v0 = vpop.permute.xlu0 %2808 }
0x15fd   :  { %v2811_v24 = vmul.f32 %v5402_v54, %v2809_v0  ;;  %v7275_v54 = vld [vmem:[%s8120_s5 + $0x50] sm:$0xff]  ;;  %v7281_v0 = vld [vmem:[%s8120_s5 + $0x48] sm:$0xff] }
0x15ff   :  { %2813 = vrot.lane.b32.xlu0 %v2811_v24, %s5781_s28  ;;  %v7287_v24 = vld [vmem:[%s8120_s5 + $0x40] sm:$0xff] }
0x160c   :  { %v2915_v1 = vpop.permute.xlu1 %2914 }
0x160d   :  { %v2917_v6 = vmul.f32 %v5404_v21, %v2915_v1  ;;  %v7299_v21 = vld [vmem:[%s8120_s5 + $0x30] sm:$0xff]  ;;  %v7305_v1 = vld [vmem:[%s8120_s5 + $0x28] sm:$0xff] }
0x160f   :  { %2919 = vrot.lane.b32.xlu1 %v2917_v6, %s5781_s28  ;;  %v7311_v6 = vld [vmem:[%s8120_s5 + $0x20] sm:$0xff] }
0x1671   :  { %v2814_v43 = vpop.permute.xlu0 %2813 }
0x1672   :  { %v7203_v48 = vadd.f32 %v2814_v43, %v2806_v4  ;;  %v7317_v4 = vld [vmem:[%s8120_s5 + $0x18] sm:$0xff]  ;;  %v7323_v43 = vld [vmem:[%s8120_s5 + $0x10] sm:$0xff] }
0x1674   :  { %5405 = vtanh.f32 %v7203_v48 }
0x1681   :  { %v5406_v50 = vpop.eup %5405  ;;  %v2920_v52 = vpop.permute.xlu1 %2919 }
0x1682   :  { %2819 = vrot.lane.b32.xlu0 %v5406_v50, %s5781_s28  ;;  %v7208_v53 = vadd.f32 %v2920_v52, %v2912_v51  ;;  %v7329_v50 = vld [vmem:[%s8120_s5 + $0x8] sm:$0xff]  ;;  %v7335_v51 = vld [vmem:[%s8120_s5] sm:$0xff] }
0x1683   :  { %v8250_v52 = vld [vmem:[#allocation44_spill] sm:$0xff] }
0x1684   :  { %5407 = vtanh.f32 %v7208_v53 }
0x1685   :  { %5409 = vpow2.f32 %v5044_v12 }
0x1686   :  { %5411 = vpow2.f32 %v5047_v17 }
0x1691   :  { %v5408_v55 = vpop.eup %5407 }
0x1692   :  { %2925 = vrot.lane.b32.xlu1 %v5408_v55, %s5781_s28  ;;  %v5410_v32 = vpop.eup %5409  ;;  %v308_v55 = vadd.f32 %v8250_v52, %v6360_v62 }
0x1693   :  { %v2800_v5 = vadd.f32 1.0, %v5410_v32  ;;  %v5412_v63 = vpop.eup %5411  ;;  %v8251_v32 = vld [vmem:[#allocation46_spill] sm:$0xff] }
0x1694   :  { %v2906_v9 = vadd.f32 1.0, %v5412_v63  ;;  %v310_v17 = vadd.f32 %v8251_v32, %v6366_v28 }
0x1695   :  { %5413 = vrcp.f32 %v2800_v5 }
0x1696   :  { %5415 = vrcp.f32 %v2906_v9 }
0x16a2   :  { %v5414_v2 = vpop.eup %5413 }
0x16a3   :  { %v5416_v31 = vpop.eup %5415 }
0x16f4   :  { %v2820_v61 = vpop.permute.xlu0 %2819 }
0x16f5   :  { %v7212_v20 = vmul.f32 %v5414_v2, %v2820_v61  ;;  %v8252_v61 = vld [vmem:[#allocation39_spill] sm:$0xff] }
0x16f6   :  { %v517_v9 = vadd.f32 %v8252_v61, %v6383_v11 }
0x16f7   :  { %8248 = vst [vmem:[#allocation28_spill] sm:$0xff] %v7212_v20  ;;  %5048 = vmatmul.mubr.msk.f32.vlgmr.msra.gmra.mxu0 %vm655_vm1, %v7212_v20 }
0x16f8   :  { %3189 = vmatpush1.msra.mxu0 %v7080_v25  ;;  %3236 = vmatprep.mubr.f32.mxu0 %v8212_v19 }
0x16f9   :  { %3190 = vmatprep.subr.mxu0 %v7087_v8 }
0x16fa   :  { %3191 = vmatpush1.msra.mxu0 %v7093_v40 }
0x16fb   :  { %3192 = vmatprep.subr.mxu0 %v7099_v46 }
0x16fc   :  { %3193 = vmatpush1.msra.mxu0 %v7105_v37 }
0x16fd   :  { %3194 = vmatprep.subr.mxu0 %v7111_v39 }
0x16fe   :  { %3195 = vmatpush1.msra.mxu0 %v7117_v14 }
0x16ff   :  { %3196 = vmatprep.subr.mxu0 %v7123_v22 }
0x1700   :  { %3197 = vmatpush1.msra.mxu0 %v7129_v23 }
0x1701   :  { %3198 = vmatprep.subr.mxu0 %v7135_v10 }
0x1702   :  { %3199 = vmatpush1.msra.mxu0 %v7141_v45 }
0x1703   :  { %3200 = vmatprep.subr.mxu0 %v7147_v13 }
0x1704   :  { %3201 = vmatpush1.msra.mxu0 %v7153_v57  ;;  %v2926_v36 = vpop.permute.xlu1 %2925 }
0x1705   :  { %3202 = vmatprep.subr.mxu0 %v7233_v56  ;;  %v7243_v7 = vmul.f32 %v5416_v31, %v2926_v36 }
0x1706   :  { %3203 = vmatpush1.msra.mxu0 %v7239_v44 }
0x1707   :  { %3414 = vmatprep.subr.mxu0 %v7161_v29  ;;  %8249 = vst [vmem:[#allocation30_spill] sm:$0xff] %v7243_v7  ;;  %5051 = vmatmul.mubr.msk.f32.vlgmr.msra.gmra.mxu1 %vm655_vm1, %v7243_v7  ;;  %v8253_v7 = vld [vmem:[#allocation41_spill] sm:$0xff] }
0x1708   :  { %3295 = vmatpush1.msra.mxu1 %v7250_v33  ;;  %3342 = vmatprep.mubr.f32.mxu1 %v8212_v19  ;;  %v519_v26 = vadd.f32 %v8253_v7, %v6386_v3 }
0x1709   :  { %3296 = vmatprep.subr.mxu1 %v7257_v60 }
0x170a   :  { %3297 = vmatpush1.msra.mxu1 %v7263_v58 }
0x170b   :  { %3298 = vmatprep.subr.mxu1 %v7269_v38 }
0x170c   :  { %3299 = vmatpush1.msra.mxu1 %v7275_v54 }
0x170d   :  { %3300 = vmatprep.subr.mxu1 %v7281_v0 }
0x170e   :  { %3301 = vmatpush1.msra.mxu1 %v7287_v24 }
0x170f   :  { %3302 = vmatprep.subr.mxu1 %v7293_v18 }
0x1710   :  { %3303 = vmatpush1.msra.mxu1 %v7299_v21 }
0x1711   :  { %3304 = vmatprep.subr.mxu1 %v7305_v1 }
0x1712   :  { %3305 = vmatpush1.msra.mxu1 %v7311_v6 }
0x1713   :  { %3306 = vmatprep.subr.mxu1 %v7317_v4 }
0x1714   :  { %3307 = vmatpush1.msra.mxu1 %v7323_v43 }
0x1715   :  { %3308 = vmatprep.subr.mxu1 %v7329_v50 }
0x1716   :  { %3309 = vmatpush1.msra.mxu1 %v7335_v51 }
0x1717   :  { %3520 = vmatprep.subr.mxu1 %v7187_v42 }
0x17b7   :  { %v3012_v12 = vpop.f32.mrf.mxu0 }
0x17b8   :  { %v3017_v5 = vadd.f32 %v3012_v12, %v308_v55 }
0x17b9   :  { %v3014_v63 = vpop.f32.mrf.mxu0 }
0x17ba   :  { %v3018_v2 = vadd.f32 %v3014_v63, %v310_v17  ;;  %v5049_v55 = vmul.f32 -1.442695, %v3017_v5 }
0x17bc   :  { %5417 = vtanh.f32 %v3018_v2 }
0x17c7   :  { %v3118_v36 = vpop.f32.mrf.mxu1 }
0x17c8   :  { %v3123_v30 = vadd.f32 %v3118_v36, %v517_v9 }
0x17c9   :  { %v5418_v31 = vpop.eup %5417  ;;  %v3120_v52 = vpop.f32.mrf.mxu1 }
0x17ca   :  { %3034 = vrot.lane.b32.xlu0 %v5418_v31, %s5781_s28  ;;  %v3124_v20 = vadd.f32 %v3120_v52, %v519_v26  ;;  %v5052_v32 = vmul.f32 -1.442695, %v3123_v30 }
0x17cc   :  { %5419 = vtanh.f32 %v3124_v20 }
0x17cd   :  { %5421 = vpow2.f32 %v5049_v55 }
0x17ce   :  { %5423 = vpow2.f32 %v5052_v32 }
0x17d9   :  { %v5420_v34 = vpop.eup %5419 }
0x17da   :  { %3140 = vrot.lane.b32.xlu1 %v5420_v34, %s5781_s28  ;;  %v5422_v12 = vpop.eup %5421 }
0x17db   :  { %v3025_v17 = vadd.f32 1.0, %v5422_v12  ;;  %v5424_v63 = vpop.eup %5423 }
0x17dc   :  { %v3131_v9 = vadd.f32 1.0, %v5424_v63  ;;  %v5053_v63 = vmul.f32 -1.442695, %v3124_v20 }
0x17dd   :  { %5425 = vrcp.f32 %v3025_v17  ;;  %v5050_v17 = vmul.f32 -1.442695, %v3018_v2 }
0x17de   :  { %5427 = vrcp.f32 %v3131_v9 }
0x17ea   :  { %v5426_v61 = vpop.eup %5425 }
0x17eb   :  { %v5428_v26 = vpop.eup %5427  ;;  %v3032_v34 = vmul.f32 %v5426_v61, %v7203_v48 }
0x183c   :  { %v3035_v35 = vpop.permute.xlu0 %3034 }
0x183d   :  { %v3037_v7 = vmul.f32 %v5426_v61, %v3035_v35  ;;  %v3138_v35 = vmul.f32 %v5428_v26, %v7208_v53 }
0x183f   :  { %3039 = vrot.lane.b32.xlu0 %v3037_v7, %s5781_s28 }
0x184c   :  { %v3141_v31 = vpop.permute.xlu1 %3140 }
0x184d   :  { %v3143_v36 = vmul.f32 %v5428_v26, %v3141_v31 }
0x184f   :  { %3145 = vrot.lane.b32.xlu1 %v3143_v36, %s5781_s28 }
0x18b1   :  { %v3040_v5 = vpop.permute.xlu0 %3039 }
0x18b2   :  { %v7352_v30 = vadd.f32 %v3040_v5, %v3032_v34  ;;  %v8256_v34 = vld [vmem:[#allocation48_spill] sm:$0xff] }
0x18b3   :  { %v314_v5 = vadd.f32 %v8256_v34, %v6360_v62 }
0x18b4   :  { %5429 = vtanh.f32 %v7352_v30 }
0x18c1   :  { %v5430_v52 = vpop.eup %5429  ;;  %v3146_v55 = vpop.permute.xlu1 %3145 }
0x18c2   :  { %3045 = vrot.lane.b32.xlu0 %v5430_v52, %s5781_s28  ;;  %v7357_v12 = vadd.f32 %v3146_v55, %v3138_v35  ;;  %v8257_v35 = vld [vmem:[#allocation50_spill] sm:$0xff] }
0x18c3   :  { %v316_v55 = vadd.f32 %v8257_v35, %v6366_v28 }
0x18c4   :  { %5431 = vtanh.f32 %v7357_v12 }
0x18c5   :  { %5433 = vpow2.f32 %v5050_v17 }
0x18c6   :  { %5435 = vpow2.f32 %v5053_v63  ;;  %v8258_v63 = vld [vmem:[#allocation35_spill] sm:$0xff] }
0x18d1   :  { %v5432_v32 = vpop.eup %5431 }
0x18d2   :  { %3151 = vrot.lane.b32.xlu1 %v5432_v32, %s5781_s28  ;;  %v5434_v48 = vpop.eup %5433 }
0x18d3   :  { %v3026_v61 = vadd.f32 1.0, %v5434_v48  ;;  %v5436_v7 = vpop.eup %5435 }
0x18d4   :  { %v3132_v53 = vadd.f32 1.0, %v5436_v7 }
0x18d5   :  { %5437 = vrcp.f32 %v3026_v61  ;;  %v511_v61 = vadd.f32 %v8258_v63, %v6383_v11 }
0x18d6   :  { %5439 = vrcp.f32 %v3132_v53 }
0x18e2   :  { %v5438_v9 = vpop.eup %5437 }
0x18e3   :  { %v5440_v20 = vpop.eup %5439 }
0x1934   :  { %v3046_v31 = vpop.permute.xlu0 %3045 }
0x1935   :  { %v7361_v36 = vmul.f32 %v5438_v9, %v3046_v31  ;;  %v8259_v31 = vld [vmem:[#allocation37_spill] sm:$0xff] }
0x1936   :  { %v513_v53 = vadd.f32 %v8259_v31, %v6386_v3 }
0x1937   :  { %8254 = vst [vmem:[#allocation55_spill] sm:$0xff] %v7361_v36  ;;  %5054 = vmatmul.mubr.msk.f32.vlgmr.msra.gmra.mxu0 %vm655_vm1, %v7361_v36 }
0x1938   :  { %3415 = vmatpush1.msra.mxu0 %v7080_v25  ;;  %3462 = vmatprep.mubr.f32.mxu0 %v8212_v19 }
0x1939   :  { %3416 = vmatprep.subr.mxu0 %v7087_v8 }
0x193a   :  { %3417 = vmatpush1.msra.mxu0 %v7093_v40 }
0x193b   :  { %3418 = vmatprep.subr.mxu0 %v7099_v46 }
0x193c   :  { %3419 = vmatpush1.msra.mxu0 %v7105_v37 }
0x193d   :  { %3420 = vmatprep.subr.mxu0 %v7111_v39 }
0x193e   :  { %3421 = vmatpush1.msra.mxu0 %v7117_v14 }
0x193f   :  { %3422 = vmatprep.subr.mxu0 %v7123_v22 }
0x1940   :  { %3423 = vmatpush1.msra.mxu0 %v7129_v23 }
0x1941   :  { %3424 = vmatprep.subr.mxu0 %v7135_v10 }
0x1942   :  { %3425 = vmatpush1.msra.mxu0 %v7141_v45 }
0x1943   :  { %3426 = vmatprep.subr.mxu0 %v7147_v13 }
0x1944   :  { %3427 = vmatpush1.msra.mxu0 %v7153_v57  ;;  %v3152_v2 = vpop.permute.xlu1 %3151 }
0x1945   :  { %3428 = vmatprep.subr.mxu0 %v7233_v56  ;;  %v7382_v26 = vmul.f32 %v5440_v20, %v3152_v2 }
0x1946   :  { %3429 = vmatpush1.msra.mxu0 %v7239_v44 }
0x1947   :  { %3640 = vmatprep.subr.mxu0 %v7161_v29  ;;  %8255 = vst [vmem:[#allocation57_spill] sm:$0xff] %v7382_v26  ;;  %5057 = vmatmul.mubr.msk.f32.vlgmr.msra.gmra.mxu1 %vm655_vm1, %v7382_v26 }
0x1948   :  { %3521 = vmatpush1.msra.mxu1 %v7250_v33  ;;  %3568 = vmatprep.mubr.f32.mxu1 %v8212_v19 }
0x1949   :  { %3522 = vmatprep.subr.mxu1 %v7257_v60 }
0x194a   :  { %3523 = vmatpush1.msra.mxu1 %v7263_v58 }
0x194b   :  { %3524 = vmatprep.subr.mxu1 %v7269_v38 }
0x194c   :  { %3525 = vmatpush1.msra.mxu1 %v7275_v54 }
0x194d   :  { %3526 = vmatprep.subr.mxu1 %v7281_v0 }
0x194e   :  { %3527 = vmatpush1.msra.mxu1 %v7287_v24 }
0x194f   :  { %3528 = vmatprep.subr.mxu1 %v7293_v18 }
0x1950   :  { %3529 = vmatpush1.msra.mxu1 %v7299_v21 }
0x1951   :  { %3530 = vmatprep.subr.mxu1 %v7305_v1 }
0x1952   :  { %3531 = vmatpush1.msra.mxu1 %v7311_v6 }
0x1953   :  { %3532 = vmatprep.subr.mxu1 %v7317_v4 }
0x1954   :  { %3533 = vmatpush1.msra.mxu1 %v7323_v43 }
0x1955   :  { %3534 = vmatprep.subr.mxu1 %v7329_v50 }
0x1956   :  { %3535 = vmatpush1.msra.mxu1 %v7335_v51 }
0x1957   :  { %3746 = vmatprep.subr.mxu1 %v7187_v42 }
0x19f7   :  { %v3238_v52 = vpop.f32.mrf.mxu0 }
0x19f8   :  { %v3243_v32 = vadd.f32 %v3238_v52, %v314_v5 }
0x19f9   :  { %v3240_v17 = vpop.f32.mrf.mxu0 }
0x19fa   :  { %v3244_v48 = vadd.f32 %v3240_v17, %v316_v55  ;;  %v5055_v5 = vmul.f32 -1.442695, %v3243_v32 }
0x19fc   :  { %5441 = vtanh.f32 %v3244_v48 }
0x1a07   :  { %v3344_v9 = vpop.f32.mrf.mxu1 }
0x1a08   :  { %v3349_v20 = vadd.f32 %v3344_v9, %v511_v61 }
0x1a09   :  { %v5442_v7 = vpop.eup %5441  ;;  %v3346_v2 = vpop.f32.mrf.mxu1 }
0x1a0a   :  { %3260 = vrot.lane.b32.xlu0 %v5442_v7, %s5781_s28  ;;  %v3350_v34 = vadd.f32 %v3346_v2, %v513_v53  ;;  %v5058_v35 = vmul.f32 -1.442695, %v3349_v20 }
0x1a0c   :  { %5443 = vtanh.f32 %v3350_v34 }
0x1a0d   :  { %5445 = vpow2.f32 %v5055_v5 }
0x1a0e   :  { %5447 = vpow2.f32 %v5058_v35 }
0x1a19   :  { %v5444_v36 = vpop.eup %5443 }
0x1a1a   :  { %3366 = vrot.lane.b32.xlu1 %v5444_v36, %s5781_s28  ;;  %v5446_v52 = vpop.eup %5445 }
0x1a1b   :  { %v3251_v55 = vadd.f32 1.0, %v5446_v52  ;;  %v5448_v17 = vpop.eup %5447 }
0x1a1c   :  { %v3357_v61 = vadd.f32 1.0, %v5448_v17  ;;  %v5059_v17 = vmul.f32 -1.442695, %v3350_v34 }
0x1a1d   :  { %5449 = vrcp.f32 %v3251_v55  ;;  %v5056_v55 = vmul.f32 -1.442695, %v3244_v48 }
0x1a1e   :  { %5451 = vrcp.f32 %v3357_v61 }
0x1a2a   :  { %v5450_v63 = vpop.eup %5449 }
0x1a2b   :  { %v5452_v7 = vpop.eup %5451  ;;  %v3258_v36 = vmul.f32 %v5450_v63, %v7352_v30 }
0x1a7c   :  { %v3261_v26 = vpop.permute.xlu0 %3260 }
0x1a7d   :  { %v3263_v31 = vmul.f32 %v5450_v63, %v3261_v26  ;;  %v3364_v26 = vmul.f32 %v5452_v7, %v7357_v12 }
0x1a7f   :  { %3265 = vrot.lane.b32.xlu0 %v3263_v31, %s5781_s28 }
0x1a8c   :  { %v3367_v9 = vpop.permute.xlu1 %3366 }
0x1a8d   :  { %v3369_v53 = vmul.f32 %v5452_v7, %v3367_v9 }
0x1a8f   :  { %3371 = vrot.lane.b32.xlu1 %v3369_v53, %s5781_s28 }
0x1af1   :  { %v3266_v32 = vpop.permute.xlu0 %3265 }
0x1af2   :  { %v7416_v20 = vadd.f32 %v3266_v32, %v3258_v36  ;;  %v8262_v36 = vld [vmem:[#allocation52_spill] sm:$0xff] }
0x1af3   :  { %v320_v32 = vadd.f32 %v8262_v36, %v6360_v62 }
0x1af4   :  { %5453 = vtanh.f32 %v7416_v20 }
0x1b01   :  { %v5454_v2 = vpop.eup %5453  ;;  %v3372_v5 = vpop.permute.xlu1 %3371 }
0x1b02   :  { %3271 = vrot.lane.b32.xlu0 %v5454_v2, %s5781_s28  ;;  %v7421_v52 = vadd.f32 %v3372_v5, %v3364_v26  ;;  %v8263_v26 = vld [vmem:[#allocation54_spill] sm:$0xff] }
0x1b03   :  { %v322_v5 = vadd.f32 %v8263_v26, %v6366_v28 }
0x1b04   :  { %5455 = vtanh.f32 %v7421_v52 }
0x1b05   :  { %5457 = vpow2.f32 %v5056_v55 }
0x1b06   :  { %5459 = vpow2.f32 %v5059_v17  ;;  %v8264_v17 = vld [vmem:[#allocation31_spill] sm:$0xff] }
0x1b11   :  { %v5456_v35 = vpop.eup %5455 }
0x1b12   :  { %3377 = vrot.lane.b32.xlu1 %v5456_v35, %s5781_s28  ;;  %v5458_v30 = vpop.eup %5457 }
0x1b13   :  { %v3252_v63 = vadd.f32 1.0, %v5458_v30  ;;  %v5460_v31 = vpop.eup %5459 }
0x1b14   :  { %v3358_v12 = vadd.f32 1.0, %v5460_v31 }
0x1b15   :  { %5461 = vrcp.f32 %v3252_v63  ;;  %v505_v63 = vadd.f32 %v8264_v17, %v6383_v11 }
0x1b16   :  { %5463 = vrcp.f32 %v3358_v12 }
0x1b22   :  { %v5462_v61 = vpop.eup %5461 }
0x1b23   :  { %v5464_v48 = vpop.eup %5463 }
0x1b74   :  { %v3272_v9 = vpop.permute.xlu0 %3271 }
0x1b75   :  { %v7425_v53 = vmul.f32 %v5462_v61, %v3272_v9  ;;  %v8265_v9 = vld [vmem:[#allocation33_spill] sm:$0xff] }
0x1b76   :  { %v507_v12 = vadd.f32 %v8265_v9, %v6386_v3 }
0x1b77   :  { %8260 = vst [vmem:[#allocation32_spill] sm:$0xff] %v7425_v53  ;;  %5060 = vmatmul.mubr.msk.f32.vlgmr.msra.gmra.mxu0 %vm655_vm1, %v7425_v53 }
0x1b78   :  { %3641 = vmatpush1.msra.mxu0 %v7080_v25  ;;  %3688 = vmatprep.mubr.f32.mxu0 %v8212_v19 }
0x1b79   :  { %3642 = vmatprep.subr.mxu0 %v7087_v8 }
0x1b7a   :  { %3643 = vmatpush1.msra.mxu0 %v7093_v40 }
0x1b7b   :  { %3644 = vmatprep.subr.mxu0 %v7099_v46 }
0x1b7c   :  { %3645 = vmatpush1.msra.mxu0 %v7105_v37 }
0x1b7d   :  { %3646 = vmatprep.subr.mxu0 %v7111_v39 }
0x1b7e   :  { %3647 = vmatpush1.msra.mxu0 %v7117_v14 }
0x1b7f   :  { %3648 = vmatprep.subr.mxu0 %v7123_v22 }
0x1b80   :  { %3649 = vmatpush1.msra.mxu0 %v7129_v23 }
0x1b81   :  { %3650 = vmatprep.subr.mxu0 %v7135_v10 }
0x1b82   :  { %3651 = vmatpush1.msra.mxu0 %v7141_v45 }
0x1b83   :  { %3652 = vmatprep.subr.mxu0 %v7147_v13 }
0x1b84   :  { %3653 = vmatpush1.msra.mxu0 %v7153_v57  ;;  %v3378_v34 = vpop.permute.xlu1 %3377 }
0x1b85   :  { %3654 = vmatprep.subr.mxu0 %v7233_v56  ;;  %v7446_v7 = vmul.f32 %v5464_v48, %v3378_v34 }
0x1b86   :  { %3655 = vmatpush1.msra.mxu0 %v7239_v44 }
0x1b87   :  { %3866 = vmatprep.subr.mxu0 %v7161_v29  ;;  %8261 = vst [vmem:[#allocation34_spill] sm:$0xff] %v7446_v7  ;;  %5063 = vmatmul.mubr.msk.f32.vlgmr.msra.gmra.mxu1 %vm655_vm1, %v7446_v7 }
0x1b88   :  { %3747 = vmatpush1.msra.mxu1 %v7250_v33  ;;  %3794 = vmatprep.mubr.f32.mxu1 %v8212_v19 }
0x1b89   :  { %3748 = vmatprep.subr.mxu1 %v7257_v60 }
0x1b8a   :  { %3749 = vmatpush1.msra.mxu1 %v7263_v58 }
0x1b8b   :  { %3750 = vmatprep.subr.mxu1 %v7269_v38 }
0x1b8c   :  { %3751 = vmatpush1.msra.mxu1 %v7275_v54 }
0x1b8d   :  { %3752 = vmatprep.subr.mxu1 %v7281_v0 }
0x1b8e   :  { %3753 = vmatpush1.msra.mxu1 %v7287_v24 }
0x1b8f   :  { %3754 = vmatprep.subr.mxu1 %v7293_v18 }
0x1b90   :  { %3755 = vmatpush1.msra.mxu1 %v7299_v21 }
0x1b91   :  { %3756 = vmatprep.subr.mxu1 %v7305_v1 }
0x1b92   :  { %3757 = vmatpush1.msra.mxu1 %v7311_v6 }
0x1b93   :  { %3758 = vmatprep.subr.mxu1 %v7317_v4 }
0x1b94   :  { %3759 = vmatpush1.msra.mxu1 %v7323_v43 }
0x1b95   :  { %3760 = vmatprep.subr.mxu1 %v7329_v50 }
0x1b96   :  { %3761 = vmatpush1.msra.mxu1 %v7335_v51 }
0x1b97   :  { %3972 = vmatprep.subr.mxu1 %v7187_v42 }
0x1c37   :  { %v3464_v2 = vpop.f32.mrf.mxu0 }
0x1c38   :  { %v3469_v35 = vadd.f32 %v3464_v2, %v320_v32 }
0x1c39   :  { %v3466_v55 = vpop.f32.mrf.mxu0 }
0x1c3a   :  { %v3470_v30 = vadd.f32 %v3466_v55, %v322_v5  ;;  %v5061_v32 = vmul.f32 -1.442695, %v3469_v35 }
0x1c3c   :  { %5465 = vtanh.f32 %v3470_v30 }
0x1c47   :  { %v3570_v61 = vpop.f32.mrf.mxu1 }
0x1c48   :  { %v3575_v48 = vadd.f32 %v3570_v61, %v505_v63 }
0x1c49   :  { %v5466_v31 = vpop.eup %5465  ;;  %v3572_v34 = vpop.f32.mrf.mxu1 }
0x1c4a   :  { %3486 = vrot.lane.b32.xlu0 %v5466_v31, %s5781_s28  ;;  %v3576_v36 = vadd.f32 %v3572_v34, %v507_v12  ;;  %v5064_v26 = vmul.f32 -1.442695, %v3575_v48 }
0x1c4c   :  { %5467 = vtanh.f32 %v3576_v36 }
0x1c4d   :  { %5469 = vpow2.f32 %v5061_v32 }
0x1c4e   :  { %5471 = vpow2.f32 %v5064_v26 }
0x1c59   :  { %v5468_v53 = vpop.eup %5467 }
0x1c5a   :  { %3592 = vrot.lane.b32.xlu1 %v5468_v53, %s5781_s28  ;;  %v5470_v2 = vpop.eup %5469 }
0x1c5b   :  { %v3477_v5 = vadd.f32 1.0, %v5470_v2  ;;  %v5472_v55 = vpop.eup %5471 }
0x1c5c   :  { %v3583_v63 = vadd.f32 1.0, %v5472_v55  ;;  %v5065_v55 = vmul.f32 -1.442695, %v3576_v36 }
0x1c5d   :  { %5473 = vrcp.f32 %v3477_v5  ;;  %v5062_v5 = vmul.f32 -1.442695, %v3470_v30 }
0x1c5e   :  { %5475 = vrcp.f32 %v3583_v63 }
0x1c6a   :  { %v5474_v17 = vpop.eup %5473 }
0x1c6b   :  { %v5476_v31 = vpop.eup %5475  ;;  %v3484_v53 = vmul.f32 %v5474_v17, %v7416_v20 }
0x1cbc   :  { %v3487_v7 = vpop.permute.xlu0 %3486 }
0x1cbd   :  { %v3489_v9 = vmul.f32 %v5474_v17, %v3487_v7  ;;  %v3590_v7 = vmul.f32 %v5476_v31, %v7421_v52 }
0x1cbf   :  { %3491 = vrot.lane.b32.xlu0 %v3489_v9, %s5781_s28 }
0x1ccc   :  { %v3593_v61 = vpop.permute.xlu1 %3592 }
0x1ccd   :  { %v3595_v12 = vmul.f32 %v5476_v31, %v3593_v61 }
0x1ccf   :  { %3597 = vrot.lane.b32.xlu1 %v3595_v12, %s5781_s28 }
0x1d31   :  { %v3492_v35 = vpop.permute.xlu0 %3491 }
0x1d32   :  { %v7480_v48 = vadd.f32 %v3492_v35, %v3484_v53  ;;  %v8268_v53 = vld [vmem:[#allocation56_spill] sm:$0xff] }
0x1d33   :  { %v326_v35 = vadd.f32 %v8268_v53, %v6360_v62 }
0x1d34   :  { %5477 = vtanh.f32 %v7480_v48 }
0x1d41   :  { %v5478_v34 = vpop.eup %5477  ;;  %v3598_v32 = vpop.permute.xlu1 %3597 }
0x1d42   :  { %3497 = vrot.lane.b32.xlu0 %v5478_v34, %s5781_s28  ;;  %v7485_v2 = vadd.f32 %v3598_v32, %v3590_v7  ;;  %v8269_v7 = vld [vmem:[#allocation58_spill] sm:$0xff] }
0x1d43   :  { %v328_v32 = vadd.f32 %v8269_v7, %v6366_v28 }
0x1d44   :  { %5479 = vtanh.f32 %v7485_v2 }
0x1d45   :  { %5481 = vpow2.f32 %v5062_v5 }
0x1d46   :  { %5483 = vpow2.f32 %v5065_v55  ;;  %v8270_v55 = vld [vmem:[#allocation27_spill] sm:$0xff] }
0x1d51   :  { %v5480_v26 = vpop.eup %5479 }
0x1d52   :  { %3603 = vrot.lane.b32.xlu1 %v5480_v26, %s5781_s28  ;;  %v5482_v20 = vpop.eup %5481 }
0x1d53   :  { %v3478_v17 = vadd.f32 1.0, %v5482_v20  ;;  %v5484_v9 = vpop.eup %5483 }
0x1d54   :  { %v3584_v52 = vadd.f32 1.0, %v5484_v9 }
0x1d55   :  { %5485 = vrcp.f32 %v3478_v17  ;;  %v499_v17 = vadd.f32 %v8270_v55, %v6383_v11 }
0x1d56   :  { %5487 = vrcp.f32 %v3584_v52 }
0x1d62   :  { %v5486_v63 = vpop.eup %5485 }
0x1d63   :  { %v5488_v30 = vpop.eup %5487 }
0x1db4   :  { %v3498_v61 = vpop.permute.xlu0 %3497 }
0x1db5   :  { %v7489_v12 = vmul.f32 %v5486_v63, %v3498_v61  ;;  %v8271_v61 = vld [vmem:[#allocation29_spill] sm:$0xff] }
0x1db6   :  { %v501_v52 = vadd.f32 %v8271_v61, %v6386_v3 }
0x1db7   :  { %8266 = vst [vmem:[#allocation51_spill] sm:$0xff] %v7489_v12  ;;  %5066 = vmatmul.mubr.msk.f32.vlgmr.msra.gmra.mxu0 %vm655_vm1, %v7489_v12 }
0x1db8   :  { %3867 = vmatpush1.msra.mxu0 %v7080_v25  ;;  %3914 = vmatprep.mubr.f32.mxu0 %v8212_v19 }
0x1db9   :  { %3868 = vmatprep.subr.mxu0 %v7087_v8 }
0x1dba   :  { %3869 = vmatpush1.msra.mxu0 %v7093_v40 }
0x1dbb   :  { %3870 = vmatprep.subr.mxu0 %v7099_v46 }
0x1dbc   :  { %3871 = vmatpush1.msra.mxu0 %v7105_v37 }
0x1dbd   :  { %3872 = vmatprep.subr.mxu0 %v7111_v39 }
0x1dbe   :  { %3873 = vmatpush1.msra.mxu0 %v7117_v14 }
0x1dbf   :  { %3874 = vmatprep.subr.mxu0 %v7123_v22 }
0x1dc0   :  { %3875 = vmatpush1.msra.mxu0 %v7129_v23 }
0x1dc1   :  { %3876 = vmatprep.subr.mxu0 %v7135_v10 }
0x1dc2   :  { %3877 = vmatpush1.msra.mxu0 %v7141_v45 }
0x1dc3   :  { %3878 = vmatprep.subr.mxu0 %v7147_v13 }
0x1dc4   :  { %3879 = vmatpush1.msra.mxu0 %v7153_v57  ;;  %v3604_v36 = vpop.permute.xlu1 %3603 }
0x1dc5   :  { %3880 = vmatprep.subr.mxu0 %v7233_v56  ;;  %v7510_v31 = vmul.f32 %v5488_v30, %v3604_v36 }
0x1dc6   :  { %3881 = vmatpush1.msra.mxu0 %v7239_v44 }
0x1dc7   :  { %4092 = vmatprep.subr.mxu0 %v7161_v29  ;;  %8267 = vst [vmem:[#allocation53_spill] sm:$0xff] %v7510_v31  ;;  %5069 = vmatmul.mubr.msk.f32.vlgmr.msra.gmra.mxu1 %vm655_vm1, %v7510_v31 }
0x1dc8   :  { %3973 = vmatpush1.msra.mxu1 %v7250_v33  ;;  %4020 = vmatprep.mubr.f32.mxu1 %v8212_v19 }
0x1dc9   :  { %3974 = vmatprep.subr.mxu1 %v7257_v60 }
0x1dca   :  { %3975 = vmatpush1.msra.mxu1 %v7263_v58 }
0x1dcb   :  { %3976 = vmatprep.subr.mxu1 %v7269_v38 }
0x1dcc   :  { %3977 = vmatpush1.msra.mxu1 %v7275_v54 }
0x1dcd   :  { %3978 = vmatprep.subr.mxu1 %v7281_v0 }
0x1dce   :  { %3979 = vmatpush1.msra.mxu1 %v7287_v24 }
0x1dcf   :  { %3980 = vmatprep.subr.mxu1 %v7293_v18 }
0x1dd0   :  { %3981 = vmatpush1.msra.mxu1 %v7299_v21 }
0x1dd1   :  { %3982 = vmatprep.subr.mxu1 %v7305_v1 }
0x1dd2   :  { %3983 = vmatpush1.msra.mxu1 %v7311_v6 }
0x1dd3   :  { %3984 = vmatprep.subr.mxu1 %v7317_v4 }
0x1dd4   :  { %3985 = vmatpush1.msra.mxu1 %v7323_v43 }
0x1dd5   :  { %3986 = vmatprep.subr.mxu1 %v7329_v50 }
0x1dd6   :  { %3987 = vmatpush1.msra.mxu1 %v7335_v51 }
0x1dd7   :  { %4198 = vmatprep.subr.mxu1 %v7187_v42 }
0x1e77   :  { %v3690_v34 = vpop.f32.mrf.mxu0 }
0x1e78   :  { %v3695_v26 = vadd.f32 %v3690_v34, %v326_v35 }
0x1e79   :  { %v3692_v5 = vpop.f32.mrf.mxu0 }
0x1e7a   :  { %v3696_v20 = vadd.f32 %v3692_v5, %v328_v32  ;;  %v5067_v35 = vmul.f32 -1.442695, %v3695_v26 }
0x1e7c   :  { %5489 = vtanh.f32 %v3696_v20 }
0x1e87   :  { %v3796_v63 = vpop.f32.mrf.mxu1 }
0x1e88   :  { %v3801_v30 = vadd.f32 %v3796_v63, %v499_v17 }
0x1e89   :  { %v5490_v9 = vpop.eup %5489  ;;  %v3798_v36 = vpop.f32.mrf.mxu1 }
0x1e8a   :  { %3712 = vrot.lane.b32.xlu0 %v5490_v9, %s5781_s28  ;;  %v3802_v53 = vadd.f32 %v3798_v36, %v501_v52  ;;  %v5070_v7 = vmul.f32 -1.442695, %v3801_v30 }
0x1e8c   :  { %5491 = vtanh.f32 %v3802_v53 }
0x1e8d   :  { %5493 = vpow2.f32 %v5067_v35 }
0x1e8e   :  { %5495 = vpow2.f32 %v5070_v7 }
0x1e99   :  { %v5492_v12 = vpop.eup %5491 }
0x1e9a   :  { %3818 = vrot.lane.b32.xlu1 %v5492_v12, %s5781_s28  ;;  %v5494_v34 = vpop.eup %5493 }
0x1e9b   :  { %v3703_v32 = vadd.f32 1.0, %v5494_v34  ;;  %v5496_v5 = vpop.eup %5495 }
0x1e9c   :  { %v3809_v17 = vadd.f32 1.0, %v5496_v5  ;;  %v5071_v5 = vmul.f32 -1.442695, %v3802_v53  ;;  %v8275_v53 = vld [vmem:[#allocation25_spill] sm:$0xff] }
0x1e9d   :  { %5497 = vrcp.f32 %v3703_v32  ;;  %v5068_v32 = vmul.f32 -1.442695, %v3696_v20 }
0x1e9e   :  { %5499 = vrcp.f32 %v3809_v17 }
0x1eaa   :  { %v5498_v55 = vpop.eup %5497 }
0x1eab   :  { %v5500_v9 = vpop.eup %5499  ;;  %v3710_v12 = vmul.f32 %v5498_v55, %v7480_v48 }
0x1efc   :  { %v3713_v31 = vpop.permute.xlu0 %3712 }
0x1efd   :  { %v3715_v61 = vmul.f32 %v5498_v55, %v3713_v31  ;;  %v3816_v31 = vmul.f32 %v5500_v9, %v7485_v2 }
0x1eff   :  { %3717 = vrot.lane.b32.xlu0 %v3715_v61, %s5781_s28 }
0x1f0c   :  { %v3819_v63 = vpop.permute.xlu1 %3818 }
0x1f0d   :  { %v3821_v52 = vmul.f32 %v5500_v9, %v3819_v63  ;;  %v495_v9 = vadd.f32 %v8275_v53, %v6386_v3 }
0x1f0f   :  { %3823 = vrot.lane.b32.xlu1 %v3821_v52, %s5781_s28 }
0x1f71   :  { %v3718_v26 = vpop.permute.xlu0 %3717 }
0x1f72   :  { %v7544_v30 = vadd.f32 %v3718_v26, %v3710_v12 }
0x1f74   :  { %5501 = vtanh.f32 %v7544_v30 }
0x1f81   :  { %v5502_v36 = vpop.eup %5501  ;;  %v3824_v35 = vpop.permute.xlu1 %3823 }
0x1f82   :  { %3723 = vrot.lane.b32.xlu0 %v5502_v36, %s5781_s28  ;;  %v7549_v34 = vadd.f32 %v3824_v35, %v3816_v31 }
0x1f84   :  { %5503 = vtanh.f32 %v7549_v34 }
0x1f85   :  { %5505 = vpow2.f32 %v5068_v32 }
0x1f86   :  { %5507 = vpow2.f32 %v5071_v5 }
0x1f91   :  { %v5504_v7 = vpop.eup %5503 }
0x1f92   :  { %3829 = vrot.lane.b32.xlu1 %v5504_v7, %s5781_s28  ;;  %v5506_v48 = vpop.eup %5505 }
0x1f93   :  { %v3704_v55 = vadd.f32 1.0, %v5506_v48  ;;  %v5508_v61 = vpop.eup %5507 }
0x1f94   :  { %v3810_v2 = vadd.f32 1.0, %v5508_v61 }
0x1f95   :  { %5509 = vrcp.f32 %v3704_v55 }
0x1f96   :  { %5511 = vrcp.f32 %v3810_v2 }
0x1fa2   :  { %v5510_v17 = vpop.eup %5509 }
0x1ff4   :  { %v3724_v63 = vpop.permute.xlu0 %3723 }
0x1ff5   :  { %v7553_v52 = vmul.f32 %v5510_v17, %v3724_v63 }
0x1ff7   :  { %5072 = vmatmul.mubr.msk.f32.vlgmr.msra.gmra.mxu0 %vm655_vm1, %v7553_v52 }
0x1ff8   :  { %4093 = vmatpush1.msra.mxu0 %v7080_v25  ;;  %4140 = vmatprep.mubr.f32.mxu0 %v8212_v19  ;;  %v5512_v25 = vpop.eup %5511 }
0x1ff9   :  { %4094 = vmatprep.subr.mxu0 %v7087_v8 }
0x1ffa   :  { %4095 = vmatpush1.msra.mxu0 %v7093_v40 }
0x1ffb   :  { %4096 = vmatprep.subr.mxu0 %v7099_v46  ;;  %v8272_v46 = vld [vmem:[#allocation60_spill] sm:$0xff] }
0x1ffc   :  { %4097 = vmatpush1.msra.mxu0 %v7105_v37  ;;  %v332_v37 = vadd.f32 %v8272_v46, %v6360_v62 }
0x1ffd   :  { %4098 = vmatprep.subr.mxu0 %v7111_v39 }
0x1ffe   :  { %4099 = vmatpush1.msra.mxu0 %v7117_v14  ;;  %v8273_v14 = vld [vmem:[#allocation62_spill] sm:$0xff] }
0x1fff   :  { %4100 = vmatprep.subr.mxu0 %v7123_v22  ;;  %v334_v22 = vadd.f32 %v8273_v14, %v6366_v28 }
0x2000   :  { %4101 = vmatpush1.msra.mxu0 %v7129_v23 }
0x2001   :  { %4102 = vmatprep.subr.mxu0 %v7135_v10 }
0x2002   :  { %4103 = vmatpush1.msra.mxu0 %v7141_v45 }
0x2003   :  { %4104 = vmatprep.subr.mxu0 %v7147_v13  ;;  %v8274_v13 = vld [vmem:[#allocation23_spill] sm:$0xff] }
0x2004   :  { %4105 = vmatpush1.msra.mxu0 %v7153_v57  ;;  %v3830_v8 = vpop.permute.xlu1 %3829  ;;  %v493_v57 = vadd.f32 %v8274_v13, %v6383_v11 }
0x2005   :  { %4106 = vmatprep.subr.mxu0 %v7233_v56  ;;  %v7574_v40 = vmul.f32 %v5512_v25, %v3830_v8 }
0x2006   :  { %4107 = vmatpush1.msra.mxu0 %v7239_v44 }
0x2007   :  { %4318 = vmatprep.subr.mxu0 %v7161_v29  ;;  %5075 = vmatmul.mubr.msk.f32.vlgmr.msra.gmra.mxu1 %vm655_vm1, %v7574_v40 }
0x2008   :  { %4199 = vmatpush1.msra.mxu1 %v7250_v33  ;;  %4246 = vmatprep.mubr.f32.mxu1 %v8212_v19 }
0x2009   :  { %4200 = vmatprep.subr.mxu1 %v7257_v60 }
0x200a   :  { %4201 = vmatpush1.msra.mxu1 %v7263_v58 }
0x200b   :  { %4202 = vmatprep.subr.mxu1 %v7269_v38 }
0x200c   :  { %4203 = vmatpush1.msra.mxu1 %v7275_v54 }
0x200d   :  { %4204 = vmatprep.subr.mxu1 %v7281_v0 }
0x200e   :  { %4205 = vmatpush1.msra.mxu1 %v7287_v24 }
0x200f   :  { %4206 = vmatprep.subr.mxu1 %v7293_v18 }
0x2010   :  { %4207 = vmatpush1.msra.mxu1 %v7299_v21 }
0x2011   :  { %4208 = vmatprep.subr.mxu1 %v7305_v1 }
0x2012   :  { %4209 = vmatpush1.msra.mxu1 %v7311_v6 }
0x2013   :  { %4210 = vmatprep.subr.mxu1 %v7317_v4 }
0x2014   :  { %4211 = vmatpush1.msra.mxu1 %v7323_v43 }
0x2015   :  { %4212 = vmatprep.subr.mxu1 %v7329_v50 }
0x2016   :  { %4213 = vmatpush1.msra.mxu1 %v7335_v51 }
0x2017   :  { %4424 = vmatprep.subr.mxu1 %v7187_v42 }
0x20b7   :  { %v3916_v39 = vpop.f32.mrf.mxu0 }
0x20b8   :  { %v3921_v23 = vadd.f32 %v3916_v39, %v332_v37 }
0x20b9   :  { %v3918_v10 = vpop.f32.mrf.mxu0 }
0x20ba   :  { %v3922_v45 = vadd.f32 %v3918_v10, %v334_v22  ;;  %v5073_v31 = vmul.f32 -1.442695, %v3921_v23 }
0x20bc   :  { %5513 = vtanh.f32 %v3922_v45  ;;  %v5074_v13 = vmul.f32 -1.442695, %v3922_v45  ;;  %v7631_v45 = vld [vmem:[%s8117_s2 + $0x68] sm:$0xff] }
0x20c7   :  { %v4022_v20 = vpop.f32.mrf.mxu1 }
0x20c8   :  { %v4027_v42 = vadd.f32 %v4022_v20, %v493_v57 }
0x20c9   :  { %v5514_v29 = vpop.eup %5513  ;;  %v4024_v12 = vpop.f32.mrf.mxu1 }
0x20ca   :  { %3938 = vrot.lane.b32.xlu0 %v5514_v29, %s5781_s28  ;;  %v4028_v26 = vadd.f32 %v4024_v12, %v495_v9  ;;  %v5076_v7 = vmul.f32 -1.442695, %v4027_v42  ;;  %v7624_v12 = vld [vmem:[%s8117_s2 + $0x70] sm:$0xff] }
0x20cc   :  { %5515 = vtanh.f32 %v4028_v26  ;;  %v5077_v57 = vmul.f32 -1.442695, %v4028_v26  ;;  %v7637_v26 = vld [vmem:[%s8117_s2 + $0x60] sm:$0xff] }
0x20cd   :  { %5517 = vpow2.f32 %v5073_v31  ;;  %v7649_v31 = vld [vmem:[%s8117_s2 + $0x50] sm:$0xff] }
0x20ce   :  { %5519 = vpow2.f32 %v5076_v7  ;;  %v7661_v7 = vld [vmem:[%s8117_s2 + $0x40] sm:$0xff] }
0x20d9   :  { %v5516_v36 = vpop.eup %5515 }
0x20da   :  { %4044 = vrot.lane.b32.xlu1 %v5516_v36, %s5781_s28  ;;  %v5518_v35 = vpop.eup %5517  ;;  %v7643_v36 = vld [vmem:[%s8117_s2 + $0x58] sm:$0xff] }
0x20db   :  { %v3929_v32 = vadd.f32 1.0, %v5518_v35  ;;  %v5520_v48 = vpop.eup %5519  ;;  %v7655_v35 = vld [vmem:[%s8117_s2 + $0x48] sm:$0xff] }
0x20dc   :  { %v4035_v17 = vadd.f32 1.0, %v5520_v48  ;;  %v7673_v48 = vld [vmem:[%s8117_s2 + $0x30] sm:$0xff] }
0x20dd   :  { %5521 = vrcp.f32 %v3929_v32  ;;  %v7667_v32 = vld [vmem:[%s8117_s2 + $0x38] sm:$0xff] }
0x20de   :  { %5523 = vrcp.f32 %v4035_v17  ;;  %v7697_v17 = vld [vmem:[%s8117_s2 + $0x10] sm:$0xff] }
0x20ea   :  { %v5522_v5 = vpop.eup %5521 }
0x20eb   :  { %v5524_v63 = vpop.eup %5523  ;;  %v3936_v8 = vmul.f32 %v5522_v5, %v7544_v30 }
0x20ec   :  { %v4042_v14 = vmul.f32 %v5524_v63, %v7549_v34 }
0x213c   :  { %v3939_v55 = vpop.permute.xlu0 %3938 }
0x213d   :  { %v3941_v61 = vmul.f32 %v5522_v5, %v3939_v55  ;;  %v7679_v5 = vld [vmem:[%s8117_s2 + $0x28] sm:$0xff]  ;;  %v7685_v55 = vld [vmem:[%s8117_s2 + $0x20] sm:$0xff] }
0x213f   :  { %3943 = vrot.lane.b32.xlu0 %v3941_v61, %s5781_s28  ;;  %v7691_v61 = vld [vmem:[%s8117_s2 + $0x18] sm:$0xff] }
0x214c   :  { %v4045_v2 = vpop.permute.xlu1 %4044 }
0x214d   :  { %v4047_v25 = vmul.f32 %v5524_v63, %v4045_v2 }
0x214f   :  { %4049 = vrot.lane.b32.xlu1 %v4047_v25, %s5781_s28  ;;  %v5692_v25 = vld [vmem:[%s8117_s2 + $0x78] sm:$0xff] }
0x21b1   :  { %v3944_v46 = vpop.permute.xlu0 %3943 }
0x21b2   :  { %v7608_v37 = vadd.f32 %v3944_v46, %v3936_v8 }
0x21b4   :  { %5525 = vtanh.f32 %v7608_v37 }
0x21c1   :  { %v5526_v39 = vpop.eup %5525  ;;  %v4050_v22 = vpop.permute.xlu1 %4049 }
0x21c2   :  { %3949 = vrot.lane.b32.xlu0 %v5526_v39, %s5781_s28  ;;  %v7613_v23 = vadd.f32 %v4050_v22, %v4042_v14 }
0x21c4   :  { %5527 = vtanh.f32 %v7613_v23 }
0x21c5   :  { %5529 = vpow2.f32 %v5074_v13 }
0x21c6   :  { %5531 = vpow2.f32 %v5077_v57 }
0x21d1   :  { %v5528_v10 = vpop.eup %5527 }
0x21d2   :  { %4055 = vrot.lane.b32.xlu1 %v5528_v10, %s5781_s28  ;;  %v5530_v30 = vpop.eup %5529 }
0x21d3   :  { %v3930_v29 = vadd.f32 1.0, %v5530_v30  ;;  %v5532_v20 = vpop.eup %5531 }
0x21d4   :  { %v4036_v34 = vadd.f32 1.0, %v5532_v20 }
0x21d5   :  { %5533 = vrcp.f32 %v3930_v29 }
0x21d6   :  { %5535 = vrcp.f32 %v4036_v34 }
0x21e2   :  { %v5534_v53 = vpop.eup %5533 }
0x21e3   :  { %v5536_v63 = vpop.eup %5535 }
0x2234   :  { %v3950_v9 = vpop.permute.xlu0 %3949 }
0x2235   :  { %v7617_v42 = vmul.f32 %v5534_v53, %v3950_v9 }
0x2237   :  { %5078 = vmatmul.mubr.msk.f32.vlgmr.msra.gmra.mxu0 %vm655_vm1, %v7617_v42 }
0x2238   :  { %4319 = vmatpush1.msra.mxu0 %v7624_v12  ;;  %4366 = vmatprep.mubr.f32.mxu0 %v8212_v19 }
0x2239   :  { %4320 = vmatprep.subr.mxu0 %v7631_v45 }
0x223a   :  { %4321 = vmatpush1.msra.mxu0 %v7637_v26 }
0x223b   :  { %4322 = vmatprep.subr.mxu0 %v7643_v36 }
0x223c   :  { %4323 = vmatpush1.msra.mxu0 %v7649_v31 }
0x223d   :  { %4324 = vmatprep.subr.mxu0 %v7655_v35 }
0x223e   :  { %4325 = vmatpush1.msra.mxu0 %v7661_v7 }
0x223f   :  { %4326 = vmatprep.subr.mxu0 %v7667_v32 }
0x2240   :  { %4327 = vmatpush1.msra.mxu0 %v7673_v48 }
0x2241   :  { %4328 = vmatprep.subr.mxu0 %v7679_v5 }
0x2242   :  { %4329 = vmatpush1.msra.mxu0 %v7685_v55 }
0x2243   :  { %4330 = vmatprep.subr.mxu0 %v7691_v61 }
0x2244   :  { %4331 = vmatpush1.msra.mxu0 %v7697_v17  ;;  %v4056_v2 = vpop.permute.xlu1 %4055 }
0x2245   :  { %4332 = vmatprep.subr.mxu0 %v7233_v56  ;;  %v7705_v8 = vmul.f32 %v5536_v63, %v4056_v2  ;;  %v5693_v56 = vld [vmem:[%s8120_s5 + $0x78] sm:$0xff] }
0x2246   :  { %4333 = vmatpush1.msra.mxu0 %v7239_v44  ;;  %v8276_v44 = vld [vmem:[#allocation64_spill] sm:$0xff] }
0x2247   :  { %4544 = vmatprep.subr.mxu0 %v5692_v25  ;;  %5081 = vmatmul.mubr.msk.f32.vlgmr.msra.gmra.mxu1 %vm655_vm1, %v7705_v8 }
0x2248   :  { %4425 = vmatpush1.msra.mxu1 %v7250_v33  ;;  %4472 = vmatprep.mubr.f32.mxu1 %v8212_v19  ;;  %v338_v33 = vadd.f32 %v8276_v44, %v6360_v62 }
0x2249   :  { %4426 = vmatprep.subr.mxu1 %v7257_v60 }
0x224a   :  { %4427 = vmatpush1.msra.mxu1 %v7263_v58  ;;  %v8277_v58 = vld [vmem:[#allocation66_spill] sm:$0xff] }
0x224b   :  { %4428 = vmatprep.subr.mxu1 %v7269_v38  ;;  %v340_v38 = vadd.f32 %v8277_v58, %v6366_v28 }
0x224c   :  { %4429 = vmatpush1.msra.mxu1 %v7275_v54 }
0x224d   :  { %4430 = vmatprep.subr.mxu1 %v7281_v0 }
0x224e   :  { %4431 = vmatpush1.msra.mxu1 %v7287_v24 }
0x224f   :  { %4432 = vmatprep.subr.mxu1 %v7293_v18  ;;  %v8278_v18 = vld [vmem:[#allocation19_spill] sm:$0xff] }
0x2250   :  { %4433 = vmatpush1.msra.mxu1 %v7299_v21  ;;  %v487_v21 = vadd.f32 %v8278_v18, %v6383_v11 }
0x2251   :  { %4434 = vmatprep.subr.mxu1 %v7305_v1 }
0x2252   :  { %4435 = vmatpush1.msra.mxu1 %v7311_v6 }
0x2253   :  { %4436 = vmatprep.subr.mxu1 %v7317_v4  ;;  %v8279_v4 = vld [vmem:[#allocation21_spill] sm:$0xff] }
0x2254   :  { %4437 = vmatpush1.msra.mxu1 %v7323_v43  ;;  %v489_v43 = vadd.f32 %v8279_v4, %v6386_v3 }
0x2255   :  { %4438 = vmatprep.subr.mxu1 %v7329_v50 }
0x2256   :  { %4439 = vmatpush1.msra.mxu1 %v7335_v51 }
0x2257   :  { %4650 = vmatprep.subr.mxu1 %v5693_v56 }
0x22f7   :  { %v4142_v60 = vpop.f32.mrf.mxu0 }
0x22f8   :  { %v4147_v54 = vadd.f32 %v4142_v60, %v338_v33 }
0x22f9   :  { %v4144_v0 = vpop.f32.mrf.mxu0 }
0x22fa   :  { %v4148_v24 = vadd.f32 %v4144_v0, %v340_v38  ;;  %v5079_v14 = vmul.f32 -1.442695, %v4147_v54 }
0x22fc   :  { %5537 = vtanh.f32 %v4148_v24  ;;  %v5080_v54 = vmul.f32 -1.442695, %v4148_v24  ;;  %v5704_v24 = vld [vmem:[%s8120_s5 + $0x30] sm:$0xff] }
0x2307   :  { %v4248_v6 = vpop.f32.mrf.mxu1 }
0x2308   :  { %v4253_v50 = vadd.f32 %v4248_v6, %v487_v21 }
0x2309   :  { %v5538_v1 = vpop.eup %5537  ;;  %v4250_v51 = vpop.f32.mrf.mxu1 }
0x230a   :  { %4164 = vrot.lane.b32.xlu0 %v5538_v1, %s5781_s28  ;;  %v4254_v46 = vadd.f32 %v4250_v51, %v489_v43  ;;  %v5082_v10 = vmul.f32 -1.442695, %v4253_v50  ;;  %v5705_v43 = vld [vmem:[%s8120_s5 + $0x28] sm:$0xff]  ;;  %v5706_v50 = vld [vmem:[%s8120_s5 + $0x20] sm:$0xff]  ;;  %v5707_v51 = vld [vmem:[%s8120_s5 + $0x18] sm:$0xff] }
0x230c   :  { %5539 = vtanh.f32 %v4254_v46  ;;  %v5083_v0 = vmul.f32 -1.442695, %v4254_v46  ;;  %v5708_v46 = vld [vmem:[%s8120_s5 + $0x10] sm:$0xff] }
0x230d   :  { %5541 = vpow2.f32 %v5079_v14  ;;  %v5710_v14 = vld [vmem:[%s8120_s5] sm:$0xff] }
0x230e   :  { %5543 = vpow2.f32 %v5082_v10 }
0x2319   :  { %v5540_v39 = vpop.eup %5539 }
0x231a   :  { %4270 = vrot.lane.b32.xlu1 %v5540_v39, %s5781_s28  ;;  %v5542_v22 = vpop.eup %5541  ;;  %v5709_v39 = vld [vmem:[%s8120_s5 + $0x8] sm:$0xff] }
0x231b   :  { %v4155_v13 = vadd.f32 1.0, %v5542_v22  ;;  %v5544_v30 = vpop.eup %5543  ;;  %v8280_v22 = vld [vmem:[#allocation67_spill] sm:$0xff] }
0x231c   :  { %v4261_v53 = vadd.f32 1.0, %v5544_v30  ;;  %v344_v10 = vadd.f32 %v8280_v22, %v6360_v62  ;;  %v8281_v30 = vld [vmem:[#allocation69_spill] sm:$0xff] }
0x231d   :  { %5545 = vrcp.f32 %v4155_v13 }
0x231e   :  { %5547 = vrcp.f32 %v4261_v53 }
0x232a   :  { %v5546_v57 = vpop.eup %5545 }
0x232b   :  { %v5548_v9 = vpop.eup %5547  ;;  %v4162_v2 = vmul.f32 %v5546_v57, %v7608_v37 }
0x232c   :  { %v4268_v33 = vmul.f32 %v5548_v9, %v7613_v23 }
0x237c   :  { %v4165_v29 = vpop.permute.xlu0 %4164 }
0x237d   :  { %v4167_v20 = vmul.f32 %v5546_v57, %v4165_v29  ;;  %v346_v57 = vadd.f32 %v8281_v30, %v6366_v28 }
0x237f   :  { %4169 = vrot.lane.b32.xlu0 %v4167_v20, %s5781_s28 }
0x238c   :  { %v4271_v34 = vpop.permute.xlu1 %4270 }
0x238d   :  { %v4273_v63 = vmul.f32 %v5548_v9, %v4271_v34  ;;  %v8282_v9 = vld [vmem:[#allocation17_spill] sm:$0xff] }
0x238e   :  { %v481_v34 = vadd.f32 %v8282_v9, %v6383_v11 }
0x238f   :  { %4275 = vrot.lane.b32.xlu1 %v4273_v63, %s5781_s28 }
0x23f1   :  { %v4170_v25 = vpop.permute.xlu0 %4169 }
0x23f2   :  { %v7741_v56 = vadd.f32 %v4170_v25, %v4162_v2  ;;  %v8283_v25 = vld [vmem:[#allocation18_spill] sm:$0xff] }
0x23f4   :  { %5549 = vtanh.f32 %v7741_v56 }
0x2401   :  { %v5550_v44 = vpop.eup %5549  ;;  %v4276_v60 = vpop.permute.xlu1 %4275 }
0x2402   :  { %4175 = vrot.lane.b32.xlu0 %v5550_v44, %s5781_s28  ;;  %v7746_v58 = vadd.f32 %v4276_v60, %v4268_v33  ;;  %v483_v44 = vadd.f32 %v8283_v25, %v6386_v3  ;;  %v8286_v25 = vld [vmem:[#allocation15_spill] sm:$0xff] }
0x2404   :  { %5551 = vtanh.f32 %v7746_v58 }
0x2405   :  { %5553 = vpow2.f32 %v5080_v54 }
0x2406   :  { %5555 = vpow2.f32 %v5083_v0 }
0x2411   :  { %v5552_v38 = vpop.eup %5551 }
0x2412   :  { %4281 = vrot.lane.b32.xlu1 %v5552_v38, %s5781_s28  ;;  %v5554_v37 = vpop.eup %5553 }
0x2413   :  { %v4156_v18 = vadd.f32 1.0, %v5554_v37  ;;  %v5556_v21 = vpop.eup %5555 }
0x2414   :  { %v4262_v23 = vadd.f32 1.0, %v5556_v21 }
0x2415   :  { %5557 = vrcp.f32 %v4156_v18 }
0x2416   :  { %5559 = vrcp.f32 %v4262_v23 }
0x2422   :  { %v5558_v1 = vpop.eup %5557 }
0x2474   :  { %v4176_v6 = vpop.permute.xlu0 %4175 }
0x2475   :  { %v7750_v4 = vmul.f32 %v5558_v1, %v4176_v6 }
0x2477   :  { %5084 = vmatmul.mubr.msk.f32.vlgmr.msra.gmra.mxu0 %vm655_vm1, %v7750_v4 }
0x2478   :  { %4545 = vmatpush1.msra.mxu0 %v7624_v12  ;;  %4592 = vmatprep.mubr.f32.mxu0 %v8212_v19  ;;  %v5694_v12 = vld [vmem:[%s8117_s2 + $0x8] sm:$0xff] }
0x2479   :  { %4546 = vmatprep.subr.mxu0 %v7631_v45  ;;  %v5695_v45 = vld [vmem:[%s8117_s2] sm:$0xff] }
0x247a   :  { %4547 = vmatpush1.msra.mxu0 %v7637_v26  ;;  %v5560_v26 = vpop.eup %5559 }
0x247b   :  { %4548 = vmatprep.subr.mxu0 %v7643_v36 }
0x247c   :  { %4549 = vmatpush1.msra.mxu0 %v7649_v31 }
0x247d   :  { %4550 = vmatprep.subr.mxu0 %v7655_v35  ;;  %v5696_v35 = vld [vmem:[%s8120_s5 + $0x70] sm:$0xff] }
0x247e   :  { %4551 = vmatpush1.msra.mxu0 %v7661_v7  ;;  %v5697_v7 = vld [vmem:[%s8120_s5 + $0x68] sm:$0xff] }
0x247f   :  { %4552 = vmatprep.subr.mxu0 %v7667_v32  ;;  %v5698_v32 = vld [vmem:[%s8120_s5 + $0x60] sm:$0xff] }
0x2480   :  { %4553 = vmatpush1.msra.mxu0 %v7673_v48  ;;  %v5699_v48 = vld [vmem:[%s8120_s5 + $0x58] sm:$0xff] }
0x2481   :  { %4554 = vmatprep.subr.mxu0 %v7679_v5  ;;  %v5700_v5 = vld [vmem:[%s8120_s5 + $0x50] sm:$0xff] }
0x2482   :  { %4555 = vmatpush1.msra.mxu0 %v7685_v55  ;;  %v5701_v55 = vld [vmem:[%s8120_s5 + $0x48] sm:$0xff] }
0x2483   :  { %4556 = vmatprep.subr.mxu0 %v7691_v61  ;;  %v5702_v61 = vld [vmem:[%s8120_s5 + $0x40] sm:$0xff] }
0x2484   :  { %4557 = vmatpush1.msra.mxu0 %v7697_v17  ;;  %v4282_v36 = vpop.permute.xlu1 %4281  ;;  %v5703_v17 = vld [vmem:[%s8120_s5 + $0x38] sm:$0xff] }
0x2485   :  { %4558 = vmatprep.subr.mxu0 %v5694_v12  ;;  %v7775_v31 = vmul.f32 %v5560_v26, %v4282_v36 }
0x2486   :  { %4559 = vmatpush1.msra.mxu0 %v5695_v45 }
0x2487   :  { %5122 = vmatprep.subr.mxu0 %v8212_v19  ;;  %5087 = vmatmul.mubr.msk.f32.vlgmr.msra.gmra.mxu1 %vm655_vm1, %v7775_v31 }
0x2488   :  { %4651 = vmatpush1.msra.mxu1 %v5696_v35  ;;  %4698 = vmatprep.mubr.f32.mxu1 %v8212_v19 }
0x2489   :  { %4652 = vmatprep.subr.mxu1 %v5697_v7 }
0x248a   :  { %4653 = vmatpush1.msra.mxu1 %v5698_v32 }
0x248b   :  { %4654 = vmatprep.subr.mxu1 %v5699_v48 }
0x248c   :  { %4655 = vmatpush1.msra.mxu1 %v5700_v5 }
0x248d   :  { %4656 = vmatprep.subr.mxu1 %v5701_v55 }
0x248e   :  { %4657 = vmatpush1.msra.mxu1 %v5702_v61 }
0x248f   :  { %4658 = vmatprep.subr.mxu1 %v5703_v17 }
0x2490   :  { %4659 = vmatpush1.msra.mxu1 %v5704_v24 }
0x2491   :  { %4660 = vmatprep.subr.mxu1 %v5705_v43 }
0x2492   :  { %4661 = vmatpush1.msra.mxu1 %v5706_v50 }
0x2493   :  { %4662 = vmatprep.subr.mxu1 %v5707_v51 }
0x2494   :  { %4663 = vmatpush1.msra.mxu1 %v5708_v46 }
0x2495   :  { %4664 = vmatprep.subr.mxu1 %v5709_v39 }
0x2496   :  { %4665 = vmatpush1.msra.mxu1 %v5710_v14 }
0x2497   :  { %5131 = vmatprep.subr.mxu1 %v8212_v19 }
0x2537   :  { %v4368_v13 = vpop.f32.mrf.mxu0 }
0x2538   :  { %v4373_v29 = vadd.f32 %v4368_v13, %v344_v10 }
0x2539   :  { %v4370_v20 = vpop.f32.mrf.mxu0 }
0x253a   :  { %v4374_v53 = vadd.f32 %v4370_v20, %v346_v57  ;;  %v5085_v37 = vmul.f32 -1.442695, %v4373_v29  ;;  %v8284_v57 = vld [vmem:[#allocation70_spill] sm:$0xff] }
0x253b   :  { %v350_v29 = vadd.f32 %v8284_v57, %v6360_v62 }
0x253c   :  { %5561 = vtanh.f32 %v4374_v53  ;;  %v5086_v43 = vmul.f32 -1.442695, %v4374_v53  ;;  %v8285_v53 = vld [vmem:[#allocation71_spill] sm:$0xff] }
0x253d   :  { %v352_v9 = vadd.f32 %v8285_v53, %v6366_v28 }
0x2547   :  { %v4474_v2 = vpop.f32.mrf.mxu1 }
0x2548   :  { %v4479_v33 = vadd.f32 %v4474_v2, %v481_v34 }
0x2549   :  { %v5562_v63 = vpop.eup %5561  ;;  %v4476_v60 = vpop.f32.mrf.mxu1 }
0x254a   :  { %4390 = vrot.lane.b32.xlu0 %v5562_v63, %s5781_s28  ;;  %v4480_v38 = vadd.f32 %v4476_v60, %v483_v44  ;;  %v5088_v18 = vmul.f32 -1.442695, %v4479_v33  ;;  %v475_v44 = vadd.f32 %v8286_v25, %v6383_v11  ;;  %v7875_v11 = vld [vmem:[%s8122_s7] ss:$0 sm:$0xff] }
0x254c   :  { %5563 = vtanh.f32 %v4480_v38  ;;  %v5089_v50 = vmul.f32 -1.442695, %v4480_v38  ;;  %v8287_v38 = vld [vmem:[#allocation16_spill] sm:$0xff] }
0x254d   :  { %5565 = vpow2.f32 %v5085_v37 }
0x254e   :  { %5567 = vpow2.f32 %v5088_v18  ;;  %v8288_v18 = vld [vmem:[#allocation72_spill] sm:$0xff] }
0x2559   :  { %v5564_v54 = vpop.eup %5563 }
0x255a   :  { %4496 = vrot.lane.b32.xlu1 %v5564_v54, %s5781_s28  ;;  %v5566_v0 = vpop.eup %5565  ;;  %v477_v54 = vadd.f32 %v8287_v38, %v6386_v3 }
0x255b   :  { %v4381_v21 = vadd.f32 1.0, %v5566_v0  ;;  %v5568_v1 = vpop.eup %5567 }
0x255c   :  { %v4487_v45 = vadd.f32 1.0, %v5568_v1  ;;  %v7883_v1 = vld [vmem:[%s8123_s8] ss:$0 sm:$0xff] }
0x255d   :  { %5569 = vrcp.f32 %v4381_v21  ;;  %v871_v21 = vmul.f32 %v7875_v11, %v8288_v18  ;;  %v1567_v57 = vmul.f32 %v7883_v1, %v6699_v47 }
0x255e   :  { %5571 = vrcp.f32 %v4487_v45  ;;  %v1333_v45 = vmul.f32 %v7875_v11, %v6529_v27 }
0x255f   :  { %v872_v3 = vsel %vm655_vm1, %v871_v21, 0.0  ;;  %v8296_v21 = vld [vmem:[#allocation28_spill] sm:$0xff] }
0x256a   :  { %v5570_v6 = vpop.eup %5569 }
0x256b   :  { %v5572_v26 = vpop.eup %5571  ;;  %v4388_v7 = vmul.f32 %v5570_v6, %v7741_v56 }
0x256c   :  { %v4494_v55 = vmul.f32 %v5572_v26, %v7746_v58 }
0x25bc   :  { %v4391_v23 = vpop.permute.xlu0 %4390 }
0x25bd   :  { %v4393_v12 = vmul.f32 %v5570_v6, %v4391_v23  ;;  %v8289_v6 = vld [vmem:[#allocation73_spill] sm:$0xff] }
0x25be   :  { %v883_v23 = vmul.f32 %v7883_v1, %v8289_v6 }
0x25bf   :  { %4395 = vrot.lane.b32.xlu0 %v4393_v12, %s5781_s28 }
0x25c0   :  { %v884_v12 = vsel %vm655_vm1, %v883_v23, 0.0 }
0x25cc   :  { %v4497_v36 = vpop.permute.xlu1 %4496 }
0x25cd   :  { %v4499_v35 = vmul.f32 %v5572_v26, %v4497_v36  ;;  %v1334_v26 = vsel %vm655_vm1, %v1333_v45, 0.0  ;;  %v1561_v36 = vmul.f32 %v7875_v11, %v6668_v41 }
0x25cf   :  { %4501 = vrot.lane.b32.xlu1 %v4499_v35, %s5781_s28  ;;  %v1562_v35 = vsel %vm655_vm1, %v1561_v36, 0.0 }
0x2631   :  { %v4396_v32 = vpop.permute.xlu0 %4395 }
0x2632   :  { %v7839_v48 = vadd.f32 %v4396_v32, %v4388_v7 }
0x2634   :  { %5573 = vtanh.f32 %v7839_v48 }
0x2641   :  { %v5574_v5 = vpop.eup %5573  ;;  %v4502_v61 = vpop.permute.xlu1 %4501 }
0x2642   :  { %4401 = vrot.lane.b32.xlu0 %v5574_v5, %s5781_s28  ;;  %v7844_v17 = vadd.f32 %v4502_v61, %v4494_v55 }
0x2644   :  { %5575 = vtanh.f32 %v7844_v17 }
0x2645   :  { %5577 = vpow2.f32 %v5086_v43 }
0x2646   :  { %5579 = vpow2.f32 %v5089_v50 }
0x2651   :  { %v5576_v24 = vpop.eup %5575 }
0x2652   :  { %4507 = vrot.lane.b32.xlu1 %v5576_v24, %s5781_s28  ;;  %v5578_v56 = vpop.eup %5577 }
0x2653   :  { %v4382_v51 = vadd.f32 1.0, %v5578_v56  ;;  %v5580_v46 = vpop.eup %5579 }
0x2654   :  { %v4488_v58 = vadd.f32 1.0, %v5580_v46  ;;  %v1105_v46 = vmul.f32 %v7875_v11, %v6465_v59  ;;  %v1568_v59 = vsel %vm655_vm1, %v1567_v57, 0.0  ;;  %v8301_v57 = vld [vmem:[#allocation57_spill] sm:$0xff] }
0x2655   :  { %5581 = vrcp.f32 %v4382_v51 }
0x2656   :  { %5583 = vrcp.f32 %v4488_v58 }
0x2662   :  { %v5582_v39 = vpop.eup %5581 }
0x2663   :  { %v5584_v10 = vpop.eup %5583 }
0x26b4   :  { %v4402_v14 = vpop.permute.xlu0 %4401 }
0x26b5   :  { %v7848_v22 = vmul.f32 %v5582_v39, %v4402_v14  ;;  %v1106_v39 = vsel %vm655_vm1, %v1105_v46, 0.0  ;;  %v1111_v14 = vmul.f32 %v7883_v1, %v6486_v16  ;;  %v8299_v46 = vld [vmem:[#allocation61_spill] sm:$0xff] }
0x26b7   :  { %5090 = vmatmul.mubr.msk.f32.vlgmr.msra.gmra.mxu0 %vm655_vm1, %v7848_v22  ;;  %v1112_v58 = vsel %vm655_vm1, %v1111_v14, 0.0  ;;  %v8300_v14 = vld [vmem:[#allocation30_spill] sm:$0xff] }
0x26c4   :  { %v4508_v13 = vpop.permute.xlu1 %4507 }
0x26c5   :  { %v7852_v30 = vmul.f32 %v5584_v10, %v4508_v13  ;;  %v1339_v10 = vmul.f32 %v7883_v1, %v6620_v49  ;;  %v8291_v49 = vld [vmem:[#allocation68_spill] sm:$0xff] }
0x26c7   :  { %5093 = vmatmul.mubr.msk.f32.vlgmr.msra.gmra.mxu1 %vm655_vm1, %v7852_v30  ;;  %v1340_v13 = vsel %vm655_vm1, %v1339_v10, 0.0 }
0x2777   :  { %v4594_v20 = vpop.f32.mrf.mxu0 }
0x2778   :  { %v4599_v34 = vadd.f32 %v4594_v20, %v350_v29  ;;  %v1795_v29 = vmul.f32 %v7883_v1, %v6838_v15  ;;  %v8290_v20 = vld [vmem:[#allocation22_spill] sm:$0xff]  ;;  %v8292_v15 = vld [vmem:[#allocation20_spill] sm:$0xff] }
0x2779   :  { %v4596_v63 = vpop.f32.mrf.mxu0  ;;  %v2023_v53 = vmul.f32 %v7883_v1, %v8290_v20  ;;  %v2017_v25 = vmul.f32 %v7875_v11, %v8292_v15  ;;  %v8302_v20 = vld [vmem:[#allocation34_spill] sm:$0xff] }
0x277a   :  { %v7860_v2 = vadd.f32 %v4596_v63, %v352_v9  ;;  %v5091_v7 = vmul.f32 -1.442695, %v4599_v34  ;;  %v1796_v16 = vsel %vm655_vm1, %v1795_v29, 0.0  ;;  %v1789_v9 = vmul.f32 %v7875_v11, %v8291_v49 }
0x277b   :  { %v2024_v34 = vsel %vm655_vm1, %v2023_v53, 0.0  ;;  %v3386_v53 = vmul.f32 %v7883_v1, %v8302_v20  ;;  %v4866_v20 = vld [vmem:[%s8127_s12 + $0x78] sm:$0xff] }
0x277c   :  { %5585 = vtanh.f32 %v7860_v2  ;;  %v1790_v63 = vsel %vm655_vm1, %v1789_v9, 0.0  ;;  %5132 = vmatpush3.msra.mxu1 %v4866_v20 }
0x277d   :  { %5133 = vmatprep.subr.mxu1 %v8212_v19 }
0x2787   :  { %v4700_v60 = vpop.f32.mrf.mxu1 }
0x2788   :  { %v4705_v37 = vadd.f32 %v4700_v60, %v475_v44  ;;  %v2018_v44 = vsel %vm655_vm1, %v2017_v25, 0.0  ;;  %v3387_v25 = vsel %vm655_vm1, %v3386_v53, 0.0  ;;  %v4865_v53 = vld [vmem:[%s8127_s12 + $0x70] sm:$0xff] }
0x2789   :  { %v5586_v33 = vpop.eup %5585  ;;  %v4702_v62 = vpop.f32.mrf.mxu1  ;;  %5134 = vmatpush3.msra.mxu1 %v4865_v53 }
0x278a   :  { %4616 = vrot.lane.b32.xlu0 %v5586_v33, %s5781_s28  ;;  %v7868_v0 = vadd.f32 %v4702_v62, %v477_v54  ;;  %v5094_v5 = vmul.f32 -1.442695, %v4705_v37  ;;  %v8293_v33 = vld [vmem:[#allocation63_spill] sm:$0xff]  ;;  %v8294_v54 = vld [vmem:[#allocation24_spill] sm:$0xff]  ;;  %5135 = vmatprep.subr.mxu1 %v8212_v19 }
0x278b   :  { %v2245_v60 = vmul.f32 %v7875_v11, %v8293_v33  ;;  %v2473_v37 = vmul.f32 %v7875_v11, %v8294_v54  ;;  %v8295_v62 = vld [vmem:[#allocation59_spill] sm:$0xff]  ;;  %v8305_v33 = vld [vmem:[#allocation32_spill] sm:$0xff] }
0x278c   :  { %5587 = vtanh.f32 %v7868_v0 }
0x278d   :  { %5589 = vpow2.f32 %v5091_v7  ;;  %v2246_v38 = vsel %vm655_vm1, %v2245_v60, 0.0  ;;  %v2474_v18 = vsel %vm655_vm1, %v2473_v37, 0.0  ;;  %v3381_v60 = vmul.f32 %v7875_v11, %v8305_v33 }
0x278e   :  { %5591 = vpow2.f32 %v5094_v5 }
0x2799   :  { %v5588_v28 = vpop.eup %5587 }
0x279a   :  { %4722 = vrot.lane.b32.xlu1 %v5588_v28, %s5781_s28  ;;  %v5590_v32 = vpop.eup %5589  ;;  %v2701_v28 = vmul.f32 %v7875_v11, %v8295_v62 }
0x279b   :  { %v4607_v55 = vadd.f32 1.0, %v5590_v32  ;;  %v5592_v61 = vpop.eup %5591 }
0x279c   :  { %v4713_v56 = vadd.f32 1.0, %v5592_v61  ;;  %v2702_v6 = vsel %vm655_vm1, %v2701_v28, 0.0  ;;  %v8306_v28 = vld [vmem:[#allocation51_spill] sm:$0xff] }
0x279d   :  { %5593 = vrcp.f32 %v4607_v55 }
0x279e   :  { %5595 = vrcp.f32 %v4713_v56  ;;  %v8298_v56 = vld [vmem:[#allocation26_spill] sm:$0xff] }
0x27a9   :  { %873 = vadd.xlane.f32.xlu0 %v872_v3  ;;  %v2929_v3 = vmul.f32 %v7875_v11, %v8296_v21  ;;  %v4064_v21 = vmul.f32 %v7883_v1, %v7705_v8 }
0x27aa   :  { %v5594_v24 = vpop.eup %5593 }
0x27ab   :  { %v5596_v41 = vpop.eup %5595  ;;  %v2930_v23 = vsel %vm655_vm1, %v2929_v3, 0.0  ;;  %v4614_v45 = vmul.f32 %v5594_v24, %v7839_v48  ;;  %v8297_v48 = vld [vmem:[#allocation65_spill] sm:$0xff]  ;;  %v3382_v3 = vsel %vm655_vm1, %v3381_v60, 0.0 }
0x27ac   :  { %v4720_v5 = vmul.f32 %v5596_v41, %v7844_v17  ;;  %v2707_v17 = vmul.f32 %v7883_v1, %v8299_v46 }
0x27ae   :  { %v2708_v10 = vsel %vm655_vm1, %v2707_v17, 0.0 }
0x27be   :  { %885 = vadd.xlane.f32.xlu1 %v884_v12 }
0x27c2   :  { %1335 = vadd.xlane.f32.xlu1 %v1334_v26 }
0x27c6   :  { %1563 = vadd.xlane.f32.xlu1 %v1562_v35 }
0x27fc   :  { %v4617_v27 = vpop.permute.xlu0 %4616 }
0x27fd   :  { %v4619_v43 = vmul.f32 %v5594_v24, %v4617_v27  ;;  %v5782_v27 = vmov 0   ;;  %v2251_v24 = vmul.f32 %v7883_v1, %v8297_v48 }
0x27fe   :  { %5175 = vset.pattern.permute.xlu1 %v5782_v27  ;;  %5176 = vset.pattern.permute.xlu0 %v5782_v27 }
0x27ff   :  { %4621 = vrot.lane.b32.xlu0 %v4619_v43, %s5781_s28 }
0x280c   :  { %v4723_v50 = vpop.permute.xlu1 %4722 }
0x280d   :  { %v4725_v51 = vmul.f32 %v5596_v41, %v4723_v50  ;;  %v2479_v50 = vmul.f32 %v7883_v1, %v8298_v56 }
0x280f   :  { %4727 = vrot.lane.b32.xlu1 %v4725_v51, %s5781_s28  ;;  %v2252_v51 = vsel %vm655_vm1, %v2251_v24, 0.0  ;;  %v2480_v41 = vsel %vm655_vm1, %v2479_v50, 0.0  ;;  %v5095_v24 = vmul.f32 -1.442695, %v7868_v0 }
0x281e   :  { %1107 = vadd.xlane.f32.xlu0 %v1106_v39 }
0x2822   :  { %1113 = vadd.xlane.f32.xlu0 %v1112_v58  ;;  %v2934_v58 = vmul.f32 %v7883_v1, %v8300_v14 }
0x2824   :  { %v2935_v29 = vsel %vm655_vm1, %v2934_v58, 0.0 }
0x2826   :  { %1341 = vadd.xlane.f32.xlu0 %v1340_v13 }
0x282a   :  { %1569 = vadd.xlane.f32.xlu0 %v1568_v59  ;;  %v3160_v59 = vmul.f32 %v7883_v1, %v8301_v57 }
0x282c   :  { %v3161_v49 = vsel %vm655_vm1, %v3160_v59, 0.0  ;;  %v4764_v59 = vld [vmem:[%s8125_s10 + $0x10] sm:$0x3] }
0x282e   :  { %1797 = vadd.xlane.f32.xlu0 %v1796_v16 }
0x2832   :  { %2025 = vadd.xlane.f32.xlu0 %v2024_v34  ;;  %v874_v47 = vpop.xlane.xlu0 %873  ;;  %v8303_v34 = vld [vmem:[#allocation55_spill] sm:$0xff] }
0x2833   :  { %876 = vst.msk [vmem:[#allocation4] sm:$0xff] %vm8151_vm2, %v874_v47  ;;  %1791 = vadd.xlane.f32.xlu1 %v1790_v63  ;;  %v3155_v47 = vmul.f32 %v7875_v11, %v8303_v34  ;;  %v8304_v63 = vld [vmem:[#allocation53_spill] sm:$0xff]  ;;  %vm2711_vm2 = vcmask 80968  }
0x2834   :  { %v3612_v15 = vmul.f32 %v7883_v1, %v8304_v63  ;;  %v4863_v34 = vld [vmem:[%s8127_s12 + $0x60] sm:$0xff]  ;;  %v4862_v63 = vld [vmem:[%s8127_s12 + $0x58] sm:$0xff] }
0x2835   :  { %v3156_v54 = vsel %vm655_vm1, %v3155_v47, 0.0 }
0x2836   :  { %v3613_v37 = vsel %vm655_vm1, %v3612_v15, 0.0  ;;  %v4861_v15 = vld [vmem:[%s8127_s12 + $0x50] sm:$0xff] }
0x2837   :  { %2019 = vadd.xlane.f32.xlu1 %v2018_v44 }
0x283b   :  { %2247 = vadd.xlane.f32.xlu1 %v2246_v38  ;;  %v3838_v38 = vmul.f32 %v7883_v1, %v7574_v40 }
0x283d   :  { %v3839_v40 = vsel %vm655_vm1, %v3838_v38, 0.0 }
0x283f   :  { %2475 = vadd.xlane.f32.xlu1 %v2474_v18  ;;  %v3607_v18 = vmul.f32 %v7875_v11, %v8306_v28 }
0x2841   :  { %v3608_v8 = vsel %vm655_vm1, %v3607_v18, 0.0 }
0x2843   :  { %2703 = vadd.xlane.f32.xlu1 %v2702_v6 }
0x2847   :  { %v886_v12 = vpop.xlane.xlu1 %885  ;;  %2931 = vadd.xlane.f32.xlu1 %v2930_v23  ;;  %v3833_v23 = vmul.f32 %v7875_v11, %v7553_v52 }
0x2848   :  { %888 = vst.msk [vmem:[#allocation5] sm:$0xff] %vm8152_vm3, %v886_v12  ;;  %v4290_v12 = vmul.f32 %v7883_v1, %v7775_v31  ;;  %vm4776_vm3 = vcmask 1041408  }
0x2849   :  { %v3834_v52 = vsel %vm655_vm1, %v3833_v23, 0.0  ;;  %5123 = vmatpush3.msk.msra.mxu0 %vm4776_vm3, %v4764_v59  ;;  %vm2483_vm3 = vcmask 89168  }
0x284a   :  { %v4291_v31 = vsel %vm655_vm1, %v4290_v12, 0.0  ;;  %5124 = vmatprep.subr.mxu0 %v8212_v19 }
0x284b   :  { %v1336_v35 = vpop.xlane.xlu1 %1335 }
0x284f   :  { %v1564_v7 = vpop.xlane.xlu1 %1563 }
0x2871   :  { %v4622_v26 = vpop.permute.xlu0 %4621 }
0x2872   :  { %v4624_v36 = vadd.f32 %v4622_v26, %v4614_v45  ;;  %v4065_v45 = vsel %vm655_vm1, %v4064_v21, 0.0 }
0x2874   :  { %5597 = vtanh.f32 %v4624_v36  ;;  %v4059_v36 = vmul.f32 %v7875_v11, %v7617_v42 }
0x2876   :  { %v4060_v42 = vsel %vm655_vm1, %v4059_v36, 0.0 }
0x2881   :  { %v5598_v32 = vpop.eup %5597  ;;  %v4728_v55 = vpop.permute.xlu1 %4727 }
0x2882   :  { %4627 = vrot.lane.b32.xlu0 %v5598_v32, %s5781_s28  ;;  %v4730_v61 = vadd.f32 %v4728_v55, %v4720_v5  ;;  %v4285_v32 = vmul.f32 %v7875_v11, %v7750_v4  ;;  %v4511_v55 = vmul.f32 %v7875_v11, %v7848_v22  ;;  %v5092_v4 = vmul.f32 -1.442695, %v7860_v2 }
0x2884   :  { %5599 = vtanh.f32 %v4730_v61  ;;  %v4286_v61 = vsel %vm655_vm1, %v4285_v32, 0.0  ;;  %v4858_v32 = vld [vmem:[%s8127_s12 + $0x38] sm:$0xff] }
0x2885   :  { %5601 = vpow2.f32 %v5092_v4  ;;  %v4852_v4 = vld [vmem:[%s8127_s12 + $0x8] sm:$0xff] }
0x2886   :  { %5603 = vpow2.f32 %v5095_v24 }
0x2891   :  { %v5600_v43 = vpop.eup %5599 }
0x2892   :  { %4733 = vrot.lane.b32.xlu1 %v5600_v43, %s5781_s28  ;;  %v4512_v43 = vsel %vm655_vm1, %v4511_v55, 0.0  ;;  %v5602_v22 = vpop.eup %5601  ;;  %v4854_v55 = vld [vmem:[%s8127_s12 + $0x18] sm:$0xff] }
0x2893   :  { %v4608_v56 = vadd.f32 1.0, %v5602_v22  ;;  %v5604_v50 = vpop.eup %5603 }
0x2894   :  { %v4714_v17 = vadd.f32 1.0, %v5604_v50  ;;  %v5100_v50 = vld [vmem:[#allocation7] ss:$0 sm:$0xff] }
0x2895   :  { %5605 = vrcp.f32 %v4608_v56 }
0x2896   :  { %5607 = vrcp.f32 %v4714_v17 }
0x28a1   :  { %2253 = vadd.xlane.f32.xlu0 %v2252_v51 }
0x28a2   :  { %v5606_v51 = vpop.eup %5605 }
0x28a3   :  { %v5608_v14 = vpop.eup %5607 }
0x28a5   :  { %2481 = vadd.xlane.f32.xlu0 %v2480_v41 }
0x28a7   :  { %v1108_v39 = vpop.xlane.xlu0 %1107 }
0x28a8   :  { %1110 = vst.msk [vmem:[#allocation4] sm:$0xff] %vm1109_vm4, %v1108_v39 }
0x28a9   :  { %1338 = vst.msk [vmem:[#allocation4] sm:$0xff] %vm1337_vm5, %v1336_v35  ;;  %2709 = vadd.xlane.f32.xlu0 %v2708_v10  ;;  %v4516_v35 = vmul.f32 %v7883_v1, %v7852_v30 }
0x28aa   :  { %1566 = vst.msk [vmem:[#allocation4] sm:$0xff] %vm1565_vm6, %v1564_v7 }
0x28ab   :  { %v1114_v13 = vpop.xlane.xlu0 %1113  ;;  %v4517_v5 = vsel %vm655_vm1, %v4516_v35, 0.0 }
0x28ac   :  { %1116 = vst.msk [vmem:[#allocation5] sm:$0xff] %vm8153_vm7, %v1114_v13  ;;  %v5096_v13 = vld [vmem:[#allocation6] ss:$0 sm:$0xff]  ;;  %vm5783_vm7 = vmmov 0  }
0x28ad   :  { %2936 = vadd.xlane.f32.xlu0 %v2935_v29  ;;  %5128 = vmatprep.mubr.msk.f32.mxu0 %vm5783_vm7, %v8212_v19 }
0x28ae   :  { %5163 = vmatprep.mubr.msk.f32.mxu1 %vm5783_vm7, %v8212_v19  ;;  %vm8309_vm7 = vcmask 7168  }
0x28af   :  { %v1342_v16 = vpop.xlane.xlu0 %1341 }
0x28b0   :  { %1344 = vst.msk [vmem:[#allocation5] sm:$0xff] %vm1343_vm8, %v1342_v16 }
0x28b1   :  { %3162 = vadd.xlane.f32.xlu0 %v3161_v49 }
0x28b3   :  { %v1570_v9 = vpop.xlane.xlu0 %1569 }
0x28b4   :  { %1572 = vst.msk [vmem:[#allocation5] sm:$0xff] %vm1571_vm9, %v1570_v9  ;;  %v4864_v9 = vld [vmem:[%s8127_s12 + $0x68] sm:$0xff] }
0x28b5   :  { %3388 = vadd.xlane.f32.xlu0 %v3387_v25  ;;  %5136 = vmatpush3.msra.mxu1 %v4864_v9 }
0x28b6   :  { %3157 = vadd.xlane.f32.xlu1 %v3156_v54  ;;  %5137 = vmatprep.subr.mxu1 %v8212_v19 }
0x28b7   :  { %v1798_v44 = vpop.xlane.xlu0 %1797  ;;  %5138 = vmatpush3.msra.mxu1 %v4863_v34 }
0x28b8   :  { %1800 = vst.msk [vmem:[#allocation5] sm:$0xff] %vm1799_vm10, %v1798_v44  ;;  %5139 = vmatprep.subr.mxu1 %v8212_v19  ;;  %v4860_v44 = vld [vmem:[%s8127_s12 + $0x48] sm:$0xff] }
0x28b9   :  { %3614 = vadd.xlane.f32.xlu0 %v3613_v37  ;;  %5140 = vmatpush3.msra.mxu1 %v4862_v63 }
0x28ba   :  { %3383 = vadd.xlane.f32.xlu1 %v3382_v3  ;;  %5141 = vmatprep.subr.mxu1 %v8212_v19 }
0x28bb   :  { %v2026_v62 = vpop.xlane.xlu0 %2025  ;;  %5142 = vmatpush3.msra.mxu1 %v4861_v15 }
0x28bc   :  { %2028 = vst.msk [vmem:[#allocation5] sm:$0xff] %vm2027_vm11, %v2026_v62  ;;  %v1792_v6 = vpop.xlane.xlu1 %1791  ;;  %5143 = vmatprep.subr.mxu1 %v8212_v19 }
0x28bd   :  { %3840 = vadd.xlane.f32.xlu0 %v3839_v40  ;;  %1794 = vst.msk [vmem:[#allocation4] sm:$0xff] %vm1793_vm12, %v1792_v6  ;;  %5144 = vmatpush3.msra.mxu1 %v4860_v44 }
0x28be   :  { %3609 = vadd.xlane.f32.xlu1 %v3608_v8  ;;  %5145 = vmatprep.subr.mxu1 %v8212_v19 }
0x28c0   :  { %v2020_v26 = vpop.xlane.xlu1 %2019 }
0x28c1   :  { %4066 = vadd.xlane.f32.xlu0 %v4065_v45  ;;  %2022 = vst.msk [vmem:[#allocation4] sm:$0xff] %vm2021_vm13, %v2020_v26 }
0x28c2   :  { %3835 = vadd.xlane.f32.xlu1 %v3834_v52 }
0x28c4   :  { %v2248_v7 = vpop.xlane.xlu1 %2247 }
0x28c5   :  { %4292 = vadd.xlane.f32.xlu0 %v4291_v31  ;;  %2250 = vst.msk [vmem:[#allocation4] sm:$0xff] %vm2249_vm14, %v2248_v7  ;;  %v4859_v7 = vld [vmem:[%s8127_s12 + $0x40] sm:$0xff] }
0x28c6   :  { %4061 = vadd.xlane.f32.xlu1 %v4060_v42  ;;  %5146 = vmatpush3.msra.mxu1 %v4859_v7  ;;  %v4857_v42 = vld [vmem:[%s8127_s12 + $0x30] sm:$0xff] }
0x28c7   :  { %5147 = vmatprep.subr.mxu1 %v8212_v19 }
0x28c8   :  { %v2476_v30 = vpop.xlane.xlu1 %2475  ;;  %5148 = vmatpush3.msra.mxu1 %v4858_v32 }
0x28c9   :  { %4518 = vadd.xlane.f32.xlu0 %v4517_v5  ;;  %2478 = vst.msk [vmem:[#allocation4] sm:$0xff] %vm2477_vm15, %v2476_v30  ;;  %5149 = vmatprep.subr.mxu1 %v8212_v19  ;;  %v4856_v5 = vld [vmem:[%s8127_s12 + $0x28] sm:$0xff]  ;;  %v4855_v30 = vld [vmem:[%s8127_s12 + $0x20] sm:$0xff] }
0x28ca   :  { %4287 = vadd.xlane.f32.xlu1 %v4286_v61  ;;  %5150 = vmatpush3.msra.mxu1 %v4857_v42  ;;  %v4853_v61 = vld [vmem:[%s8127_s12 + $0x10] sm:$0xff] }
0x28cb   :  { %5151 = vmatprep.subr.mxu1 %v8212_v19 }
0x28cc   :  { %v2704_v27 = vpop.xlane.xlu1 %2703  ;;  %5152 = vmatpush3.msra.mxu1 %v4856_v5 }
0x28cd   :  { %2706 = vst.msk [vmem:[#allocation4] sm:$0xff] %vm2705_vm0, %v2704_v27  ;;  %5153 = vmatprep.subr.mxu1 %v8212_v19  ;;  %v4851_v27 = vld [vmem:[%s8127_s12] sm:$0xff] }
0x28ce   :  { %4513 = vadd.xlane.f32.xlu1 %v4512_v43  ;;  %5154 = vmatpush3.msra.mxu1 %v4855_v30  ;;  %v5097_v43 = vld [vmem:[%s8126_s11] ss:$0 sm:$0xff] }
0x28cf   :  { %5155 = vmatprep.subr.mxu1 %v8212_v19 }
0x28d0   :  { %v2932_v48 = vpop.xlane.xlu1 %2931  ;;  %5156 = vmatpush3.msra.mxu1 %v4854_v55 }
0x28d1   :  { %2933 = vst.msk [vmem:[#allocation4] sm:$0xff] %vm2711_vm2, %v2932_v48  ;;  %5157 = vmatprep.subr.mxu1 %v8212_v19 }
0x28d2   :  { %5158 = vmatpush3.msra.mxu1 %v4853_v61 }
0x28d3   :  { %5159 = vmatprep.subr.mxu1 %v8212_v19 }
0x28d4   :  { %5160 = vmatpush3.msra.mxu1 %v4852_v4 }
0x28d5   :  { %5161 = vmatprep.subr.mxu1 %v8212_v19 }
0x28d6   :  { %5162 = vmatpush3.msra.mxu1 %v4851_v27 }
0x28f4   :  { %v4628_v2 = vpop.permute.xlu0 %4627 }
0x28f5   :  { %v4630_v46 = vmul.f32 %v5606_v51, %v4628_v2 }
0x28f7   :  { %v4737_v41 = vmul.f32 %v7875_v11, %v4630_v46  ;;  %v4763_v11 = vld [vmem:[%s8125_s10 + $0x8] sm:$0xff] }
0x28f8   :  { %5125 = vmatpush3.msra.mxu0 %v4763_v11 }
0x28f9   :  { %v4738_v39 = vsel %vm655_vm1, %v4737_v41, 0.0  ;;  %5126 = vmatprep.subr.mxu0 %v8212_v19 }
0x28fa   :  { %4739 = vadd.xlane.f32.xlu1 %v4738_v39 }
0x2904   :  { %v4734_v58 = vpop.permute.xlu1 %4733 }
0x2905   :  { %v4736_v10 = vmul.f32 %v5608_v14, %v4734_v58 }
0x2907   :  { %v4742_v0 = vmul.f32 %v7883_v1, %v4736_v10  ;;  %v4762_v1 = vld [vmem:[%s8125_s10] sm:$0xff] }
0x2908   :  { %5127 = vmatpush3.msra.mxu0 %v4762_v1 }
0x2909   :  { %v4743_v57 = vsel %vm655_vm1, %v4742_v0, 0.0  ;;  %vm2255_vm1 = vcmask 97368  }
0x290a   :  { %4744 = vadd.xlane.f32.xlu0 %v4743_v57 }
0x290b   :  { %4757 = vperm.xlu1 %5175, %v5096_v13  }
0x292a   :  { %v2254_v29 = vpop.xlane.xlu0 %2253 }
0x292b   :  { %2256 = vst.msk [vmem:[#allocation5] sm:$0xff] %vm2255_vm1, %v2254_v29 }
0x292e   :  { %v2482_v16 = vpop.xlane.xlu0 %2481 }
0x292f   :  { %2484 = vst.msk [vmem:[#allocation5] sm:$0xff] %vm2483_vm3, %v2482_v16 }
0x2932   :  { %v2710_v49 = vpop.xlane.xlu0 %2709 }
0x2933   :  { %2712 = vst.msk [vmem:[#allocation5] sm:$0xff] %vm2711_vm2, %v2710_v49  ;;  %vm8307_vm2 = vcmask 138368  }
0x2936   :  { %v2937_v47 = vpop.xlane.xlu0 %2936 }
0x2937   :  { %2938 = vst.msk [vmem:[#allocation5] sm:$0xff] %vm2705_vm0, %v2937_v47 }
0x293a   :  { %v3163_v25 = vpop.xlane.xlu0 %3162 }
0x293b   :  { %3164 = vst.msk [vmem:[#allocation5] sm:$0xff] %vm2477_vm15, %v3163_v25 }
0x293e   :  { %v3389_v33 = vpop.xlane.xlu0 %3388 }
0x293f   :  { %3390 = vst.msk [vmem:[#allocation5] sm:$0xff] %vm2249_vm14, %v3389_v33  ;;  %v3158_v60 = vpop.xlane.xlu1 %3157 }
0x2940   :  { %3159 = vst.msk [vmem:[#allocation4] sm:$0xff] %vm2483_vm3, %v3158_v60 }
0x2942   :  { %v3615_v38 = vpop.xlane.xlu0 %3614 }
0x2943   :  { %3616 = vst.msk [vmem:[#allocation5] sm:$0xff] %vm2021_vm13, %v3615_v38  ;;  %v3384_v54 = vpop.xlane.xlu1 %3383 }
0x2944   :  { %3385 = vst.msk [vmem:[#allocation4] sm:$0xff] %vm2255_vm1, %v3384_v54 }
0x2946   :  { %v3841_v37 = vpop.xlane.xlu0 %3840 }
0x2947   :  { %3842 = vst.msk [vmem:[#allocation5] sm:$0xff] %vm1793_vm12, %v3841_v37  ;;  %v3610_v62 = vpop.xlane.xlu1 %3609 }
0x2948   :  { %3611 = vst.msk [vmem:[#allocation4] sm:$0xff] %vm2027_vm11, %v3610_v62 }
0x294a   :  { %v4067_v28 = vpop.xlane.xlu0 %4066 }
0x294b   :  { %4068 = vst.msk [vmem:[#allocation5] sm:$0xff] %vm1565_vm6, %v4067_v28  ;;  %v3836_v18 = vpop.xlane.xlu1 %3835  ;;  %vm8308_vm6 = vcmask 146568  }
0x294c   :  { %3837 = vst.msk [vmem:[#allocation4] sm:$0xff] %vm1799_vm10, %v3836_v18 }
0x294e   :  { %v4293_v21 = vpop.xlane.xlu0 %4292 }
0x294f   :  { %4294 = vst.msk [vmem:[#allocation5] sm:$0xff] %vm1337_vm5, %v4293_v21  ;;  %v4062_v3 = vpop.xlane.xlu1 %4061  ;;  %vm4772_vm5 = vcmask 146432  }
0x2950   :  { %4063 = vst.msk [vmem:[#allocation4] sm:$0xff] %vm1571_vm9, %v4062_v3 }
0x2952   :  { %v4519_v40 = vpop.xlane.xlu0 %4518 }
0x2953   :  { %4520 = vst.msk [vmem:[#allocation5] sm:$0xff] %vm1109_vm4, %v4519_v40  ;;  %v4288_v6 = vpop.xlane.xlu1 %4287  ;;  %vm8310_vm4 = vmmov %vm8309_vm7 }
0x2954   :  { %4289 = vst.msk [vmem:[#allocation4] sm:$0xff] %vm1343_vm8, %v4288_v6 }
0x2957   :  { %v4514_v23 = vpop.xlane.xlu1 %4513 }
0x2958   :  { %4515 = vst.msk [vmem:[#allocation4] sm:$0xff] %vm8307_vm2, %v4514_v23 }
0x2983   :  { %v4740_v12 = vpop.xlane.xlu1 %4739 }
0x2984   :  { %4741 = vst.msk [vmem:[#allocation4] sm:$0xff] %vm8308_vm6, %v4740_v12 }
0x2987   :  { %v4758_v26 = vpop.permute.xlu1 %4757 }
0x298b   :  { %v4747_v45 = vld [vmem:[#allocation4] sm:$0xff] }
0x2993   :  { %v4745_v8 = vpop.xlane.xlu0 %4744 }
0x2994   :  { %4746 = vst.msk [vmem:[#allocation5] sm:$0xff] %vm8309_vm7, %v4745_v8 }
0x299b   :  { %v4748_v36 = vld [vmem:[#allocation5] sm:$0xff] }
0x299c   :  { %v4749_v35 = vadd.f32 %v4748_v36, %v4747_v45 }
0x299e   :  { %v4760_v52 = vadd.f32 %v4758_v26, %v4749_v35 }
0x29a0   :  { %5609 = vtanh.f32 %v4760_v52 }
0x29ad   :  { %v5610_v31 = vpop.eup %5609 }
0x29ae   :  { %5129 = vmatmul.mubr.msk.f32.vlgmr.msra.gmra.mxu0 %vm4772_vm5, %v5610_v31 }
0x2a6e   :  { %v4846_v48 = vpop.f32.mrf.mxu0 }
0x2a6f   :  { %v4847_v22 = vadd.f32 %v5097_v43, %v4846_v48 }
0x2a70   :  { %v5130_v24 = vpop.f32.mrf.mxu0 }
0x2a71   :  { %5611 = vtanh.f32 %v4847_v22 }
0x2a7e   :  { %v5612_v56 = vpop.eup %5611 }
0x2a7f   :  { %5164 = vmatmul.mubr.f32.vlgmr.msra.gmra.mxu1 %v5612_v56 }
0x2b3f   :  { %v4940_v51 = vpop.f32.mrf.mxu1 }
0x2b40   :  { %v4941_v2 = vadd.f32 %v5100_v50, %v4940_v51 }
0x2b41   :  { %v5165_v46 = vpop.f32.mrf.mxu1 }
0x2b42   :  { %5613 = vtanh.f32 %v4941_v2 }
0x2b4f   :  { %v5614_v17 = vpop.eup %5613 }
0x2b50   :  { %4945 = vst.msk [vmem:[%s8128_s14] sm:$0xff] %vm8310_vm4, %v5614_v17 }
0x2b51   :  { %4950 = vsyncpa [#allocation9], 1 }
0x2b52   :  { %4951 = vsyncpa [#allocation11], 1 }

</bundles_post_ra>
